<compile_context>
chip_gen: v5e
topology: v5e:2x2
jax: 0.10.0
libtpu: 0.0.40
codegen_flags: <defaults>
</compile_context>

<pallas_src>
import numpy as np

import jax
import jax.numpy as jnp
from jax.experimental import pallas as pl
from jax.experimental.pallas import tpu as pltpu


# --------------------------------------------------------------------------
# The single fused kernel
# --------------------------------------------------------------------------

def _lgsc_kernel(
    x_ref,
    e1_rs, e1_bd, e1_bi,
    e2_rs, e2_bd, e2_bi,
    e3_rs, e3_bd, e3_bi,
    d3_rs, d3_bd, d3_bi,
    d2_rsa, d2_bda, d2_rsb, d2_bdb, d2_bi,
    d1_rsa, d1_bda, d1_rsb, d1_bdb, d1_bi,
    c1_rs, c1_bd, c1_bi,
    c2_rs, c2_bd, c2_bi,
    gap_rs, fc_bd, fc_bi,
    d3_out, d2_out, d1_out, clf_out,
):
    f32 = jnp.float32

    def gconv(act, rsel_ref, band_ref):
        # 3x3 conv with stride / zero-pad / (optional) 2x nearest upsample all
        # folded into the operands:  sum_dh (Rsel[dh] @ act) @ Band[dh].
        acc = None
        for dh in range(3):
            rows = jnp.dot(rsel_ref[dh], act, preferred_element_type=f32)
            term = jnp.dot(rows, band_ref[dh], preferred_element_type=f32)
            acc = term if acc is None else acc + term
        return acc

    def relu(v):
        return jnp.maximum(v, 0.0)

    x = x_ref[...]                                              # (N*16, 16*Cin)

    # EnCoder: multi-scale features.
    e1 = relu(gconv(x, e1_rs, e1_bd) + e1_bi[...])              # (N*16, 16*c1)
    e2 = relu(gconv(e1, e2_rs, e2_bd) + e2_bi[...])             # (N*8,   8*c2)
    e3 = relu(gconv(e2, e3_rs, e3_bd) + e3_bi[...])             # (N*4,   4*c3)

    # DeCoder: U-Net style; upsample + skip-concat folded into operands.
    d3 = relu(gconv(e3, d3_rs, d3_bd) + d3_bi[...])             # (N*4,   4*c2)
    d2 = relu(gconv(d3, d2_rsa, d2_bda)
              + gconv(e2, d2_rsb, d2_bdb) + d2_bi[...])         # (N*8,   8*c1)
    d1 = (gconv(d2, d1_rsa, d1_bda)
          + gconv(e1, d1_rsb, d1_bdb) + d1_bi[...])             # (N*16, 16*cin)

    # Residual spoof-cue add + auxiliary classifier (conv, conv, GAP, FC).
    s = x + d1
    c1f = relu(gconv(s, c1_rs, c1_bd) + c1_bi[...])             # (N*8,   8*c1)
    c2f = relu(gconv(c1f, c2_rs, c2_bd) + c2_bi[...])           # (N*4,   4*c2)
    pooled = jnp.dot(gap_rs[...], c2f, preferred_element_type=f32)   # (N, 4*c2)
    clf = jnp.dot(pooled, fc_bd[...], preferred_element_type=f32) + fc_bi[...]

    d3_out[...] = d3
    d2_out[...] = d2
    d1_out[...] = d1
    clf_out[...] = clf


def _full_spec(shape):
    nd = len(shape)
    return pl.BlockSpec(shape, lambda i, nd=nd: (0,) * nd)


def lgsc_forward(x_nchw, plan, shapes):
    """NCHW in / NCHW out; one pallas_call for the whole network."""
    n, cin, h, w = x_nchw.shape
    x2d = jnp.transpose(x_nchw, (0, 2, 3, 1)).reshape(n * h, w * cin)

    def flat(s):
        return (s[0] * s[1], s[2] * s[3])

    out_shape = (
        jax.ShapeDtypeStruct(flat(shapes["d3"]), jnp.float32),
        jax.ShapeDtypeStruct(flat(shapes["d2"]), jnp.float32),
        jax.ShapeDtypeStruct(flat(shapes["d1"]), jnp.float32),
        jax.ShapeDtypeStruct(shapes["clf"], jnp.float32),
    )
    operands = (x2d, *plan)

    d3f, d2f, d1f, clf = pl.pallas_call(
        _lgsc_kernel,
        grid=(1,),
        in_specs=[_full_spec(a.shape) for a in operands],
        out_specs=tuple(_full_spec(s.shape) for s in out_shape),
        out_shape=out_shape,
        compiler_params=pltpu.CompilerParams(
            dimension_semantics=("arbitrary",)),
    )(*operands)

    def to_nchw(flat2d, s):
        nn, hh, ww, cc = s
        return flat2d.reshape(nn, hh, ww, cc).transpose(0, 3, 1, 2)

    outs = (to_nchw(d3f, shapes["d3"]),
            to_nchw(d2f, shapes["d2"]),
            to_nchw(d1f, shapes["d1"]))
    return outs, clf


# --------------------------------------------------------------------------
# Parameter packing: build row-selection / banded-weight matrices (runs once,
# outside the jitted forward; pure host-side prep, no kernel work).
# --------------------------------------------------------------------------

def _plain_maps(size_in, size_out, stride):
    d = np.arange(3)[:, None]
    o = np.arange(size_out)[None, :]
    src = stride * o + d - 1                       # pad = 1, kernel = 3
    valid = (src >= 0) & (src < size_in)
    return np.clip(src, 0, size_in - 1), valid


def _ups_maps(size_small, size_out):
    # stride-1 conv applied to the 2x nearest-neighbour upsample of a
    # (size_small)-sized feature: upsampled index // 2 with pad-1 boundary.
    d = np.arange(3)[:, None]
    o = np.arange(size_out)[None, :]
    up = o + d - 1
    valid = (up >= 0) & (up < 2 * size_small)
    return np.clip(up, 0, 2 * size_small - 1) // 2, valid


def _row_select(src, valid, hi, n):
    # (3, n*Ho, n*Hi) block-diagonal (over batch) 0/1 row-selection matrices.
    ho = src.shape[1]
    r = np.zeros((3, ho, hi), np.float32)
    for d in range(3):
        o_idx = np.arange(ho)[valid[d]]
        r[d, o_idx, src[d, valid[d]]] = 1.0
    rfull = np.stack(
        [np.kron(np.eye(n, dtype=np.float32), r[d]) for d in range(3)])
    return jnp.asarray(rfull)


def _col_band(src, valid, wi, wgt):
    # Banded weight: B[dh][wi*Cin+ci, wo*Cout+co] = sum_dw W[dh,dw,ci,co].
    _, _, cin, cout = wgt.shape
    wo = src.shape[1]
    s = np.zeros((3, wi, wo), np.float32)
    for d in range(3):
        o_idx = np.arange(wo)[valid[d]]
        s[d, src[d, valid[d]], o_idx] = 1.0
    band = jnp.einsum("dqw,zdcf->zqcwf", jnp.asarray(s), wgt)
    return band.reshape(3, wi * cin, wo * cout)


def _bias_row(b, wo):
    return jnp.tile(b, wo).reshape(1, -1)


def pack_params(params, n=2, h=16, w=16):
    def conv_group(wgt_bias, hi, wi, stride):
        kw, kb = wgt_bias
        ho = (hi - 1) // stride + 1
        wo = (wi - 1) // stride + 1
        rsrc, rval = _plain_maps(hi, ho, stride)
        csrc, cval = _plain_maps(wi, wo, stride)
        ops = [_row_select(rsrc, rval, hi, n),
               _col_band(csrc, cval, wi, kw),
               _bias_row(kb, wo)]
        return ops, (ho, wo, int(kw.shape[-1]))

    def dual_group(wgt_bias, ca, hs, ws, hskip, wskip):
        # input a: (hs, ws, ca) decoder feature, consumed via 2x nearest
        #          upsample (folded into Rsel/Band);
        # input b: (hskip, wskip, cb) encoder skip, stride-1.
        kw, kb = wgt_bias
        kw_a, kw_b = kw[:, :, :ca, :], kw[:, :, ca:, :]
        ho, wo = 2 * hs, 2 * ws
        rsa, rva = _ups_maps(hs, ho)
        csa, cva = _ups_maps(ws, wo)
        rsb, rvb = _plain_maps(hskip, ho, 1)
        csb, cvb = _plain_maps(wskip, wo, 1)
        ops = [_row_select(rsa, rva, hs, n), _col_band(csa, cva, ws, kw_a),
               _row_select(rsb, rvb, hskip, n), _col_band(csb, cvb, wskip, kw_b),
               _bias_row(kb, wo)]
        return ops, (ho, wo, int(kw.shape[-1]))

    plan = []
    g, (h1, w1, _c1) = conv_group(params["enc1"], h, w, 1);        plan += g
    g, (h2, w2, _c2) = conv_group(params["enc2"], h1, w1, 2);      plan += g
    g, (h3, w3, _c3) = conv_group(params["enc3"], h2, w2, 2);      plan += g
    g, (hd3, wd3, cd3) = conv_group(params["dec3"], h3, w3, 1);    plan += g
    g, (hd2, wd2, cd2) = dual_group(params["dec2"], cd3, hd3, wd3, h2, w2)
    plan += g
    g, (hd1, wd1, cd1) = dual_group(params["dec1"], cd2, hd2, wd2, h1, w1)
    plan += g
    g, (hc1, wc1, _cc1) = conv_group(params["cls1"], hd1, wd1, 2); plan += g
    g, (hc2, wc2, _cc2) = conv_group(params["cls2"], hc1, wc1, 2); plan += g

    # Fused GAP + FC: clf = (Grow @ act) @ Hcol + b,  Grow averages rows per
    # sample, Hcol is the FC weight tiled over output columns / Wo.
    gap_r = jnp.asarray(np.kron(np.eye(n, dtype=np.float32),
                                np.full((1, hc2), 1.0 / hc2, np.float32)))
    fc_band = jnp.tile(params["fc_w"], (wc2, 1)) / wc2
    fc_bias = params["fc_b"].reshape(1, -1)
    plan += [gap_r, fc_band, fc_bias]

    shapes = {"d3": (n, hd3, wd3, cd3),
              "d2": (n, hd2, wd2, cd2),
              "d1": (n, hd1, wd1, cd1),
              "clf": (n, int(params["fc_w"].shape[-1]))}
    return plan, shapes


# --------------------------------------------------------------------------
# LGSC parameters (deterministic random init; pretrained weights unavailable)
# --------------------------------------------------------------------------

def init_params(key, cin=4, c1=8, c2=16, c3=16, ncls=2):
    ks = jax.random.split(key, 10)

    def conv_p(k, ci, co):
        scale = 0.1 / np.sqrt(9.0 * ci)
        w = jax.random.normal(k, (3, 3, ci, co), jnp.float32) * scale
        return w, jnp.zeros((co,), jnp.float32)

    return {
        "enc1": conv_p(ks[0], cin, c1),
        "enc2": conv_p(ks[1], c1, c2),
        "enc3": conv_p(ks[2], c2, c3),
        "dec3": conv_p(ks[3], c3, c2),
        "dec2": conv_p(ks[4], c2 + c2, c1),   # conv over concat([up(d3), e2])
        "dec1": conv_p(ks[5], c1 + c1, cin),  # conv over concat([up(d2), e1])
        "cls1": conv_p(ks[6], cin, c1),
        "cls2": conv_p(ks[7], c1, c2),
        "fc_w": jax.random.normal(ks[8], (c2, ncls), jnp.float32) * 0.1,
        "fc_b": jnp.zeros((ncls,), jnp.float32),
    }


# --------------------------------------------------------------------------

if __name__ == "__main__":
    x = jax.random.normal(jax.random.PRNGKey(0), (2, 4, 16, 16), jnp.float32)
    params = init_params(jax.random.PRNGKey(1), cin=4)
    plan, shapes = pack_params(params, n=2, h=16, w=16)

    fwd = jax.jit(lambda inp, p: lgsc_forward(inp, p, shapes))
    outs, clfo = fwd(x, plan)
    jax.block_until_ready((outs, clfo))

    assert outs[-1].shape == x.shape, outs[-1].shape
    assert clfo.shape == (2, 2), clfo.shape
    print("KERNEL_OK")
</pallas_src>

<mosaic_0001>
module attributes {stable_mosaic.version = 11 : i64} {
  func.func @_lgsc_kernel(%arg0: i32, %arg1: memref<32x64xf32, #tpu.memory_space<vmem>>, %arg2: memref<3x32x32xf32, #tpu.memory_space<vmem>>, %arg3: memref<3x64x128xf32, #tpu.memory_space<vmem>>, %arg4: memref<1x128xf32, #tpu.memory_space<vmem>>, %arg5: memref<3x16x32xf32, #tpu.memory_space<vmem>>, %arg6: memref<3x128x128xf32, #tpu.memory_space<vmem>>, %arg7: memref<1x128xf32, #tpu.memory_space<vmem>>, %arg8: memref<3x8x16xf32, #tpu.memory_space<vmem>>, %arg9: memref<3x128x64xf32, #tpu.memory_space<vmem>>, %arg10: memref<1x64xf32, #tpu.memory_space<vmem>>, %arg11: memref<3x8x8xf32, #tpu.memory_space<vmem>>, %arg12: memref<3x64x64xf32, #tpu.memory_space<vmem>>, %arg13: memref<1x64xf32, #tpu.memory_space<vmem>>, %arg14: memref<3x16x8xf32, #tpu.memory_space<vmem>>, %arg15: memref<3x64x64xf32, #tpu.memory_space<vmem>>, %arg16: memref<3x16x16xf32, #tpu.memory_space<vmem>>, %arg17: memref<3x128x64xf32, #tpu.memory_space<vmem>>, %arg18: memref<1x64xf32, #tpu.memory_space<vmem>>, %arg19: memref<3x32x16xf32, #tpu.memory_space<vmem>>, %arg20: memref<3x64x64xf32, #tpu.memory_space<vmem>>, %arg21: memref<3x32x32xf32, #tpu.memory_space<vmem>>, %arg22: memref<3x128x64xf32, #tpu.memory_space<vmem>>, %arg23: memref<1x64xf32, #tpu.memory_space<vmem>>, %arg24: memref<3x16x32xf32, #tpu.memory_space<vmem>>, %arg25: memref<3x64x64xf32, #tpu.memory_space<vmem>>, %arg26: memref<1x64xf32, #tpu.memory_space<vmem>>, %arg27: memref<3x8x16xf32, #tpu.memory_space<vmem>>, %arg28: memref<3x64x64xf32, #tpu.memory_space<vmem>>, %arg29: memref<1x64xf32, #tpu.memory_space<vmem>>, %arg30: memref<2x8xf32, #tpu.memory_space<vmem>>, %arg31: memref<64x2xf32, #tpu.memory_space<vmem>>, %arg32: memref<1x2xf32, #tpu.memory_space<vmem>>, %arg33: memref<8x64xf32, #tpu.memory_space<vmem>>, %arg34: memref<16x64xf32, #tpu.memory_space<vmem>>, %arg35: memref<32x64xf32, #tpu.memory_space<vmem>>, %arg36: memref<2x2xf32, #tpu.memory_space<vmem>>) attributes {dimension_semantics = [#tpu.dimension_semantics<arbitrary>], iteration_bounds = array<i64: 1>, scalar_prefetch = 0 : i64, scratch_operands = 0 : i64, tpu.core_type = #tpu.core_type<tc>, window_params = [{pipeline_mode = #tpu.pipeline_mode<synchronous>, transform_indices = @transform_0, window_bounds = array<i64: 32, 64>}, {pipeline_mode = #tpu.pipeline_mode<synchronous>, transform_indices = @transform_1, window_bounds = array<i64: 3, 32, 32>}, {pipeline_mode = #tpu.pipeline_mode<synchronous>, transform_indices = @transform_2, window_bounds = array<i64: 3, 64, 128>}, {pipeline_mode = #tpu.pipeline_mode<synchronous>, transform_indices = @transform_3, window_bounds = array<i64: 1, 128>}, {pipeline_mode = #tpu.pipeline_mode<synchronous>, transform_indices = @transform_4, window_bounds = array<i64: 3, 16, 32>}, {pipeline_mode = #tpu.pipeline_mode<synchronous>, transform_indices = @transform_5, window_bounds = array<i64: 3, 128, 128>}, {pipeline_mode = #tpu.pipeline_mode<synchronous>, transform_indices = @transform_6, window_bounds = array<i64: 1, 128>}, {pipeline_mode = #tpu.pipeline_mode<synchronous>, transform_indices = @transform_7, window_bounds = array<i64: 3, 8, 16>}, {pipeline_mode = #tpu.pipeline_mode<synchronous>, transform_indices = @transform_8, window_bounds = array<i64: 3, 128, 64>}, {pipeline_mode = #tpu.pipeline_mode<synchronous>, transform_indices = @transform_9, window_bounds = array<i64: 1, 64>}, {pipeline_mode = #tpu.pipeline_mode<synchronous>, transform_indices = @transform_10, window_bounds = array<i64: 3, 8, 8>}, {pipeline_mode = #tpu.pipeline_mode<synchronous>, transform_indices = @transform_11, window_bounds = array<i64: 3, 64, 64>}, {pipeline_mode = #tpu.pipeline_mode<synchronous>, transform_indices = @transform_12, window_bounds = array<i64: 1, 64>}, {pipeline_mode = #tpu.pipeline_mode<synchronous>, transform_indices = @transform_13, window_bounds = array<i64: 3, 16, 8>}, {pipeline_mode = #tpu.pipeline_mode<synchronous>, transform_indices = @transform_14, window_bounds = array<i64: 3, 64, 64>}, {pipeline_mode = #tpu.pipeline_mode<synchronous>, transform_indices = @transform_15, window_bounds = array<i64: 3, 16, 16>}, {pipeline_mode = #tpu.pipeline_mode<synchronous>, transform_indices = @transform_16, window_bounds = array<i64: 3, 128, 64>}, {pipeline_mode = #tpu.pipeline_mode<synchronous>, transform_indices = @transform_17, window_bounds = array<i64: 1, 64>}, {pipeline_mode = #tpu.pipeline_mode<synchronous>, transform_indices = @transform_18, window_bounds = array<i64: 3, 32, 16>}, {pipeline_mode = #tpu.pipeline_mode<synchronous>, transform_indices = @transform_19, window_bounds = array<i64: 3, 64, 64>}, {pipeline_mode = #tpu.pipeline_mode<synchronous>, transform_indices = @transform_20, window_bounds = array<i64: 3, 32, 32>}, {pipeline_mode = #tpu.pipeline_mode<synchronous>, transform_indices = @transform_21, window_bounds = array<i64: 3, 128, 64>}, {pipeline_mode = #tpu.pipeline_mode<synchronous>, transform_indices = @transform_22, window_bounds = array<i64: 1, 64>}, {pipeline_mode = #tpu.pipeline_mode<synchronous>, transform_indices = @transform_23, window_bounds = array<i64: 3, 16, 32>}, {pipeline_mode = #tpu.pipeline_mode<synchronous>, transform_indices = @transform_24, window_bounds = array<i64: 3, 64, 64>}, {pipeline_mode = #tpu.pipeline_mode<synchronous>, transform_indices = @transform_25, window_bounds = array<i64: 1, 64>}, {pipeline_mode = #tpu.pipeline_mode<synchronous>, transform_indices = @transform_26, window_bounds = array<i64: 3, 8, 16>}, {pipeline_mode = #tpu.pipeline_mode<synchronous>, transform_indices = @transform_27, window_bounds = array<i64: 3, 64, 64>}, {pipeline_mode = #tpu.pipeline_mode<synchronous>, transform_indices = @transform_28, window_bounds = array<i64: 1, 64>}, {pipeline_mode = #tpu.pipeline_mode<synchronous>, transform_indices = @transform_29, window_bounds = array<i64: 2, 8>}, {pipeline_mode = #tpu.pipeline_mode<synchronous>, transform_indices = @transform_30, window_bounds = array<i64: 64, 2>}, {pipeline_mode = #tpu.pipeline_mode<synchronous>, transform_indices = @transform_31, window_bounds = array<i64: 1, 2>}, {pipeline_mode = #tpu.pipeline_mode<synchronous>, transform_indices = @transform_32, window_bounds = array<i64: 8, 64>}, {pipeline_mode = #tpu.pipeline_mode<synchronous>, transform_indices = @transform_33, window_bounds = array<i64: 16, 64>}, {pipeline_mode = #tpu.pipeline_mode<synchronous>, transform_indices = @transform_34, window_bounds = array<i64: 32, 64>}, {pipeline_mode = #tpu.pipeline_mode<synchronous>, transform_indices = @transform_35, window_bounds = array<i64: 2, 2>}]} {
    %c0 = arith.constant 0 : index
    %c0_0 = arith.constant 0 : index
    %0 = vector.load %arg1[%c0, %c0_0] : memref<32x64xf32, #tpu.memory_space<vmem>>, vector<32x64xf32>
    %c0_1 = arith.constant 0 : index
    %c0_2 = arith.constant 0 : index
    %c0_3 = arith.constant 0 : index
    %1 = vector.load %arg2[%c0_1, %c0_2, %c0_3] : memref<3x32x32xf32, #tpu.memory_space<vmem>>, vector<1x32x32xf32>
    %2 = vector.shape_cast %1 : vector<1x32x32xf32> to vector<32x32xf32>
    %cst = arith.constant dense<0.000000e+00> : vector<32x64xf32>
    %3 = tpu.matmul %2, %0, %cst {dimension_numbers = #tpu.dot_dimension_numbers<[1], [0], [0], [1], [0, 0, 1, 1], [], []>} : vector<32x32xf32>, vector<32x64xf32>, vector<32x64xf32> -> vector<32x64xf32>
    %c0_4 = arith.constant 0 : index
    %c0_5 = arith.constant 0 : index
    %c0_6 = arith.constant 0 : index
    %4 = vector.load %arg3[%c0_4, %c0_5, %c0_6] : memref<3x64x128xf32, #tpu.memory_space<vmem>>, vector<1x64x128xf32>
    %5 = vector.shape_cast %4 : vector<1x64x128xf32> to vector<64x128xf32>
    %cst_7 = arith.constant dense<0.000000e+00> : vector<32x128xf32>
    %6 = tpu.matmul %3, %5, %cst_7 {dimension_numbers = #tpu.dot_dimension_numbers<[1], [0], [0], [1], [0, 0, 1, 1], [], []>} : vector<32x64xf32>, vector<64x128xf32>, vector<32x128xf32> -> vector<32x128xf32>
    %c1 = arith.constant 1 : index
    %c0_8 = arith.constant 0 : index
    %c0_9 = arith.constant 0 : index
    %7 = vector.load %arg2[%c1, %c0_8, %c0_9] : memref<3x32x32xf32, #tpu.memory_space<vmem>>, vector<1x32x32xf32>
    %8 = vector.shape_cast %7 : vector<1x32x32xf32> to vector<32x32xf32>
    %cst_10 = arith.constant dense<0.000000e+00> : vector<32x64xf32>
    %9 = tpu.matmul %8, %0, %cst_10 {dimension_numbers = #tpu.dot_dimension_numbers<[1], [0], [0], [1], [0, 0, 1, 1], [], []>} : vector<32x32xf32>, vector<32x64xf32>, vector<32x64xf32> -> vector<32x64xf32>
    %c1_11 = arith.constant 1 : index
    %c0_12 = arith.constant 0 : index
    %c0_13 = arith.constant 0 : index
    %10 = vector.load %arg3[%c1_11, %c0_12, %c0_13] : memref<3x64x128xf32, #tpu.memory_space<vmem>>, vector<1x64x128xf32>
    %11 = vector.shape_cast %10 : vector<1x64x128xf32> to vector<64x128xf32>
    %cst_14 = arith.constant dense<0.000000e+00> : vector<32x128xf32>
    %12 = tpu.matmul %9, %11, %cst_14 {dimension_numbers = #tpu.dot_dimension_numbers<[1], [0], [0], [1], [0, 0, 1, 1], [], []>} : vector<32x64xf32>, vector<64x128xf32>, vector<32x128xf32> -> vector<32x128xf32>
    %13 = arith.addf %6, %12 : vector<32x128xf32>
    %c2 = arith.constant 2 : index
    %c0_15 = arith.constant 0 : index
    %c0_16 = arith.constant 0 : index
    %14 = vector.load %arg2[%c2, %c0_15, %c0_16] : memref<3x32x32xf32, #tpu.memory_space<vmem>>, vector<1x32x32xf32>
    %15 = vector.shape_cast %14 : vector<1x32x32xf32> to vector<32x32xf32>
    %cst_17 = arith.constant dense<0.000000e+00> : vector<32x64xf32>
    %16 = tpu.matmul %15, %0, %cst_17 {dimension_numbers = #tpu.dot_dimension_numbers<[1], [0], [0], [1], [0, 0, 1, 1], [], []>} : vector<32x32xf32>, vector<32x64xf32>, vector<32x64xf32> -> vector<32x64xf32>
    %c2_18 = arith.constant 2 : index
    %c0_19 = arith.constant 0 : index
    %c0_20 = arith.constant 0 : index
    %17 = vector.load %arg3[%c2_18, %c0_19, %c0_20] : memref<3x64x128xf32, #tpu.memory_space<vmem>>, vector<1x64x128xf32>
    %18 = vector.shape_cast %17 : vector<1x64x128xf32> to vector<64x128xf32>
    %cst_21 = arith.constant dense<0.000000e+00> : vector<32x128xf32>
    %19 = tpu.matmul %16, %18, %cst_21 {dimension_numbers = #tpu.dot_dimension_numbers<[1], [0], [0], [1], [0, 0, 1, 1], [], []>} : vector<32x64xf32>, vector<64x128xf32>, vector<32x128xf32> -> vector<32x128xf32>
    %20 = arith.addf %13, %19 : vector<32x128xf32>
    %c0_22 = arith.constant 0 : index
    %c0_23 = arith.constant 0 : index
    %21 = vector.load %arg4[%c0_22, %c0_23] : memref<1x128xf32, #tpu.memory_space<vmem>>, vector<1x128xf32>
    %22 = vector.broadcast %21 : vector<1x128xf32> to vector<32x128xf32>
    %23 = arith.addf %20, %22 : vector<32x128xf32>
    %cst_24 = arith.constant 0.000000e+00 : f32
    %24 = vector.broadcast %cst_24 : f32 to vector<32x128xf32>
    %25 = arith.maximumf %23, %24 : vector<32x128xf32>
    %c0_25 = arith.constant 0 : index
    %c0_26 = arith.constant 0 : index
    %c0_27 = arith.constant 0 : index
    %26 = vector.load %arg5[%c0_25, %c0_26, %c0_27] : memref<3x16x32xf32, #tpu.memory_space<vmem>>, vector<1x16x32xf32>
    %27 = vector.shape_cast %26 : vector<1x16x32xf32> to vector<16x32xf32>
    %cst_28 = arith.constant dense<0.000000e+00> : vector<16x128xf32>
    %28 = tpu.matmul %27, %25, %cst_28 {dimension_numbers = #tpu.dot_dimension_numbers<[1], [0], [0], [1], [0, 0, 1, 1], [], []>} : vector<16x32xf32>, vector<32x128xf32>, vector<16x128xf32> -> vector<16x128xf32>
    %c0_29 = arith.constant 0 : index
    %c0_30 = arith.constant 0 : index
    %c0_31 = arith.constant 0 : index
    %29 = vector.load %arg6[%c0_29, %c0_30, %c0_31] : memref<3x128x128xf32, #tpu.memory_space<vmem>>, vector<1x128x128xf32>
    %30 = vector.shape_cast %29 : vector<1x128x128xf32> to vector<128x128xf32>
    %cst_32 = arith.constant dense<0.000000e+00> : vector<16x128xf32>
    %31 = tpu.matmul %28, %30, %cst_32 {dimension_numbers = #tpu.dot_dimension_numbers<[1], [0], [0], [1], [0, 0, 1, 1], [], []>} : vector<16x128xf32>, vector<128x128xf32>, vector<16x128xf32> -> vector<16x128xf32>
    %c1_33 = arith.constant 1 : index
    %c0_34 = arith.constant 0 : index
    %c0_35 = arith.constant 0 : index
    %32 = vector.load %arg5[%c1_33, %c0_34, %c0_35] : memref<3x16x32xf32, #tpu.memory_space<vmem>>, vector<1x16x32xf32>
    %33 = vector.shape_cast %32 : vector<1x16x32xf32> to vector<16x32xf32>
    %cst_36 = arith.constant dense<0.000000e+00> : vector<16x128xf32>
    %34 = tpu.matmul %33, %25, %cst_36 {dimension_numbers = #tpu.dot_dimension_numbers<[1], [0], [0], [1], [0, 0, 1, 1], [], []>} : vector<16x32xf32>, vector<32x128xf32>, vector<16x128xf32> -> vector<16x128xf32>
    %c1_37 = arith.constant 1 : index
    %c0_38 = arith.constant 0 : index
    %c0_39 = arith.constant 0 : index
    %35 = vector.load %arg6[%c1_37, %c0_38, %c0_39] : memref<3x128x128xf32, #tpu.memory_space<vmem>>, vector<1x128x128xf32>
    %36 = vector.shape_cast %35 : vector<1x128x128xf32> to vector<128x128xf32>
    %cst_40 = arith.constant dense<0.000000e+00> : vector<16x128xf32>
    %37 = tpu.matmul %34, %36, %cst_40 {dimension_numbers = #tpu.dot_dimension_numbers<[1], [0], [0], [1], [0, 0, 1, 1], [], []>} : vector<16x128xf32>, vector<128x128xf32>, vector<16x128xf32> -> vector<16x128xf32>
    %38 = arith.addf %31, %37 : vector<16x128xf32>
    %c2_41 = arith.constant 2 : index
    %c0_42 = arith.constant 0 : index
    %c0_43 = arith.constant 0 : index
    %39 = vector.load %arg5[%c2_41, %c0_42, %c0_43] : memref<3x16x32xf32, #tpu.memory_space<vmem>>, vector<1x16x32xf32>
    %40 = vector.shape_cast %39 : vector<1x16x32xf32> to vector<16x32xf32>
    %cst_44 = arith.constant dense<0.000000e+00> : vector<16x128xf32>
    %41 = tpu.matmul %40, %25, %cst_44 {dimension_numbers = #tpu.dot_dimension_numbers<[1], [0], [0], [1], [0, 0, 1, 1], [], []>} : vector<16x32xf32>, vector<32x128xf32>, vector<16x128xf32> -> vector<16x128xf32>
    %c2_45 = arith.constant 2 : index
    %c0_46 = arith.constant 0 : index
    %c0_47 = arith.constant 0 : index
    %42 = vector.load %arg6[%c2_45, %c0_46, %c0_47] : memref<3x128x128xf32, #tpu.memory_space<vmem>>, vector<1x128x128xf32>
    %43 = vector.shape_cast %42 : vector<1x128x128xf32> to vector<128x128xf32>
    %cst_48 = arith.constant dense<0.000000e+00> : vector<16x128xf32>
    %44 = tpu.matmul %41, %43, %cst_48 {dimension_numbers = #tpu.dot_dimension_numbers<[1], [0], [0], [1], [0, 0, 1, 1], [], []>} : vector<16x128xf32>, vector<128x128xf32>, vector<16x128xf32> -> vector<16x128xf32>
    %45 = arith.addf %38, %44 : vector<16x128xf32>
    %c0_49 = arith.constant 0 : index
    %c0_50 = arith.constant 0 : index
    %46 = vector.load %arg7[%c0_49, %c0_50] : memref<1x128xf32, #tpu.memory_space<vmem>>, vector<1x128xf32>
    %47 = vector.broadcast %46 : vector<1x128xf32> to vector<16x128xf32>
    %48 = arith.addf %45, %47 : vector<16x128xf32>
    %cst_51 = arith.constant 0.000000e+00 : f32
    %49 = vector.broadcast %cst_51 : f32 to vector<16x128xf32>
    %50 = arith.maximumf %48, %49 : vector<16x128xf32>
    %c0_52 = arith.constant 0 : index
    %c0_53 = arith.constant 0 : index
    %c0_54 = arith.constant 0 : index
    %51 = vector.load %arg8[%c0_52, %c0_53, %c0_54] : memref<3x8x16xf32, #tpu.memory_space<vmem>>, vector<1x8x16xf32>
    %52 = vector.shape_cast %51 : vector<1x8x16xf32> to vector<8x16xf32>
    %cst_55 = arith.constant dense<0.000000e+00> : vector<8x128xf32>
    %53 = tpu.matmul %52, %50, %cst_55 {dimension_numbers = #tpu.dot_dimension_numbers<[1], [0], [0], [1], [0, 0, 1, 1], [], []>} : vector<8x16xf32>, vector<16x128xf32>, vector<8x128xf32> -> vector<8x128xf32>
    %c0_56 = arith.constant 0 : index
    %c0_57 = arith.constant 0 : index
    %c0_58 = arith.constant 0 : index
    %54 = vector.load %arg9[%c0_56, %c0_57, %c0_58] : memref<3x128x64xf32, #tpu.memory_space<vmem>>, vector<1x128x64xf32>
    %55 = vector.shape_cast %54 : vector<1x128x64xf32> to vector<128x64xf32>
    %cst_59 = arith.constant dense<0.000000e+00> : vector<8x64xf32>
    %56 = tpu.matmul %53, %55, %cst_59 {dimension_numbers = #tpu.dot_dimension_numbers<[1], [0], [0], [1], [0, 0, 1, 1], [], []>} : vector<8x128xf32>, vector<128x64xf32>, vector<8x64xf32> -> vector<8x64xf32>
    %c1_60 = arith.constant 1 : index
    %c0_61 = arith.constant 0 : index
    %c0_62 = arith.constant 0 : index
    %57 = vector.load %arg8[%c1_60, %c0_61, %c0_62] : memref<3x8x16xf32, #tpu.memory_space<vmem>>, vector<1x8x16xf32>
    %58 = vector.shape_cast %57 : vector<1x8x16xf32> to vector<8x16xf32>
    %cst_63 = arith.constant dense<0.000000e+00> : vector<8x128xf32>
    %59 = tpu.matmul %58, %50, %cst_63 {dimension_numbers = #tpu.dot_dimension_numbers<[1], [0], [0], [1], [0, 0, 1, 1], [], []>} : vector<8x16xf32>, vector<16x128xf32>, vector<8x128xf32> -> vector<8x128xf32>
    %c1_64 = arith.constant 1 : index
    %c0_65 = arith.constant 0 : index
    %c0_66 = arith.constant 0 : index
    %60 = vector.load %arg9[%c1_64, %c0_65, %c0_66] : memref<3x128x64xf32, #tpu.memory_space<vmem>>, vector<1x128x64xf32>
    %61 = vector.shape_cast %60 : vector<1x128x64xf32> to vector<128x64xf32>
    %cst_67 = arith.constant dense<0.000000e+00> : vector<8x64xf32>
    %62 = tpu.matmul %59, %61, %cst_67 {dimension_numbers = #tpu.dot_dimension_numbers<[1], [0], [0], [1], [0, 0, 1, 1], [], []>} : vector<8x128xf32>, vector<128x64xf32>, vector<8x64xf32> -> vector<8x64xf32>
    %63 = arith.addf %56, %62 : vector<8x64xf32>
    %c2_68 = arith.constant 2 : index
    %c0_69 = arith.constant 0 : index
    %c0_70 = arith.constant 0 : index
    %64 = vector.load %arg8[%c2_68, %c0_69, %c0_70] : memref<3x8x16xf32, #tpu.memory_space<vmem>>, vector<1x8x16xf32>
    %65 = vector.shape_cast %64 : vector<1x8x16xf32> to vector<8x16xf32>
    %cst_71 = arith.constant dense<0.000000e+00> : vector<8x128xf32>
    %66 = tpu.matmul %65, %50, %cst_71 {dimension_numbers = #tpu.dot_dimension_numbers<[1], [0], [0], [1], [0, 0, 1, 1], [], []>} : vector<8x16xf32>, vector<16x128xf32>, vector<8x128xf32> -> vector<8x128xf32>
    %c2_72 = arith.constant 2 : index
    %c0_73 = arith.constant 0 : index
    %c0_74 = arith.constant 0 : index
    %67 = vector.load %arg9[%c2_72, %c0_73, %c0_74] : memref<3x128x64xf32, #tpu.memory_space<vmem>>, vector<1x128x64xf32>
    %68 = vector.shape_cast %67 : vector<1x128x64xf32> to vector<128x64xf32>
    %cst_75 = arith.constant dense<0.000000e+00> : vector<8x64xf32>
    %69 = tpu.matmul %66, %68, %cst_75 {dimension_numbers = #tpu.dot_dimension_numbers<[1], [0], [0], [1], [0, 0, 1, 1], [], []>} : vector<8x128xf32>, vector<128x64xf32>, vector<8x64xf32> -> vector<8x64xf32>
    %70 = arith.addf %63, %69 : vector<8x64xf32>
    %c0_76 = arith.constant 0 : index
    %c0_77 = arith.constant 0 : index
    %71 = vector.load %arg10[%c0_76, %c0_77] : memref<1x64xf32, #tpu.memory_space<vmem>>, vector<1x64xf32>
    %72 = vector.broadcast %71 : vector<1x64xf32> to vector<8x64xf32>
    %73 = arith.addf %70, %72 : vector<8x64xf32>
    %cst_78 = arith.constant 0.000000e+00 : f32
    %74 = vector.broadcast %cst_78 : f32 to vector<8x64xf32>
    %75 = arith.maximumf %73, %74 : vector<8x64xf32>
    %c0_79 = arith.constant 0 : index
    %c0_80 = arith.constant 0 : index
    %c0_81 = arith.constant 0 : index
    %76 = vector.load %arg11[%c0_79, %c0_80, %c0_81] : memref<3x8x8xf32, #tpu.memory_space<vmem>>, vector<1x8x8xf32>
    %77 = vector.shape_cast %76 : vector<1x8x8xf32> to vector<8x8xf32>
    %cst_82 = arith.constant dense<0.000000e+00> : vector<8x64xf32>
    %78 = tpu.matmul %77, %75, %cst_82 {dimension_numbers = #tpu.dot_dimension_numbers<[1], [0], [0], [1], [0, 0, 1, 1], [], []>} : vector<8x8xf32>, vector<8x64xf32>, vector<8x64xf32> -> vector<8x64xf32>
    %c0_83 = arith.constant 0 : index
    %c0_84 = arith.constant 0 : index
    %c0_85 = arith.constant 0 : index
    %79 = vector.load %arg12[%c0_83, %c0_84, %c0_85] : memref<3x64x64xf32, #tpu.memory_space<vmem>>, vector<1x64x64xf32>
    %80 = vector.shape_cast %79 : vector<1x64x64xf32> to vector<64x64xf32>
    %cst_86 = arith.constant dense<0.000000e+00> : vector<8x64xf32>
    %81 = tpu.matmul %78, %80, %cst_86 {dimension_numbers = #tpu.dot_dimension_numbers<[1], [0], [0], [1], [0, 0, 1, 1], [], []>} : vector<8x64xf32>, vector<64x64xf32>, vector<8x64xf32> -> vector<8x64xf32>
    %c1_87 = arith.constant 1 : index
    %c0_88 = arith.constant 0 : index
    %c0_89 = arith.constant 0 : index
    %82 = vector.load %arg11[%c1_87, %c0_88, %c0_89] : memref<3x8x8xf32, #tpu.memory_space<vmem>>, vector<1x8x8xf32>
    %83 = vector.shape_cast %82 : vector<1x8x8xf32> to vector<8x8xf32>
    %cst_90 = arith.constant dense<0.000000e+00> : vector<8x64xf32>
    %84 = tpu.matmul %83, %75, %cst_90 {dimension_numbers = #tpu.dot_dimension_numbers<[1], [0], [0], [1], [0, 0, 1, 1], [], []>} : vector<8x8xf32>, vector<8x64xf32>, vector<8x64xf32> -> vector<8x64xf32>
    %c1_91 = arith.constant 1 : index
    %c0_92 = arith.constant 0 : index
    %c0_93 = arith.constant 0 : index
    %85 = vector.load %arg12[%c1_91, %c0_92, %c0_93] : memref<3x64x64xf32, #tpu.memory_space<vmem>>, vector<1x64x64xf32>
    %86 = vector.shape_cast %85 : vector<1x64x64xf32> to vector<64x64xf32>
    %cst_94 = arith.constant dense<0.000000e+00> : vector<8x64xf32>
    %87 = tpu.matmul %84, %86, %cst_94 {dimension_numbers = #tpu.dot_dimension_numbers<[1], [0], [0], [1], [0, 0, 1, 1], [], []>} : vector<8x64xf32>, vector<64x64xf32>, vector<8x64xf32> -> vector<8x64xf32>
    %88 = arith.addf %81, %87 : vector<8x64xf32>
    %c2_95 = arith.constant 2 : index
    %c0_96 = arith.constant 0 : index
    %c0_97 = arith.constant 0 : index
    %89 = vector.load %arg11[%c2_95, %c0_96, %c0_97] : memref<3x8x8xf32, #tpu.memory_space<vmem>>, vector<1x8x8xf32>
    %90 = vector.shape_cast %89 : vector<1x8x8xf32> to vector<8x8xf32>
    %cst_98 = arith.constant dense<0.000000e+00> : vector<8x64xf32>
    %91 = tpu.matmul %90, %75, %cst_98 {dimension_numbers = #tpu.dot_dimension_numbers<[1], [0], [0], [1], [0, 0, 1, 1], [], []>} : vector<8x8xf32>, vector<8x64xf32>, vector<8x64xf32> -> vector<8x64xf32>
    %c2_99 = arith.constant 2 : index
    %c0_100 = arith.constant 0 : index
    %c0_101 = arith.constant 0 : index
    %92 = vector.load %arg12[%c2_99, %c0_100, %c0_101] : memref<3x64x64xf32, #tpu.memory_space<vmem>>, vector<1x64x64xf32>
    %93 = vector.shape_cast %92 : vector<1x64x64xf32> to vector<64x64xf32>
    %cst_102 = arith.constant dense<0.000000e+00> : vector<8x64xf32>
    %94 = tpu.matmul %91, %93, %cst_102 {dimension_numbers = #tpu.dot_dimension_numbers<[1], [0], [0], [1], [0, 0, 1, 1], [], []>} : vector<8x64xf32>, vector<64x64xf32>, vector<8x64xf32> -> vector<8x64xf32>
    %95 = arith.addf %88, %94 : vector<8x64xf32>
    %c0_103 = arith.constant 0 : index
    %c0_104 = arith.constant 0 : index
    %96 = vector.load %arg13[%c0_103, %c0_104] : memref<1x64xf32, #tpu.memory_space<vmem>>, vector<1x64xf32>
    %97 = vector.broadcast %96 : vector<1x64xf32> to vector<8x64xf32>
    %98 = arith.addf %95, %97 : vector<8x64xf32>
    %cst_105 = arith.constant 0.000000e+00 : f32
    %99 = vector.broadcast %cst_105 : f32 to vector<8x64xf32>
    %100 = arith.maximumf %98, %99 : vector<8x64xf32>
    %c0_106 = arith.constant 0 : index
    %c0_107 = arith.constant 0 : index
    %c0_108 = arith.constant 0 : index
    %101 = vector.load %arg14[%c0_106, %c0_107, %c0_108] : memref<3x16x8xf32, #tpu.memory_space<vmem>>, vector<1x16x8xf32>
    %102 = vector.shape_cast %101 : vector<1x16x8xf32> to vector<16x8xf32>
    %cst_109 = arith.constant dense<0.000000e+00> : vector<16x64xf32>
    %103 = tpu.matmul %102, %100, %cst_109 {dimension_numbers = #tpu.dot_dimension_numbers<[1], [0], [0], [1], [0, 0, 1, 1], [], []>} : vector<16x8xf32>, vector<8x64xf32>, vector<16x64xf32> -> vector<16x64xf32>
    %c0_110 = arith.constant 0 : index
    %c0_111 = arith.constant 0 : index
    %c0_112 = arith.constant 0 : index
    %104 = vector.load %arg15[%c0_110, %c0_111, %c0_112] : memref<3x64x64xf32, #tpu.memory_space<vmem>>, vector<1x64x64xf32>
    %105 = vector.shape_cast %104 : vector<1x64x64xf32> to vector<64x64xf32>
    %cst_113 = arith.constant dense<0.000000e+00> : vector<16x64xf32>
    %106 = tpu.matmul %103, %105, %cst_113 {dimension_numbers = #tpu.dot_dimension_numbers<[1], [0], [0], [1], [0, 0, 1, 1], [], []>} : vector<16x64xf32>, vector<64x64xf32>, vector<16x64xf32> -> vector<16x64xf32>
    %c1_114 = arith.constant 1 : index
    %c0_115 = arith.constant 0 : index
    %c0_116 = arith.constant 0 : index
    %107 = vector.load %arg14[%c1_114, %c0_115, %c0_116] : memref<3x16x8xf32, #tpu.memory_space<vmem>>, vector<1x16x8xf32>
    %108 = vector.shape_cast %107 : vector<1x16x8xf32> to vector<16x8xf32>
    %cst_117 = arith.constant dense<0.000000e+00> : vector<16x64xf32>
    %109 = tpu.matmul %108, %100, %cst_117 {dimension_numbers = #tpu.dot_dimension_numbers<[1], [0], [0], [1], [0, 0, 1, 1], [], []>} : vector<16x8xf32>, vector<8x64xf32>, vector<16x64xf32> -> vector<16x64xf32>
    %c1_118 = arith.constant 1 : index
    %c0_119 = arith.constant 0 : index
    %c0_120 = arith.constant 0 : index
    %110 = vector.load %arg15[%c1_118, %c0_119, %c0_120] : memref<3x64x64xf32, #tpu.memory_space<vmem>>, vector<1x64x64xf32>
    %111 = vector.shape_cast %110 : vector<1x64x64xf32> to vector<64x64xf32>
    %cst_121 = arith.constant dense<0.000000e+00> : vector<16x64xf32>
    %112 = tpu.matmul %109, %111, %cst_121 {dimension_numbers = #tpu.dot_dimension_numbers<[1], [0], [0], [1], [0, 0, 1, 1], [], []>} : vector<16x64xf32>, vector<64x64xf32>, vector<16x64xf32> -> vector<16x64xf32>
    %113 = arith.addf %106, %112 : vector<16x64xf32>
    %c2_122 = arith.constant 2 : index
    %c0_123 = arith.constant 0 : index
    %c0_124 = arith.constant 0 : index
    %114 = vector.load %arg14[%c2_122, %c0_123, %c0_124] : memref<3x16x8xf32, #tpu.memory_space<vmem>>, vector<1x16x8xf32>
    %115 = vector.shape_cast %114 : vector<1x16x8xf32> to vector<16x8xf32>
    %cst_125 = arith.constant dense<0.000000e+00> : vector<16x64xf32>
    %116 = tpu.matmul %115, %100, %cst_125 {dimension_numbers = #tpu.dot_dimension_numbers<[1], [0], [0], [1], [0, 0, 1, 1], [], []>} : vector<16x8xf32>, vector<8x64xf32>, vector<16x64xf32> -> vector<16x64xf32>
    %c2_126 = arith.constant 2 : index
    %c0_127 = arith.constant 0 : index
    %c0_128 = arith.constant 0 : index
    %117 = vector.load %arg15[%c2_126, %c0_127, %c0_128] : memref<3x64x64xf32, #tpu.memory_space<vmem>>, vector<1x64x64xf32>
    %118 = vector.shape_cast %117 : vector<1x64x64xf32> to vector<64x64xf32>
    %cst_129 = arith.constant dense<0.000000e+00> : vector<16x64xf32>
    %119 = tpu.matmul %116, %118, %cst_129 {dimension_numbers = #tpu.dot_dimension_numbers<[1], [0], [0], [1], [0, 0, 1, 1], [], []>} : vector<16x64xf32>, vector<64x64xf32>, vector<16x64xf32> -> vector<16x64xf32>
    %120 = arith.addf %113, %119 : vector<16x64xf32>
    %c0_130 = arith.constant 0 : index
    %c0_131 = arith.constant 0 : index
    %c0_132 = arith.constant 0 : index
    %121 = vector.load %arg16[%c0_130, %c0_131, %c0_132] : memref<3x16x16xf32, #tpu.memory_space<vmem>>, vector<1x16x16xf32>
    %122 = vector.shape_cast %121 : vector<1x16x16xf32> to vector<16x16xf32>
    %cst_133 = arith.constant dense<0.000000e+00> : vector<16x128xf32>
    %123 = tpu.matmul %122, %50, %cst_133 {dimension_numbers = #tpu.dot_dimension_numbers<[1], [0], [0], [1], [0, 0, 1, 1], [], []>} : vector<16x16xf32>, vector<16x128xf32>, vector<16x128xf32> -> vector<16x128xf32>
    %c0_134 = arith.constant 0 : index
    %c0_135 = arith.constant 0 : index
    %c0_136 = arith.constant 0 : index
    %124 = vector.load %arg17[%c0_134, %c0_135, %c0_136] : memref<3x128x64xf32, #tpu.memory_space<vmem>>, vector<1x128x64xf32>
    %125 = vector.shape_cast %124 : vector<1x128x64xf32> to vector<128x64xf32>
    %cst_137 = arith.constant dense<0.000000e+00> : vector<16x64xf32>
    %126 = tpu.matmul %123, %125, %cst_137 {dimension_numbers = #tpu.dot_dimension_numbers<[1], [0], [0], [1], [0, 0, 1, 1], [], []>} : vector<16x128xf32>, vector<128x64xf32>, vector<16x64xf32> -> vector<16x64xf32>
    %c1_138 = arith.constant 1 : index
    %c0_139 = arith.constant 0 : index
    %c0_140 = arith.constant 0 : index
    %127 = vector.load %arg16[%c1_138, %c0_139, %c0_140] : memref<3x16x16xf32, #tpu.memory_space<vmem>>, vector<1x16x16xf32>
    %128 = vector.shape_cast %127 : vector<1x16x16xf32> to vector<16x16xf32>
    %cst_141 = arith.constant dense<0.000000e+00> : vector<16x128xf32>
    %129 = tpu.matmul %128, %50, %cst_141 {dimension_numbers = #tpu.dot_dimension_numbers<[1], [0], [0], [1], [0, 0, 1, 1], [], []>} : vector<16x16xf32>, vector<16x128xf32>, vector<16x128xf32> -> vector<16x128xf32>
    %c1_142 = arith.constant 1 : index
    %c0_143 = arith.constant 0 : index
    %c0_144 = arith.constant 0 : index
    %130 = vector.load %arg17[%c1_142, %c0_143, %c0_144] : memref<3x128x64xf32, #tpu.memory_space<vmem>>, vector<1x128x64xf32>
    %131 = vector.shape_cast %130 : vector<1x128x64xf32> to vector<128x64xf32>
    %cst_145 = arith.constant dense<0.000000e+00> : vector<16x64xf32>
    %132 = tpu.matmul %129, %131, %cst_145 {dimension_numbers = #tpu.dot_dimension_numbers<[1], [0], [0], [1], [0, 0, 1, 1], [], []>} : vector<16x128xf32>, vector<128x64xf32>, vector<16x64xf32> -> vector<16x64xf32>
    %133 = arith.addf %126, %132 : vector<16x64xf32>
    %c2_146 = arith.constant 2 : index
    %c0_147 = arith.constant 0 : index
    %c0_148 = arith.constant 0 : index
    %134 = vector.load %arg16[%c2_146, %c0_147, %c0_148] : memref<3x16x16xf32, #tpu.memory_space<vmem>>, vector<1x16x16xf32>
    %135 = vector.shape_cast %134 : vector<1x16x16xf32> to vector<16x16xf32>
    %cst_149 = arith.constant dense<0.000000e+00> : vector<16x128xf32>
    %136 = tpu.matmul %135, %50, %cst_149 {dimension_numbers = #tpu.dot_dimension_numbers<[1], [0], [0], [1], [0, 0, 1, 1], [], []>} : vector<16x16xf32>, vector<16x128xf32>, vector<16x128xf32> -> vector<16x128xf32>
    %c2_150 = arith.constant 2 : index
    %c0_151 = arith.constant 0 : index
    %c0_152 = arith.constant 0 : index
    %137 = vector.load %arg17[%c2_150, %c0_151, %c0_152] : memref<3x128x64xf32, #tpu.memory_space<vmem>>, vector<1x128x64xf32>
    %138 = vector.shape_cast %137 : vector<1x128x64xf32> to vector<128x64xf32>
    %cst_153 = arith.constant dense<0.000000e+00> : vector<16x64xf32>
    %139 = tpu.matmul %136, %138, %cst_153 {dimension_numbers = #tpu.dot_dimension_numbers<[1], [0], [0], [1], [0, 0, 1, 1], [], []>} : vector<16x128xf32>, vector<128x64xf32>, vector<16x64xf32> -> vector<16x64xf32>
    %140 = arith.addf %133, %139 : vector<16x64xf32>
    %141 = arith.addf %120, %140 : vector<16x64xf32>
    %c0_154 = arith.constant 0 : index
    %c0_155 = arith.constant 0 : index
    %142 = vector.load %arg18[%c0_154, %c0_155] : memref<1x64xf32, #tpu.memory_space<vmem>>, vector<1x64xf32>
    %143 = vector.broadcast %142 : vector<1x64xf32> to vector<16x64xf32>
    %144 = arith.addf %141, %143 : vector<16x64xf32>
    %cst_156 = arith.constant 0.000000e+00 : f32
    %145 = vector.broadcast %cst_156 : f32 to vector<16x64xf32>
    %146 = arith.maximumf %144, %145 : vector<16x64xf32>
    %c0_157 = arith.constant 0 : index
    %c0_158 = arith.constant 0 : index
    %c0_159 = arith.constant 0 : index
    %147 = vector.load %arg19[%c0_157, %c0_158, %c0_159] : memref<3x32x16xf32, #tpu.memory_space<vmem>>, vector<1x32x16xf32>
    %148 = vector.shape_cast %147 : vector<1x32x16xf32> to vector<32x16xf32>
    %cst_160 = arith.constant dense<0.000000e+00> : vector<32x64xf32>
    %149 = tpu.matmul %148, %146, %cst_160 {dimension_numbers = #tpu.dot_dimension_numbers<[1], [0], [0], [1], [0, 0, 1, 1], [], []>} : vector<32x16xf32>, vector<16x64xf32>, vector<32x64xf32> -> vector<32x64xf32>
    %c0_161 = arith.constant 0 : index
    %c0_162 = arith.constant 0 : index
    %c0_163 = arith.constant 0 : index
    %150 = vector.load %arg20[%c0_161, %c0_162, %c0_163] : memref<3x64x64xf32, #tpu.memory_space<vmem>>, vector<1x64x64xf32>
    %151 = vector.shape_cast %150 : vector<1x64x64xf32> to vector<64x64xf32>
    %cst_164 = arith.constant dense<0.000000e+00> : vector<32x64xf32>
    %152 = tpu.matmul %149, %151, %cst_164 {dimension_numbers = #tpu.dot_dimension_numbers<[1], [0], [0], [1], [0, 0, 1, 1], [], []>} : vector<32x64xf32>, vector<64x64xf32>, vector<32x64xf32> -> vector<32x64xf32>
    %c1_165 = arith.constant 1 : index
    %c0_166 = arith.constant 0 : index
    %c0_167 = arith.constant 0 : index
    %153 = vector.load %arg19[%c1_165, %c0_166, %c0_167] : memref<3x32x16xf32, #tpu.memory_space<vmem>>, vector<1x32x16xf32>
    %154 = vector.shape_cast %153 : vector<1x32x16xf32> to vector<32x16xf32>
    %cst_168 = arith.constant dense<0.000000e+00> : vector<32x64xf32>
    %155 = tpu.matmul %154, %146, %cst_168 {dimension_numbers = #tpu.dot_dimension_numbers<[1], [0], [0], [1], [0, 0, 1, 1], [], []>} : vector<32x16xf32>, vector<16x64xf32>, vector<32x64xf32> -> vector<32x64xf32>
    %c1_169 = arith.constant 1 : index
    %c0_170 = arith.constant 0 : index
    %c0_171 = arith.constant 0 : index
    %156 = vector.load %arg20[%c1_169, %c0_170, %c0_171] : memref<3x64x64xf32, #tpu.memory_space<vmem>>, vector<1x64x64xf32>
    %157 = vector.shape_cast %156 : vector<1x64x64xf32> to vector<64x64xf32>
    %cst_172 = arith.constant dense<0.000000e+00> : vector<32x64xf32>
    %158 = tpu.matmul %155, %157, %cst_172 {dimension_numbers = #tpu.dot_dimension_numbers<[1], [0], [0], [1], [0, 0, 1, 1], [], []>} : vector<32x64xf32>, vector<64x64xf32>, vector<32x64xf32> -> vector<32x64xf32>
    %159 = arith.addf %152, %158 : vector<32x64xf32>
    %c2_173 = arith.constant 2 : index
    %c0_174 = arith.constant 0 : index
    %c0_175 = arith.constant 0 : index
    %160 = vector.load %arg19[%c2_173, %c0_174, %c0_175] : memref<3x32x16xf32, #tpu.memory_space<vmem>>, vector<1x32x16xf32>
    %161 = vector.shape_cast %160 : vector<1x32x16xf32> to vector<32x16xf32>
    %cst_176 = arith.constant dense<0.000000e+00> : vector<32x64xf32>
    %162 = tpu.matmul %161, %146, %cst_176 {dimension_numbers = #tpu.dot_dimension_numbers<[1], [0], [0], [1], [0, 0, 1, 1], [], []>} : vector<32x16xf32>, vector<16x64xf32>, vector<32x64xf32> -> vector<32x64xf32>
    %c2_177 = arith.constant 2 : index
    %c0_178 = arith.constant 0 : index
    %c0_179 = arith.constant 0 : index
    %163 = vector.load %arg20[%c2_177, %c0_178, %c0_179] : memref<3x64x64xf32, #tpu.memory_space<vmem>>, vector<1x64x64xf32>
    %164 = vector.shape_cast %163 : vector<1x64x64xf32> to vector<64x64xf32>
    %cst_180 = arith.constant dense<0.000000e+00> : vector<32x64xf32>
    %165 = tpu.matmul %162, %164, %cst_180 {dimension_numbers = #tpu.dot_dimension_numbers<[1], [0], [0], [1], [0, 0, 1, 1], [], []>} : vector<32x64xf32>, vector<64x64xf32>, vector<32x64xf32> -> vector<32x64xf32>
    %166 = arith.addf %159, %165 : vector<32x64xf32>
    %c0_181 = arith.constant 0 : index
    %c0_182 = arith.constant 0 : index
    %c0_183 = arith.constant 0 : index
    %167 = vector.load %arg21[%c0_181, %c0_182, %c0_183] : memref<3x32x32xf32, #tpu.memory_space<vmem>>, vector<1x32x32xf32>
    %168 = vector.shape_cast %167 : vector<1x32x32xf32> to vector<32x32xf32>
    %cst_184 = arith.constant dense<0.000000e+00> : vector<32x128xf32>
    %169 = tpu.matmul %168, %25, %cst_184 {dimension_numbers = #tpu.dot_dimension_numbers<[1], [0], [0], [1], [0, 0, 1, 1], [], []>} : vector<32x32xf32>, vector<32x128xf32>, vector<32x128xf32> -> vector<32x128xf32>
    %c0_185 = arith.constant 0 : index
    %c0_186 = arith.constant 0 : index
    %c0_187 = arith.constant 0 : index
    %170 = vector.load %arg22[%c0_185, %c0_186, %c0_187] : memref<3x128x64xf32, #tpu.memory_space<vmem>>, vector<1x128x64xf32>
    %171 = vector.shape_cast %170 : vector<1x128x64xf32> to vector<128x64xf32>
    %cst_188 = arith.constant dense<0.000000e+00> : vector<32x64xf32>
    %172 = tpu.matmul %169, %171, %cst_188 {dimension_numbers = #tpu.dot_dimension_numbers<[1], [0], [0], [1], [0, 0, 1, 1], [], []>} : vector<32x128xf32>, vector<128x64xf32>, vector<32x64xf32> -> vector<32x64xf32>
    %c1_189 = arith.constant 1 : index
    %c0_190 = arith.constant 0 : index
    %c0_191 = arith.constant 0 : index
    %173 = vector.load %arg21[%c1_189, %c0_190, %c0_191] : memref<3x32x32xf32, #tpu.memory_space<vmem>>, vector<1x32x32xf32>
    %174 = vector.shape_cast %173 : vector<1x32x32xf32> to vector<32x32xf32>
    %cst_192 = arith.constant dense<0.000000e+00> : vector<32x128xf32>
    %175 = tpu.matmul %174, %25, %cst_192 {dimension_numbers = #tpu.dot_dimension_numbers<[1], [0], [0], [1], [0, 0, 1, 1], [], []>} : vector<32x32xf32>, vector<32x128xf32>, vector<32x128xf32> -> vector<32x128xf32>
    %c1_193 = arith.constant 1 : index
    %c0_194 = arith.constant 0 : index
    %c0_195 = arith.constant 0 : index
    %176 = vector.load %arg22[%c1_193, %c0_194, %c0_195] : memref<3x128x64xf32, #tpu.memory_space<vmem>>, vector<1x128x64xf32>
    %177 = vector.shape_cast %176 : vector<1x128x64xf32> to vector<128x64xf32>
    %cst_196 = arith.constant dense<0.000000e+00> : vector<32x64xf32>
    %178 = tpu.matmul %175, %177, %cst_196 {dimension_numbers = #tpu.dot_dimension_numbers<[1], [0], [0], [1], [0, 0, 1, 1], [], []>} : vector<32x128xf32>, vector<128x64xf32>, vector<32x64xf32> -> vector<32x64xf32>
    %179 = arith.addf %172, %178 : vector<32x64xf32>
    %c2_197 = arith.constant 2 : index
    %c0_198 = arith.constant 0 : index
    %c0_199 = arith.constant 0 : index
    %180 = vector.load %arg21[%c2_197, %c0_198, %c0_199] : memref<3x32x32xf32, #tpu.memory_space<vmem>>, vector<1x32x32xf32>
    %181 = vector.shape_cast %180 : vector<1x32x32xf32> to vector<32x32xf32>
    %cst_200 = arith.constant dense<0.000000e+00> : vector<32x128xf32>
    %182 = tpu.matmul %181, %25, %cst_200 {dimension_numbers = #tpu.dot_dimension_numbers<[1], [0], [0], [1], [0, 0, 1, 1], [], []>} : vector<32x32xf32>, vector<32x128xf32>, vector<32x128xf32> -> vector<32x128xf32>
    %c2_201 = arith.constant 2 : index
    %c0_202 = arith.constant 0 : index
    %c0_203 = arith.constant 0 : index
    %183 = vector.load %arg22[%c2_201, %c0_202, %c0_203] : memref<3x128x64xf32, #tpu.memory_space<vmem>>, vector<1x128x64xf32>
    %184 = vector.shape_cast %183 : vector<1x128x64xf32> to vector<128x64xf32>
    %cst_204 = arith.constant dense<0.000000e+00> : vector<32x64xf32>
    %185 = tpu.matmul %182, %184, %cst_204 {dimension_numbers = #tpu.dot_dimension_numbers<[1], [0], [0], [1], [0, 0, 1, 1], [], []>} : vector<32x128xf32>, vector<128x64xf32>, vector<32x64xf32> -> vector<32x64xf32>
    %186 = arith.addf %179, %185 : vector<32x64xf32>
    %187 = arith.addf %166, %186 : vector<32x64xf32>
    %c0_205 = arith.constant 0 : index
    %c0_206 = arith.constant 0 : index
    %188 = vector.load %arg23[%c0_205, %c0_206] : memref<1x64xf32, #tpu.memory_space<vmem>>, vector<1x64xf32>
    %189 = vector.broadcast %188 : vector<1x64xf32> to vector<32x64xf32>
    %190 = arith.addf %187, %189 : vector<32x64xf32>
    %191 = arith.addf %0, %190 : vector<32x64xf32>
    %c0_207 = arith.constant 0 : index
    %c0_208 = arith.constant 0 : index
    %c0_209 = arith.constant 0 : index
    %192 = vector.load %arg24[%c0_207, %c0_208, %c0_209] : memref<3x16x32xf32, #tpu.memory_space<vmem>>, vector<1x16x32xf32>
    %193 = vector.shape_cast %192 : vector<1x16x32xf32> to vector<16x32xf32>
    %cst_210 = arith.constant dense<0.000000e+00> : vector<16x64xf32>
    %194 = tpu.matmul %193, %191, %cst_210 {dimension_numbers = #tpu.dot_dimension_numbers<[1], [0], [0], [1], [0, 0, 1, 1], [], []>} : vector<16x32xf32>, vector<32x64xf32>, vector<16x64xf32> -> vector<16x64xf32>
    %c0_211 = arith.constant 0 : index
    %c0_212 = arith.constant 0 : index
    %c0_213 = arith.constant 0 : index
    %195 = vector.load %arg25[%c0_211, %c0_212, %c0_213] : memref<3x64x64xf32, #tpu.memory_space<vmem>>, vector<1x64x64xf32>
    %196 = vector.shape_cast %195 : vector<1x64x64xf32> to vector<64x64xf32>
    %cst_214 = arith.constant dense<0.000000e+00> : vector<16x64xf32>
    %197 = tpu.matmul %194, %196, %cst_214 {dimension_numbers = #tpu.dot_dimension_numbers<[1], [0], [0], [1], [0, 0, 1, 1], [], []>} : vector<16x64xf32>, vector<64x64xf32>, vector<16x64xf32> -> vector<16x64xf32>
    %c1_215 = arith.constant 1 : index
    %c0_216 = arith.constant 0 : index
    %c0_217 = arith.constant 0 : index
    %198 = vector.load %arg24[%c1_215, %c0_216, %c0_217] : memref<3x16x32xf32, #tpu.memory_space<vmem>>, vector<1x16x32xf32>
    %199 = vector.shape_cast %198 : vector<1x16x32xf32> to vector<16x32xf32>
    %cst_218 = arith.constant dense<0.000000e+00> : vector<16x64xf32>
    %200 = tpu.matmul %199, %191, %cst_218 {dimension_numbers = #tpu.dot_dimension_numbers<[1], [0], [0], [1], [0, 0, 1, 1], [], []>} : vector<16x32xf32>, vector<32x64xf32>, vector<16x64xf32> -> vector<16x64xf32>
    %c1_219 = arith.constant 1 : index
    %c0_220 = arith.constant 0 : index
    %c0_221 = arith.constant 0 : index
    %201 = vector.load %arg25[%c1_219, %c0_220, %c0_221] : memref<3x64x64xf32, #tpu.memory_space<vmem>>, vector<1x64x64xf32>
    %202 = vector.shape_cast %201 : vector<1x64x64xf32> to vector<64x64xf32>
    %cst_222 = arith.constant dense<0.000000e+00> : vector<16x64xf32>
    %203 = tpu.matmul %200, %202, %cst_222 {dimension_numbers = #tpu.dot_dimension_numbers<[1], [0], [0], [1], [0, 0, 1, 1], [], []>} : vector<16x64xf32>, vector<64x64xf32>, vector<16x64xf32> -> vector<16x64xf32>
    %204 = arith.addf %197, %203 : vector<16x64xf32>
    %c2_223 = arith.constant 2 : index
    %c0_224 = arith.constant 0 : index
    %c0_225 = arith.constant 0 : index
    %205 = vector.load %arg24[%c2_223, %c0_224, %c0_225] : memref<3x16x32xf32, #tpu.memory_space<vmem>>, vector<1x16x32xf32>
    %206 = vector.shape_cast %205 : vector<1x16x32xf32> to vector<16x32xf32>
    %cst_226 = arith.constant dense<0.000000e+00> : vector<16x64xf32>
    %207 = tpu.matmul %206, %191, %cst_226 {dimension_numbers = #tpu.dot_dimension_numbers<[1], [0], [0], [1], [0, 0, 1, 1], [], []>} : vector<16x32xf32>, vector<32x64xf32>, vector<16x64xf32> -> vector<16x64xf32>
    %c2_227 = arith.constant 2 : index
    %c0_228 = arith.constant 0 : index
    %c0_229 = arith.constant 0 : index
    %208 = vector.load %arg25[%c2_227, %c0_228, %c0_229] : memref<3x64x64xf32, #tpu.memory_space<vmem>>, vector<1x64x64xf32>
    %209 = vector.shape_cast %208 : vector<1x64x64xf32> to vector<64x64xf32>
    %cst_230 = arith.constant dense<0.000000e+00> : vector<16x64xf32>
    %210 = tpu.matmul %207, %209, %cst_230 {dimension_numbers = #tpu.dot_dimension_numbers<[1], [0], [0], [1], [0, 0, 1, 1], [], []>} : vector<16x64xf32>, vector<64x64xf32>, vector<16x64xf32> -> vector<16x64xf32>
    %211 = arith.addf %204, %210 : vector<16x64xf32>
    %c0_231 = arith.constant 0 : index
    %c0_232 = arith.constant 0 : index
    %212 = vector.load %arg26[%c0_231, %c0_232] : memref<1x64xf32, #tpu.memory_space<vmem>>, vector<1x64xf32>
    %213 = vector.broadcast %212 : vector<1x64xf32> to vector<16x64xf32>
    %214 = arith.addf %211, %213 : vector<16x64xf32>
    %cst_233 = arith.constant 0.000000e+00 : f32
    %215 = vector.broadcast %cst_233 : f32 to vector<16x64xf32>
    %216 = arith.maximumf %214, %215 : vector<16x64xf32>
    %c0_234 = arith.constant 0 : index
    %c0_235 = arith.constant 0 : index
    %c0_236 = arith.constant 0 : index
    %217 = vector.load %arg27[%c0_234, %c0_235, %c0_236] : memref<3x8x16xf32, #tpu.memory_space<vmem>>, vector<1x8x16xf32>
    %218 = vector.shape_cast %217 : vector<1x8x16xf32> to vector<8x16xf32>
    %cst_237 = arith.constant dense<0.000000e+00> : vector<8x64xf32>
    %219 = tpu.matmul %218, %216, %cst_237 {dimension_numbers = #tpu.dot_dimension_numbers<[1], [0], [0], [1], [0, 0, 1, 1], [], []>} : vector<8x16xf32>, vector<16x64xf32>, vector<8x64xf32> -> vector<8x64xf32>
    %c0_238 = arith.constant 0 : index
    %c0_239 = arith.constant 0 : index
    %c0_240 = arith.constant 0 : index
    %220 = vector.load %arg28[%c0_238, %c0_239, %c0_240] : memref<3x64x64xf32, #tpu.memory_space<vmem>>, vector<1x64x64xf32>
    %221 = vector.shape_cast %220 : vector<1x64x64xf32> to vector<64x64xf32>
    %cst_241 = arith.constant dense<0.000000e+00> : vector<8x64xf32>
    %222 = tpu.matmul %219, %221, %cst_241 {dimension_numbers = #tpu.dot_dimension_numbers<[1], [0], [0], [1], [0, 0, 1, 1], [], []>} : vector<8x64xf32>, vector<64x64xf32>, vector<8x64xf32> -> vector<8x64xf32>
    %c1_242 = arith.constant 1 : index
    %c0_243 = arith.constant 0 : index
    %c0_244 = arith.constant 0 : index
    %223 = vector.load %arg27[%c1_242, %c0_243, %c0_244] : memref<3x8x16xf32, #tpu.memory_space<vmem>>, vector<1x8x16xf32>
    %224 = vector.shape_cast %223 : vector<1x8x16xf32> to vector<8x16xf32>
    %cst_245 = arith.constant dense<0.000000e+00> : vector<8x64xf32>
    %225 = tpu.matmul %224, %216, %cst_245 {dimension_numbers = #tpu.dot_dimension_numbers<[1], [0], [0], [1], [0, 0, 1, 1], [], []>} : vector<8x16xf32>, vector<16x64xf32>, vector<8x64xf32> -> vector<8x64xf32>
    %c1_246 = arith.constant 1 : index
    %c0_247 = arith.constant 0 : index
    %c0_248 = arith.constant 0 : index
    %226 = vector.load %arg28[%c1_246, %c0_247, %c0_248] : memref<3x64x64xf32, #tpu.memory_space<vmem>>, vector<1x64x64xf32>
    %227 = vector.shape_cast %226 : vector<1x64x64xf32> to vector<64x64xf32>
    %cst_249 = arith.constant dense<0.000000e+00> : vector<8x64xf32>
    %228 = tpu.matmul %225, %227, %cst_249 {dimension_numbers = #tpu.dot_dimension_numbers<[1], [0], [0], [1], [0, 0, 1, 1], [], []>} : vector<8x64xf32>, vector<64x64xf32>, vector<8x64xf32> -> vector<8x64xf32>
    %229 = arith.addf %222, %228 : vector<8x64xf32>
    %c2_250 = arith.constant 2 : index
    %c0_251 = arith.constant 0 : index
    %c0_252 = arith.constant 0 : index
    %230 = vector.load %arg27[%c2_250, %c0_251, %c0_252] : memref<3x8x16xf32, #tpu.memory_space<vmem>>, vector<1x8x16xf32>
    %231 = vector.shape_cast %230 : vector<1x8x16xf32> to vector<8x16xf32>
    %cst_253 = arith.constant dense<0.000000e+00> : vector<8x64xf32>
    %232 = tpu.matmul %231, %216, %cst_253 {dimension_numbers = #tpu.dot_dimension_numbers<[1], [0], [0], [1], [0, 0, 1, 1], [], []>} : vector<8x16xf32>, vector<16x64xf32>, vector<8x64xf32> -> vector<8x64xf32>
    %c2_254 = arith.constant 2 : index
    %c0_255 = arith.constant 0 : index
    %c0_256 = arith.constant 0 : index
    %233 = vector.load %arg28[%c2_254, %c0_255, %c0_256] : memref<3x64x64xf32, #tpu.memory_space<vmem>>, vector<1x64x64xf32>
    %234 = vector.shape_cast %233 : vector<1x64x64xf32> to vector<64x64xf32>
    %cst_257 = arith.constant dense<0.000000e+00> : vector<8x64xf32>
    %235 = tpu.matmul %232, %234, %cst_257 {dimension_numbers = #tpu.dot_dimension_numbers<[1], [0], [0], [1], [0, 0, 1, 1], [], []>} : vector<8x64xf32>, vector<64x64xf32>, vector<8x64xf32> -> vector<8x64xf32>
    %236 = arith.addf %229, %235 : vector<8x64xf32>
    %c0_258 = arith.constant 0 : index
    %c0_259 = arith.constant 0 : index
    %237 = vector.load %arg29[%c0_258, %c0_259] : memref<1x64xf32, #tpu.memory_space<vmem>>, vector<1x64xf32>
    %238 = vector.broadcast %237 : vector<1x64xf32> to vector<8x64xf32>
    %239 = arith.addf %236, %238 : vector<8x64xf32>
    %cst_260 = arith.constant 0.000000e+00 : f32
    %240 = vector.broadcast %cst_260 : f32 to vector<8x64xf32>
    %241 = arith.maximumf %239, %240 : vector<8x64xf32>
    %c0_261 = arith.constant 0 : index
    %c0_262 = arith.constant 0 : index
    %242 = vector.load %arg30[%c0_261, %c0_262] : memref<2x8xf32, #tpu.memory_space<vmem>>, vector<2x8xf32>
    %cst_263 = arith.constant dense<0.000000e+00> : vector<2x64xf32>
    %243 = tpu.matmul %242, %241, %cst_263 {dimension_numbers = #tpu.dot_dimension_numbers<[1], [0], [0], [1], [0, 0, 1, 1], [], []>} : vector<2x8xf32>, vector<8x64xf32>, vector<2x64xf32> -> vector<2x64xf32>
    %c0_264 = arith.constant 0 : index
    %c0_265 = arith.constant 0 : index
    %244 = vector.load %arg31[%c0_264, %c0_265] : memref<64x2xf32, #tpu.memory_space<vmem>>, vector<64x2xf32>
    %cst_266 = arith.constant dense<0.000000e+00> : vector<2x2xf32>
    %245 = tpu.matmul %243, %244, %cst_266 {dimension_numbers = #tpu.dot_dimension_numbers<[1], [0], [0], [1], [0, 0, 1, 1], [], []>} : vector<2x64xf32>, vector<64x2xf32>, vector<2x2xf32> -> vector<2x2xf32>
    %c0_267 = arith.constant 0 : index
    %c0_268 = arith.constant 0 : index
    %246 = vector.load %arg32[%c0_267, %c0_268] : memref<1x2xf32, #tpu.memory_space<vmem>>, vector<1x2xf32>
    %247 = vector.broadcast %246 : vector<1x2xf32> to vector<2x2xf32>
    %248 = arith.addf %245, %247 : vector<2x2xf32>
    %c0_269 = arith.constant 0 : index
    %c0_270 = arith.constant 0 : index
    %249 = vector.load %arg33[%c0_269, %c0_270] : memref<8x64xf32, #tpu.memory_space<vmem>>, vector<8x64xf32>
    tpu.vector_store %arg33[%c0_269, %c0_270], %100 {strides = array<i32>} : memref<8x64xf32, #tpu.memory_space<vmem>>, vector<8x64xf32>,
    %c0_271 = arith.constant 0 : index
    %c0_272 = arith.constant 0 : index
    %250 = vector.load %arg34[%c0_271, %c0_272] : memref<16x64xf32, #tpu.memory_space<vmem>>, vector<16x64xf32>
    tpu.vector_store %arg34[%c0_271, %c0_272], %146 {strides = array<i32>} : memref<16x64xf32, #tpu.memory_space<vmem>>, vector<16x64xf32>,
    %c0_273 = arith.constant 0 : index
    %c0_274 = arith.constant 0 : index
    %251 = vector.load %arg35[%c0_273, %c0_274] : memref<32x64xf32, #tpu.memory_space<vmem>>, vector<32x64xf32>
    tpu.vector_store %arg35[%c0_273, %c0_274], %190 {strides = array<i32>} : memref<32x64xf32, #tpu.memory_space<vmem>>, vector<32x64xf32>,
    %c0_275 = arith.constant 0 : index
    %c0_276 = arith.constant 0 : index
    %252 = vector.load %arg36[%c0_275, %c0_276] : memref<2x2xf32, #tpu.memory_space<vmem>>, vector<2x2xf32>
    tpu.vector_store %arg36[%c0_275, %c0_276], %248 {strides = array<i32>} : memref<2x2xf32, #tpu.memory_space<vmem>>, vector<2x2xf32>,
    return
  }
  func.func @transform_0(%arg0: i32) -> (i32, i32) {
    %c0_i32 = arith.constant 0 : i32
    %c0_i32_0 = arith.constant 0 : i32
    %c0_i32_1 = arith.constant 0 : i32
    return %c0_i32, %c0_i32_0 : i32, i32
  }
  func.func @transform_1(%arg0: i32) -> (i32, i32, i32) {
    %c0_i32 = arith.constant 0 : i32
    %c0_i32_0 = arith.constant 0 : i32
    %c0_i32_1 = arith.constant 0 : i32
    %c0_i32_2 = arith.constant 0 : i32
    return %c0_i32, %c0_i32_0, %c0_i32_1 : i32, i32, i32
  }
  func.func @transform_2(%arg0: i32) -> (i32, i32, i32) {
    %c0_i32 = arith.constant 0 : i32
    %c0_i32_0 = arith.constant 0 : i32
    %c0_i32_1 = arith.constant 0 : i32
    %c0_i32_2 = arith.constant 0 : i32
    return %c0_i32, %c0_i32_0, %c0_i32_1 : i32, i32, i32
  }
  func.func @transform_3(%arg0: i32) -> (i32, i32) {
    %c0_i32 = arith.constant 0 : i32
    %c0_i32_0 = arith.constant 0 : i32
    %c0_i32_1 = arith.constant 0 : i32
    return %c0_i32, %c0_i32_0 : i32, i32
  }
  func.func @transform_4(%arg0: i32) -> (i32, i32, i32) {
    %c0_i32 = arith.constant 0 : i32
    %c0_i32_0 = arith.constant 0 : i32
    %c0_i32_1 = arith.constant 0 : i32
    %c0_i32_2 = arith.constant 0 : i32
    return %c0_i32, %c0_i32_0, %c0_i32_1 : i32, i32, i32
  }
  func.func @transform_5(%arg0: i32) -> (i32, i32, i32) {
    %c0_i32 = arith.constant 0 : i32
    %c0_i32_0 = arith.constant 0 : i32
    %c0_i32_1 = arith.constant 0 : i32
    %c0_i32_2 = arith.constant 0 : i32
    return %c0_i32, %c0_i32_0, %c0_i32_1 : i32, i32, i32
  }
  func.func @transform_6(%arg0: i32) -> (i32, i32) {
    %c0_i32 = arith.constant 0 : i32
    %c0_i32_0 = arith.constant 0 : i32
    %c0_i32_1 = arith.constant 0 : i32
    return %c0_i32, %c0_i32_0 : i32, i32
  }
  func.func @transform_7(%arg0: i32) -> (i32, i32, i32) {
    %c0_i32 = arith.constant 0 : i32
    %c0_i32_0 = arith.constant 0 : i32
    %c0_i32_1 = arith.constant 0 : i32
    %c0_i32_2 = arith.constant 0 : i32
    return %c0_i32, %c0_i32_0, %c0_i32_1 : i32, i32, i32
  }
  func.func @transform_8(%arg0: i32) -> (i32, i32, i32) {
    %c0_i32 = arith.constant 0 : i32
    %c0_i32_0 = arith.constant 0 : i32
    %c0_i32_1 = arith.constant 0 : i32
    %c0_i32_2 = arith.constant 0 : i32
    return %c0_i32, %c0_i32_0, %c0_i32_1 : i32, i32, i32
  }
  func.func @transform_9(%arg0: i32) -> (i32, i32) {
    %c0_i32 = arith.constant 0 : i32
    %c0_i32_0 = arith.constant 0 : i32
    %c0_i32_1 = arith.constant 0 : i32
    return %c0_i32, %c0_i32_0 : i32, i32
  }
  func.func @transform_10(%arg0: i32) -> (i32, i32, i32) {
    %c0_i32 = arith.constant 0 : i32
    %c0_i32_0 = arith.constant 0 : i32
    %c0_i32_1 = arith.constant 0 : i32
    %c0_i32_2 = arith.constant 0 : i32
    return %c0_i32, %c0_i32_0, %c0_i32_1 : i32, i32, i32
  }
  func.func @transform_11(%arg0: i32) -> (i32, i32, i32) {
    %c0_i32 = arith.constant 0 : i32
    %c0_i32_0 = arith.constant 0 : i32
    %c0_i32_1 = arith.constant 0 : i32
    %c0_i32_2 = arith.constant 0 : i32
    return %c0_i32, %c0_i32_0, %c0_i32_1 : i32, i32, i32
  }
  func.func @transform_12(%arg0: i32) -> (i32, i32) {
    %c0_i32 = arith.constant 0 : i32
    %c0_i32_0 = arith.constant 0 : i32
    %c0_i32_1 = arith.constant 0 : i32
    return %c0_i32, %c0_i32_0 : i32, i32
  }
  func.func @transform_13(%arg0: i32) -> (i32, i32, i32) {
    %c0_i32 = arith.constant 0 : i32
    %c0_i32_0 = arith.constant 0 : i32
    %c0_i32_1 = arith.constant 0 : i32
    %c0_i32_2 = arith.constant 0 : i32
    return %c0_i32, %c0_i32_0, %c0_i32_1 : i32, i32, i32
  }
  func.func @transform_14(%arg0: i32) -> (i32, i32, i32) {
    %c0_i32 = arith.constant 0 : i32
    %c0_i32_0 = arith.constant 0 : i32
    %c0_i32_1 = arith.constant 0 : i32
    %c0_i32_2 = arith.constant 0 : i32
    return %c0_i32, %c0_i32_0, %c0_i32_1 : i32, i32, i32
  }
  func.func @transform_15(%arg0: i32) -> (i32, i32, i32) {
    %c0_i32 = arith.constant 0 : i32
    %c0_i32_0 = arith.constant 0 : i32
    %c0_i32_1 = arith.constant 0 : i32
    %c0_i32_2 = arith.constant 0 : i32
    return %c0_i32, %c0_i32_0, %c0_i32_1 : i32, i32, i32
  }
  func.func @transform_16(%arg0: i32) -> (i32, i32, i32) {
    %c0_i32 = arith.constant 0 : i32
    %c0_i32_0 = arith.constant 0 : i32
    %c0_i32_1 = arith.constant 0 : i32
    %c0_i32_2 = arith.constant 0 : i32
    return %c0_i32, %c0_i32_0, %c0_i32_1 : i32, i32, i32
  }
  func.func @transform_17(%arg0: i32) -> (i32, i32) {
    %c0_i32 = arith.constant 0 : i32
    %c0_i32_0 = arith.constant 0 : i32
    %c0_i32_1 = arith.constant 0 : i32
    return %c0_i32, %c0_i32_0 : i32, i32
  }
  func.func @transform_18(%arg0: i32) -> (i32, i32, i32) {
    %c0_i32 = arith.constant 0 : i32
    %c0_i32_0 = arith.constant 0 : i32
    %c0_i32_1 = arith.constant 0 : i32
    %c0_i32_2 = arith.constant 0 : i32
    return %c0_i32, %c0_i32_0, %c0_i32_1 : i32, i32, i32
  }
  func.func @transform_19(%arg0: i32) -> (i32, i32, i32) {
    %c0_i32 = arith.constant 0 : i32
    %c0_i32_0 = arith.constant 0 : i32
    %c0_i32_1 = arith.constant 0 : i32
    %c0_i32_2 = arith.constant 0 : i32
    return %c0_i32, %c0_i32_0, %c0_i32_1 : i32, i32, i32
  }
  func.func @transform_20(%arg0: i32) -> (i32, i32, i32) {
    %c0_i32 = arith.constant 0 : i32
    %c0_i32_0 = arith.constant 0 : i32
    %c0_i32_1 = arith.constant 0 : i32
    %c0_i32_2 = arith.constant 0 : i32
    return %c0_i32, %c0_i32_0, %c0_i32_1 : i32, i32, i32
  }
  func.func @transform_21(%arg0: i32) -> (i32, i32, i32) {
    %c0_i32 = arith.constant 0 : i32
    %c0_i32_0 = arith.constant 0 : i32
    %c0_i32_1 = arith.constant 0 : i32
    %c0_i32_2 = arith.constant 0 : i32
    return %c0_i32, %c0_i32_0, %c0_i32_1 : i32, i32, i32
  }
  func.func @transform_22(%arg0: i32) -> (i32, i32) {
    %c0_i32 = arith.constant 0 : i32
    %c0_i32_0 = arith.constant 0 : i32
    %c0_i32_1 = arith.constant 0 : i32
    return %c0_i32, %c0_i32_0 : i32, i32
  }
  func.func @transform_23(%arg0: i32) -> (i32, i32, i32) {
    %c0_i32 = arith.constant 0 : i32
    %c0_i32_0 = arith.constant 0 : i32
    %c0_i32_1 = arith.constant 0 : i32
    %c0_i32_2 = arith.constant 0 : i32
    return %c0_i32, %c0_i32_0, %c0_i32_1 : i32, i32, i32
  }
  func.func @transform_24(%arg0: i32) -> (i32, i32, i32) {
    %c0_i32 = arith.constant 0 : i32
    %c0_i32_0 = arith.constant 0 : i32
    %c0_i32_1 = arith.constant 0 : i32
    %c0_i32_2 = arith.constant 0 : i32
    return %c0_i32, %c0_i32_0, %c0_i32_1 : i32, i32, i32
  }
  func.func @transform_25(%arg0: i32) -> (i32, i32) {
    %c0_i32 = arith.constant 0 : i32
    %c0_i32_0 = arith.constant 0 : i32
    %c0_i32_1 = arith.constant 0 : i32
    return %c0_i32, %c0_i32_0 : i32, i32
  }
  func.func @transform_26(%arg0: i32) -> (i32, i32, i32) {
    %c0_i32 = arith.constant 0 : i32
    %c0_i32_0 = arith.constant 0 : i32
    %c0_i32_1 = arith.constant 0 : i32
    %c0_i32_2 = arith.constant 0 : i32
    return %c0_i32, %c0_i32_0, %c0_i32_1 : i32, i32, i32
  }
  func.func @transform_27(%arg0: i32) -> (i32, i32, i32) {
    %c0_i32 = arith.constant 0 : i32
    %c0_i32_0 = arith.constant 0 : i32
    %c0_i32_1 = arith.constant 0 : i32
    %c0_i32_2 = arith.constant 0 : i32
    return %c0_i32, %c0_i32_0, %c0_i32_1 : i32, i32, i32
  }
  func.func @transform_28(%arg0: i32) -> (i32, i32) {
    %c0_i32 = arith.constant 0 : i32
    %c0_i32_0 = arith.constant 0 : i32
    %c0_i32_1 = arith.constant 0 : i32
    return %c0_i32, %c0_i32_0 : i32, i32
  }
  func.func @transform_29(%arg0: i32) -> (i32, i32) {
    %c0_i32 = arith.constant 0 : i32
    %c0_i32_0 = arith.constant 0 : i32
    %c0_i32_1 = arith.constant 0 : i32
    return %c0_i32, %c0_i32_0 : i32, i32
  }
  func.func @transform_30(%arg0: i32) -> (i32, i32) {
    %c0_i32 = arith.constant 0 : i32
    %c0_i32_0 = arith.constant 0 : i32
    %c0_i32_1 = arith.constant 0 : i32
    return %c0_i32, %c0_i32_0 : i32, i32
  }
  func.func @transform_31(%arg0: i32) -> (i32, i32) {
    %c0_i32 = arith.constant 0 : i32
    %c0_i32_0 = arith.constant 0 : i32
    %c0_i32_1 = arith.constant 0 : i32
    return %c0_i32, %c0_i32_0 : i32, i32
  }
  func.func @transform_32(%arg0: i32) -> (i32, i32) {
    %c0_i32 = arith.constant 0 : i32
    %c0_i32_0 = arith.constant 0 : i32
    %c0_i32_1 = arith.constant 0 : i32
    return %c0_i32, %c0_i32_0 : i32, i32
  }
  func.func @transform_33(%arg0: i32) -> (i32, i32) {
    %c0_i32 = arith.constant 0 : i32
    %c0_i32_0 = arith.constant 0 : i32
    %c0_i32_1 = arith.constant 0 : i32
    return %c0_i32, %c0_i32_0 : i32, i32
  }
  func.func @transform_34(%arg0: i32) -> (i32, i32) {
    %c0_i32 = arith.constant 0 : i32
    %c0_i32_0 = arith.constant 0 : i32
    %c0_i32_1 = arith.constant 0 : i32
    return %c0_i32, %c0_i32_0 : i32, i32
  }
  func.func @transform_35(%arg0: i32) -> (i32, i32) {
    %c0_i32 = arith.constant 0 : i32
    %c0_i32_0 = arith.constant 0 : i32
    %c0_i32_1 = arith.constant 0 : i32
    return %c0_i32, %c0_i32_0 : i32, i32
  }
}

</mosaic_0001>

<bundles_post_ra>
// kernel: _lambda_.1
= control target key start
LH: loop header
LB: loop body
LE: loop exit
PB: predicated region body
PF: predicated region fallthrough
CT: control target
= control target key end

     0   :  { %s3532_s6 = smov 1   ;;  %s3533_s10 = smov 2   ;;  %s4421_s0 = inlined_call_operand.smem [shape: u32[36], index: -1, kind: input, shape index: {}] }
   0x1   :  { %s3590_s5 = sld [smem:[%s4421_s0]]   ;;  %s3534_s14 = smov 3  }
   0x2   :  { %s3595_s9 = sld [smem:[%s4421_s0 + %s3532_s6]]   ;;  %s3535_s18 = smov 4  }
   0x3   :  { %s3600_s13 = sld [smem:[%s4421_s0 + %s3533_s10]]   ;;  %s3536_s22 = smov 5  }
   0x4   :  { %s3605_s17 = sld [smem:[%s4421_s0 + %s3534_s14]]   ;;  %s3537_s26 = smov 6  }
   0x5   :  { %s3610_s21 = sld [smem:[%s4421_s0 + %s3535_s18]]   ;;  %s3538_s30 = smov 7  }
   0x6   :  { %s3615_s25 = sld [smem:[%s4421_s0 + %s3536_s22]]   ;;  %s3539_s4 = smov 8  }
   0x7   :  { %s3620_s29 = sld [smem:[%s4421_s0 + %s3537_s26]]   ;;  %s3540_s10 = smov 9  }
   0x8   :  { %s3625_s3 = sld [smem:[%s4421_s0 + %s3538_s30]]   ;;  %s3541_s15 = smov 10  }
   0x9   :  { %4439 = sst [smem:[#allocation31_spill]] %s3600_s13  ;;  %s3542_s20 = smov 11  }
   0xa   :  { %4440 = sst [smem:[#allocation32_spill]] %s3605_s17  ;;  %s3543_s26 = smov 12  }
   0xb   :  { %4441 = sst [smem:[#allocation33_spill]] %s3610_s21  ;;  %s3544_s1 = smov 13  }
   0xc   :  { %4442 = sst [smem:[#allocation34_spill]] %s3615_s25  ;;  %s3545_s7 = smov 14  }
   0xd   :  { %s3630_s8 = sld [smem:[%s4421_s0 + %s3539_s4]]   ;;  %s3547_s22 = smov 16  }
   0xe   :  { %4443 = sst [smem:[#allocation35_spill]] %s3625_s3  ;;  %s3548_s28 = smov 17  }
   0xf   :  { %s3635_s14 = sld [smem:[%s4421_s0 + %s3540_s10]]  }
  0x10   :  { %s3640_s19 = sld [smem:[%s4421_s0 + %s3541_s15]]   ;;  %s3546_s15 = smov 15  }
  0x11   :  { %s3645_s24 = sld [smem:[%s4421_s0 + %s3542_s20]]  }
  0x12   :  { %s3650_s30 = sld [smem:[%s4421_s0 + %s3543_s26]]  }
  0x13   :  { %4444 = sst [smem:[#allocation36_spill]] %s3630_s8 }
  0x14   :  { %s3655_s6 = sld [smem:[%s4421_s0 + %s3544_s1]]  }
  0x15   :  { %s3660_s12 = sld [smem:[%s4421_s0 + %s3545_s7]]   ;;  %s3549_s7 = smov 18  }
  0x16   :  { %s3665_s20 = sld [smem:[%s4421_s0 + %s3546_s15]]   ;;  %s3550_s15 = smov 19  }
  0x17   :  { %4445 = sst [smem:[#allocation37_spill]] %s3645_s24 }
  0x18   :  { %s3670_s27 = sld [smem:[%s4421_s0 + %s3547_s22]]   ;;  %s3551_s22 = smov 20  }
  0x19   :  { %s3675_s4 = sld [smem:[%s4421_s0 + %s3548_s28]]   ;;  %s3552_s28 = smov 21  }
  0x1a   :  { %4446 = sst [smem:[#allocation38_spill]] %s3655_s6 }
  0x1b   :  { %4447 = sst [smem:[#allocation39_spill]] %s3660_s12 }
  0x1c   :  { %s3680_s6 = sld [smem:[%s4421_s0 + %s3549_s7]]   ;;  %s3553_s7 = smov 22  }
  0x1d   :  { %s3685_s12 = sld [smem:[%s4421_s0 + %s3550_s15]]   ;;  %s3554_s15 = smov 23  }
  0x1e   :  { %4448 = sst [smem:[#allocation40_spill]] %s3670_s27 }
  0x1f   :  { %s3690_s27 = sld [smem:[%s4421_s0 + %s3551_s22]]   ;;  %s3555_s22 = smov 24  }
  0x20   :  { %s3695_s24 = sld [smem:[%s4421_s0 + %s3552_s28]]   ;;  %s3556_s28 = smov 25  }
  0x22   :  { %4449 = sst [smem:[#allocation41_spill]] %s3680_s6 }
  0x23   :  { %4450 = sst [smem:[#allocation42_spill]] %s3685_s12 }
  0x24   :  { %s3700_s6 = sld [smem:[%s4421_s0 + %s3553_s7]]   ;;  %s3557_s7 = smov 26  }
  0x25   :  { %4451 = sst [smem:[#allocation43_spill]] %s3690_s27 }
  0x26   :  { %4452 = sst [smem:[#allocation44_spill]] %s3695_s24 }
  0x27   :  { %s3705_s12 = sld [smem:[%s4421_s0 + %s3554_s15]]   ;;  %s3558_s15 = smov 27  }
  0x28   :  { %s3710_s27 = sld [smem:[%s4421_s0 + %s3555_s22]]   ;;  %s3559_s22 = smov 28  }
  0x29   :  { %s3715_s24 = sld [smem:[%s4421_s0 + %s3556_s28]]   ;;  %s3560_s28 = smov 29  }
  0x2a   :  { %s3720_s3 = sld [smem:[%s4421_s0 + %s3557_s7]]   ;;  %s3561_s7 = smov 30  }
  0x2b   :  { %s3725_s8 = sld [smem:[%s4421_s0 + %s3558_s15]]   ;;  %s3562_s15 = smov 31  }
  0x2c   :  { %s3735_s21 = sld [smem:[%s4421_s0 + %s3560_s28]]   ;;  %s3564_s28 = smov 33  }
  0x2d   :  { %s3755_s17 = sld [smem:[%s4421_s0 + %s3564_s28]]  }
  0x2e   :  { %4453 = sst [smem:[#allocation45_spill]] %s3710_s27 }
  0x2f   :  { %s3730_s27 = sld [smem:[%s4421_s0 + %s3559_s22]]   ;;  %s3563_s22 = smov 32  }
  0x30   :  { %4454 = sst [smem:[#allocation46_spill]] %s3720_s3 }
  0x31   :  { %4455 = sst [smem:[#allocation47_spill]] %s3725_s8 }
  0x32   :  { %s3740_s3 = sld [smem:[%s4421_s0 + %s3561_s7]]   ;;  %s3565_s7 = smov 34  }
  0x33   :  { %s3745_s8 = sld [smem:[%s4421_s0 + %s3562_s15]]   ;;  %s3566_s15 = smov 35  }
  0x34   :  { %s3750_s25 = sld [smem:[%s4421_s0 + %s3563_s22]]  }
  0x35   :  { %s3765_s13 = sld [smem:[%s4421_s0 + %s3566_s15]]  }
  0x38   :  { %4456 = sst [smem:[#allocation48_spill]] %s3740_s3 }
  0x39   :  { %s3760_s3 = sld [smem:[%s4421_s0 + %s3565_s7]]  }
  0x3a   :  { %77 = vsyncpa [#allocation3], 0 }
  0x3b   :  { %78 = vsyncpa [#allocation6], 0 }
  0x3c   :  { %79 = vsyncpa [#allocation9], 0 }
  0x3d   :  { %80 = vsyncpa [#allocation12], 0 }
  0x3e   :  { %81 = vsyncpa [#allocation15], 0 }
  0x3f   :  { %82 = vsyncpa [#allocation18], 0 }
  0x40   :  { %83 = vsyncpa [#allocation21], 0  ;;  %s117_s22 = sshll.u32 %s3635_s14, 4  ;;  %s118_s22 = int_to_ptr.hbm [resolvable:$true] %s117_s22 }
  0x41   :  { %84 = vsyncpa [#allocation4], 0  ;;  %s3567_s23 = smov [#allocation5]   ;;  %s143_s28 = sshll.u32 %s3650_s30, 4  ;;  %s144_s28 = int_to_ptr.hbm [resolvable:$true] %s143_s28 }
  0x42   :  { %s119_s26 = sshll.u32 %s3567_s23, 4  ;;  %s3204_s0 = sshra.s32 %s118_s22, 4  ;;  %s120_s26 = int_to_ptr.vmem [resolvable:$true] %s119_s26  ;;  %s3205_s0 = int_to_ptr.hbm [resolvable:$true] %s3204_s0 }
  0x43   :  { %s3206_s1 = scalar_lea.hbm %s3205_s0, 1  ;;  %s3208_s2 = scalar_lea.hbm %s3635_s14, 1 }
  0x44   :  { %p3207_p0 = scmp.ne.s32.totalorder %s3205_s0, %s3206_s1  ;;  %p3209_p1 = scmp.lt.s32.totalorder %s3205_s0, %s3635_s14 }
  0x45   :  { %p3210_p2 = scmp.lt.s32.totalorder %s3208_s2, %s3206_s1 }
  0x47   :  { %p3211_p3 = por %p3210_p2, %p3209_p1 }
  0x49   :  { %p3212_p4 = pnand %p3211_p3, %p3207_p0 }
  0x4b   :  { %3215 = shalt.err (!%p3212_p4)
}
  0x4c   :  { %122 = dma.hbm_to_vmem [thread:$0]  %s118_s22, 16, %s120_s26, [#allocation6]  }
  0x4d   :  { %s3568_s7 = smov [#allocation8]   ;;  %s173_s11 = sshll.u32 %s3675_s4, 4  ;;  %s174_s11 = int_to_ptr.hbm [resolvable:$true] %s173_s11 }
  0x4e   :  { %s145_s10 = sshll.u32 %s3568_s7, 4  ;;  %s3228_s15 = sshra.s32 %s144_s28, 4  ;;  %s146_s10 = int_to_ptr.vmem [resolvable:$true] %s145_s10  ;;  %s3229_s15 = int_to_ptr.hbm [resolvable:$true] %s3228_s15 }
  0x4f   :  { %s3230_s16 = scalar_lea.hbm %s3229_s15, 1  ;;  %s3232_s18 = scalar_lea.hbm %s3650_s30, 1 }
  0x50   :  { %p3231_p5 = scmp.ne.s32.totalorder %s3229_s15, %s3230_s16  ;;  %p3233_p6 = scmp.lt.s32.totalorder %s3229_s15, %s3650_s30 }
  0x51   :  { %p3234_p7 = scmp.lt.s32.totalorder %s3232_s18, %s3230_s16 }
  0x53   :  { %p3235_p8 = por %p3234_p7, %p3233_p6 }
  0x55   :  { %p3236_p9 = pnand %p3235_p8, %p3231_p5 }
  0x57   :  { %3239 = shalt.err (!%p3236_p9)
}
  0x58   :  { %148 = dma.hbm_to_vmem [thread:$0]  %s144_s28, 16, %s146_s10, [#allocation9]  }
  0x59   :  { %s3569_s14 = smov [#allocation11]   ;;  %s202_s23 = sshll.u32 %s3705_s12, 4  ;;  %s203_s23 = int_to_ptr.hbm [resolvable:$true] %s202_s23 }
  0x5a   :  { %s175_s22 = sshll.u32 %s3569_s14, 4  ;;  %s3252_s26 = sshra.s32 %s174_s11, 4  ;;  %s176_s22 = int_to_ptr.vmem [resolvable:$true] %s175_s22  ;;  %s3253_s26 = int_to_ptr.hbm [resolvable:$true] %s3252_s26 }
  0x5b   :  { %s3254_s0 = scalar_lea.hbm %s3253_s26, 1  ;;  %s3256_s1 = scalar_lea.hbm %s3675_s4, 1 }
  0x5c   :  { %p3255_p10 = scmp.ne.s32.totalorder %s3253_s26, %s3254_s0  ;;  %p3257_p11 = scmp.lt.s32.totalorder %s3253_s26, %s3675_s4 }
  0x5d   :  { %p3258_p12 = scmp.lt.s32.totalorder %s3256_s1, %s3254_s0 }
  0x5f   :  { %p3259_p13 = por %p3258_p12, %p3257_p11 }
  0x61   :  { %p3260_p0 = pnand %p3259_p13, %p3255_p10 }
  0x63   :  { %3263 = shalt.err (!%p3260_p0)
}
  0x64   :  { %178 = dma.hbm_to_vmem [thread:$0]  %s174_s11, 16, %s176_s22, [#allocation12]  }
  0x65   :  { %s3570_s30 = smov [#allocation14]   ;;  %s233_s2 = sshll.u32 %s3730_s27, 4  ;;  %s3778_s2 = int_to_ptr.hbm [resolvable:$true] %s233_s2 }
  0x66   :  { %s204_s28 = sshll.u32 %s3570_s30, 4  ;;  %s3276_s7 = sshra.s32 %s203_s23, 4  ;;  %s205_s28 = int_to_ptr.vmem [resolvable:$true] %s204_s28  ;;  %s3277_s7 = int_to_ptr.hbm [resolvable:$true] %s3276_s7 }
  0x67   :  { %s3278_s10 = scalar_lea.hbm %s3277_s7, 48  ;;  %s3280_s4 = scalar_lea.hbm %s3705_s12, 48 }
  0x68   :  { %p3279_p1 = scmp.ne.s32.totalorder %s3277_s7, %s3278_s10  ;;  %p3281_p2 = scmp.lt.s32.totalorder %s3277_s7, %s3705_s12 }
  0x69   :  { %p3282_p3 = scmp.lt.s32.totalorder %s3280_s4, %s3278_s10 }
  0x6b   :  { %p3283_p4 = por %p3282_p3, %p3281_p2 }
  0x6d   :  { %p3284_p5 = pnand %p3283_p4, %p3279_p1 }
  0x6f   :  { %3287 = shalt.err (!%p3284_p5)
}
  0x70   :  { %s3571_s11 = smov 128   ;;  %s3572_s15 = smov 8  }
  0x71   :  { %210 = dma.hbm_to_vmem [thread:$0]  %s203_s23, 768, %s205_s28, [#allocation15], %s3571_s11, %s3571_s11, %s3572_s15  }
  0x72   :  { %s102_s16 = sshll.u32 %s3620_s29, 4  ;;  %s3573_s18 = smov [#allocation17]   ;;  %s103_s16 = int_to_ptr.hbm [resolvable:$true] %s102_s16 }
  0x73   :  { %s235_s14 = sshll.u32 %s3573_s18, 4  ;;  %s3300_s12 = sshra.s32 %s3778_s2, 4  ;;  %s236_s14 = int_to_ptr.vmem [resolvable:$true] %s235_s14  ;;  %s3301_s12 = int_to_ptr.hbm [resolvable:$true] %s3300_s12 }
  0x74   :  { %s3302_s22 = scalar_lea.hbm %s3301_s12, 1  ;;  %s3304_s26 = scalar_lea.hbm %s3730_s27, 1 }
  0x75   :  { %p3303_p6 = scmp.ne.s32.totalorder %s3301_s12, %s3302_s22  ;;  %p3305_p7 = scmp.lt.s32.totalorder %s3301_s12, %s3730_s27 }
  0x76   :  { %p3306_p8 = scmp.lt.s32.totalorder %s3304_s26, %s3302_s22 }
  0x78   :  { %p3307_p9 = por %p3306_p8, %p3305_p7 }
  0x7a   :  { %p3308_p10 = pnand %p3307_p9, %p3303_p6 }
  0x7c   :  { %3311 = shalt.err (!%p3308_p10)
}
  0x7d   :  { %238 = dma.hbm_to_vmem [thread:$0]  %s3778_s2, 16, %s236_s14, [#allocation18]  }
  0x7e   :  { %s3574_s23 = smov [#allocation2]   ;;  %s127_s1 = sshll.u32 %s3640_s19, 4  ;;  %s3791_s1 = int_to_ptr.hbm [resolvable:$true] %s127_s1 }
  0x7f   :  { %s104_s0 = sshll.u32 %s3574_s23, 4  ;;  %s3324_s30 = sshra.s32 %s103_s16, 4  ;;  %s105_s0 = int_to_ptr.vmem [resolvable:$true] %s104_s0  ;;  %s3325_s30 = int_to_ptr.hbm [resolvable:$true] %s3324_s30 }
  0x80   :  { %s3326_s28 = scalar_lea.hbm %s3325_s30, 1  ;;  %s3328_s27 = scalar_lea.hbm %s3620_s29, 1 }
  0x81   :  { %p3327_p11 = scmp.ne.s32.totalorder %s3325_s30, %s3326_s28  ;;  %p3329_p12 = scmp.lt.s32.totalorder %s3325_s30, %s3620_s29 }
  0x82   :  { %p3330_p13 = scmp.lt.s32.totalorder %s3328_s27, %s3326_s28 }
  0x84   :  { %p3331_p0 = por %p3330_p13, %p3329_p12 }
  0x86   :  { %p3332_p1 = pnand %p3331_p0, %p3327_p11 }
  0x88   :  { %3335 = shalt.err (!%p3332_p1)
}
  0x89   :  { %107 = dma.hbm_to_vmem [thread:$0]  %s103_s16, 16, %s105_s0, [#allocation3]  }
  0x8a   :  { %s157_s2 = sshll.u32 %s3665_s20, 4  ;;  %s3575_s7 = smov [#allocation7]   ;;  %s3796_s2 = int_to_ptr.hbm [resolvable:$true] %s157_s2 }
  0x8b   :  { %s129_s10 = sshll.u32 %s3575_s7, 4  ;;  %s3348_s4 = sshra.s32 %s3791_s1, 4  ;;  %s130_s10 = int_to_ptr.vmem [resolvable:$true] %s129_s10  ;;  %s3349_s4 = int_to_ptr.hbm [resolvable:$true] %s3348_s4 }
  0x8c   :  { %s3350_s18 = scalar_lea.hbm %s3349_s4, 24  ;;  %s3352_s29 = scalar_lea.hbm %s3640_s19, 24 }
  0x8d   :  { %p3351_p2 = scmp.ne.s32.totalorder %s3349_s4, %s3350_s18  ;;  %p3353_p3 = scmp.lt.s32.totalorder %s3349_s4, %s3640_s19 }
  0x8e   :  { %p3354_p4 = scmp.lt.s32.totalorder %s3352_s29, %s3350_s18 }
  0x90   :  { %p3355_p5 = por %p3354_p4, %p3353_p3 }
  0x92   :  { %p3356_p6 = pnand %p3355_p5, %p3351_p2 }
  0x94   :  { %3359 = shalt.err (!%p3356_p6)
}
  0x95   :  { %135 = dma.hbm_to_vmem [thread:$0]  %s3791_s1, 384, %s130_s10, [#allocation6], %s3571_s11, %s3571_s11, %s3572_s15  }
  0x96   :  { %s3576_s16 = smov [#allocation10]   ;;  %s192_s12 = sshll.u32 %s3700_s6, 4  ;;  %s193_s12 = int_to_ptr.hbm [resolvable:$true] %s192_s12 }
  0x97   :  { %s159_s14 = sshll.u32 %s3576_s16, 4  ;;  %s3372_s22 = sshra.s32 %s3796_s2, 4  ;;  %s160_s14 = int_to_ptr.vmem [resolvable:$true] %s159_s14  ;;  %s3373_s22 = int_to_ptr.hbm [resolvable:$true] %s3372_s22 }
  0x98   :  { %s3374_s19 = scalar_lea.hbm %s3373_s22, 48  ;;  %s3376_s26 = scalar_lea.hbm %s3665_s20, 48 }
  0x99   :  { %p3375_p7 = scmp.ne.s32.totalorder %s3373_s22, %s3374_s19  ;;  %p3377_p8 = scmp.lt.s32.totalorder %s3373_s22, %s3665_s20 }
  0x9a   :  { %p3378_p9 = scmp.lt.s32.totalorder %s3376_s26, %s3374_s19 }
  0x9c   :  { %p3379_p10 = por %p3378_p9, %p3377_p8 }
  0x9e   :  { %p3380_p11 = pnand %p3379_p10, %p3375_p7 }
  0xa0   :  { %3383 = shalt.err (!%p3380_p11)
}
  0xa1   :  { %165 = dma.hbm_to_vmem [thread:$0]  %s3796_s2, 768, %s160_s14, [#allocation9], %s3571_s11, %s3571_s11, %s3572_s15  }
  0xa2   :  { %s218_s23 = sshll.u32 %s3715_s24, 4  ;;  %s3577_s0 = smov [#allocation13]   ;;  %s219_s23 = int_to_ptr.hbm [resolvable:$true] %s218_s23 }
  0xa3   :  { %s194_s1 = sshll.u32 %s3577_s0, 4  ;;  %s3396_s30 = sshra.s32 %s193_s12, 4  ;;  %s195_s1 = int_to_ptr.vmem [resolvable:$true] %s194_s1  ;;  %s3397_s30 = int_to_ptr.hbm [resolvable:$true] %s3396_s30 }
  0xa4   :  { %s3398_s20 = scalar_lea.hbm %s3397_s30, 1  ;;  %s3400_s28 = scalar_lea.hbm %s3700_s6, 1 }
  0xa5   :  { %p3399_p12 = scmp.ne.s32.totalorder %s3397_s30, %s3398_s20  ;;  %p3401_p13 = scmp.lt.s32.totalorder %s3397_s30, %s3700_s6 }
  0xa6   :  { %p3402_p0 = scmp.lt.s32.totalorder %s3400_s28, %s3398_s20 }
  0xa8   :  { %p3403_p1 = por %p3402_p0, %p3401_p13 }
  0xaa   :  { %p3404_p2 = pnand %p3403_p1, %p3399_p12 }
  0xac   :  { %3407 = shalt.err (!%p3404_p2)
}
  0xad   :  { %197 = dma.hbm_to_vmem [thread:$0]  %s193_s12, 16, %s195_s1, [#allocation12]  }
  0xae   :  { %s3578_s11 = smov [#allocation16]   ;;  %s244_s27 = sshll.u32 %s3735_s21, 4  ;;  %s245_s27 = int_to_ptr.hbm [resolvable:$true] %s244_s27 }
  0xaf   :  { %s220_s15 = sshll.u32 %s3578_s11, 4  ;;  %s3420_s2 = sshra.s32 %s219_s23, 4  ;;  %s221_s15 = int_to_ptr.vmem [resolvable:$true] %s220_s15  ;;  %s3421_s2 = int_to_ptr.hbm [resolvable:$true] %s3420_s2 }
  0xb0   :  { %s3422_s7 = scalar_lea.hbm %s3421_s2, 1  ;;  %s3424_s10 = scalar_lea.hbm %s3715_s24, 1 }
  0xb1   :  { %p3423_p3 = scmp.ne.s32.totalorder %s3421_s2, %s3422_s7  ;;  %p3425_p4 = scmp.lt.s32.totalorder %s3421_s2, %s3715_s24 }
  0xb2   :  { %p3426_p5 = scmp.lt.s32.totalorder %s3424_s10, %s3422_s7 }
  0xb4   :  { %p3427_p6 = por %p3426_p5, %p3425_p4 }
  0xb6   :  { %p3428_p7 = pnand %p3427_p6, %p3423_p3 }
  0xb8   :  { %3431 = shalt.err (!%p3428_p7)
}
  0xb9   :  { %223 = dma.hbm_to_vmem [thread:$0]  %s219_s23, 16, %s221_s15, [#allocation15]  }
  0xba   :  { %s257_s6 = sshll.u32 %s3745_s8, 4  ;;  %s3579_s4 = smov [#allocation19]   ;;  %s258_s6 = int_to_ptr.hbm [resolvable:$true] %s257_s6 }
  0xbb   :  { %s246_s18 = sshll.u32 %s3579_s4, 4  ;;  %s3444_s29 = sshra.s32 %s245_s27, 4  ;;  %s247_s18 = int_to_ptr.vmem [resolvable:$true] %s246_s18  ;;  %s3445_s29 = int_to_ptr.hbm [resolvable:$true] %s3444_s29 }
  0xbc   :  { %s3446_s16 = scalar_lea.hbm %s3445_s29, 2  ;;  %s3448_s14 = scalar_lea.hbm %s3735_s21, 2 }
  0xbd   :  { %p3447_p8 = scmp.ne.s32.totalorder %s3445_s29, %s3446_s16  ;;  %p3449_p9 = scmp.lt.s32.totalorder %s3445_s29, %s3735_s21 }
  0xbe   :  { %p3450_p10 = scmp.lt.s32.totalorder %s3448_s14, %s3446_s16 }
  0xc0   :  { %p3451_p11 = por %p3450_p10, %p3449_p9 }
  0xc2   :  { %p3452_p12 = pnand %p3451_p11, %p3447_p8 }
  0xc4   :  { %3455 = shalt.err (!%p3452_p12)
}
  0xc5   :  { %249 = dma.hbm_to_vmem [thread:$0]  %s245_s27, 32, %s247_s18, [#allocation18]  }
  0xc6   :  { %s3580_s24 = smov [#allocation20]   ;;  %s3468_s22 = sshra.s32 %s258_s6, 4  ;;  %s3469_s22 = int_to_ptr.hbm [resolvable:$true] %s3468_s22 }
  0xc7   :  { %s259_s12 = sshll.u32 %s3580_s24, 4  ;;  %s3470_s19 = scalar_lea.hbm %s3469_s22, 1  ;;  %s260_s12 = int_to_ptr.vmem [resolvable:$true] %s259_s12 }
  0xc8   :  { %p3471_p13 = scmp.ne.s32.totalorder %s3469_s22, %s3470_s19  ;;  %s3472_s26 = scalar_lea.hbm %s3745_s8, 1 }
  0xc9   :  { %p3473_p0 = scmp.lt.s32.totalorder %s3469_s22, %s3745_s8  ;;  %p3474_p1 = scmp.lt.s32.totalorder %s3472_s26, %s3470_s19 }
  0xcb   :  { %p3475_p2 = por %p3474_p1, %p3473_p0 }
  0xcd   :  { %p3476_p3 = pnand %p3475_p2, %p3471_p13 }
  0xcf   :  { %3479 = shalt.err (!%p3476_p3)
}
  0xd0   :  { %262 = dma.hbm_to_vmem [thread:$0]  %s258_s6, 16, %s260_s12, [#allocation21]  }
  0xd1   :  { %3516 = dma.done.wait [#allocation3], 16  }
  0xd2   :  { %3517 = vsyncadd [#allocation3], 4294967280 }
  0xd3   :  { %3518 = dma.done.wait [#allocation6], 400  }
  0xd4   :  { %3519 = vsyncadd [#allocation6], 4294966896 }
  0xd5   :  { %3520 = dma.done.wait [#allocation9], 784  }
  0xd6   :  { %3521 = vsyncadd [#allocation9], 4294966512 }
  0xd7   :  { %3522 = dma.done.wait [#allocation12], 32  }
  0xd8   :  { %3523 = vsyncadd [#allocation12], 4294967264 }
  0xd9   :  { %3524 = dma.done.wait [#allocation15], 784  }
  0xda   :  { %3525 = vsyncadd [#allocation15], 4294966512 }
  0xdb   :  { %3526 = dma.done.wait [#allocation18], 48  }
  0xdc   :  { %3527 = vsyncadd [#allocation18], 4294967248 }
  0xdd   :  { %3528 = dma.done.wait [#allocation21], 16  }
  0xde   :  { %3529 = vsyncadd [#allocation21], 4294967280  ;;  %v314_v0 = vld [vmem:[%s3590_s5 + $0x18] sm:$0xff]  ;;  %v313_v1 = vld [vmem:[%s3590_s5 + $0x10] sm:$0xff]  ;;  %vm319_vm0 = vcmask 261120   ;;  %s4457_s21 = sld [smem:[#allocation31_spill]] }
  0xdf   :  { %344 = vmatpush.msra.mxu0 %v314_v0  ;;  %3137 = vmatpush.msra.mxu1 %v314_v0  ;;  %v312_v2 = vld [vmem:[%s3590_s5 + $0x8] sm:$0xff]  ;;  %v311_v3 = vld [vmem:[%s3590_s5] sm:$0xff]  ;;  %v318_v5 = vld [vmem:[%s3595_s9 + $0x18] sm:$0xff]  ;;  %vm424_vm1 = vcmask 523264   ;;  %s4459_s8 = sld [smem:[#allocation34_spill]]  ;;  %vm844_vm2 = vcmask 130048  }
  0xe0   :  { %v315_v4 = vld [vmem:[%s3595_s9] sm:$0xff]  ;;  %v316_v6 = vld [vmem:[%s3595_s9 + $0x8] sm:$0xff]  ;;  %v317_v8 = vld [vmem:[%s3595_s9 + $0x10] sm:$0xff]  ;;  %s4460_s23 = sld [smem:[#allocation33_spill]]  ;;  %vm1036_vm3 = vcmask 64512   ;;  %s3581_s10 = smov [#allocation22]  }
  0xe1   :  { %345 = vmatpush.msra.mxu0 %v313_v1  ;;  %3138 = vmatpush.msra.mxu1 %v313_v1  ;;  %v2768_v7 = vld [vmem:[%s3595_s9 + $0x20] sm:$0xff]  ;;  %v2769_v9 = vld [vmem:[%s3595_s9 + $0x28] sm:$0xff]  ;;  %v2770_v17 = vld [vmem:[%s3595_s9 + $0x30] sm:$0xff]  ;;  %s4461_s0 = sld [smem:[#allocation36_spill]]  ;;  %s2705_s6 = sshll.u32 %s3581_s10, 4  ;;  %vm2692_vm4 = vcmask 9216   ;;  %s2706_s6 = int_to_ptr.vmem [resolvable:$true] %s2705_s6 }
  0xe2   :  { %v2792_v18 = vld [vmem:[%s3595_s9 + $0x40] sm:$0xff]  ;;  %v2771_v22 = vld [vmem:[%s3595_s9 + $0x38] sm:$0xff]  ;;  %v2793_v23 = vld [vmem:[%s3595_s9 + $0x48] sm:$0xff]  ;;  %s4462_s1 = sld [smem:[#allocation35_spill]]  ;;  %s2707_s4 = sshll.u32 %s3765_s13, 4  ;;  %s2708_s4 = int_to_ptr.hbm [resolvable:$true] %s2707_s4 }
  0xe3   :  { %346 = vmatpush.msra.mxu0 %v312_v2  ;;  %3139 = vmatpush.msra.mxu1 %v312_v2  ;;  %v2794_v24 = vld [vmem:[%s3595_s9 + $0x50] sm:$0xff]  ;;  %v2795_v25 = vld [vmem:[%s3595_s9 + $0x58] sm:$0xff]  ;;  %s4458_s9 = sld [smem:[#allocation32_spill]]  ;;  %s3504_s18 = sshra.s32 %s2708_s4, 4  ;;  %s3505_s18 = int_to_ptr.hbm [resolvable:$true] %s3504_s18 }
  0xe4   :  { %v368_v10 = vld [vmem:[%s4457_s21 + $0x38] sm:$0xff]  ;;  %v367_v11 = vld [vmem:[%s4457_s21 + $0x30] sm:$0xff]  ;;  %v366_v13 = vld [vmem:[%s4457_s21 + $0x28] sm:$0xff]  ;;  %s4463_s30 = sld [smem:[#allocation37_spill]]  ;;  %s3506_s29 = scalar_lea.hbm %s3505_s18, 2 }
  0xe5   :  { %347 = vmatpush.msra.mxu0 %v311_v3  ;;  %3140 = vmatpush.msra.mxu1 %v311_v3  ;;  %v2783_v12 = vld [vmem:[%s4457_s21 + $0x78] sm:$0xff]  ;;  %v2782_v14 = vld [vmem:[%s4457_s21 + $0x70] sm:$0xff]  ;;  %v2781_v15 = vld [vmem:[%s4457_s21 + $0x68] sm:$0xff]  ;;  %s4464_s20 = sld [smem:[#allocation39_spill]]  ;;  %p3507_p4 = scmp.ne.s32.totalorder %s3505_s18, %s3506_s29 }
  0xe6   :  { %2764 = vmatmul.msk.f32.vlgmr.msra.gmra.mxu0 %vm319_vm0, %v315_v4  ;;  %2767 = vmatmul.msk.f32.vlgmr.msra.gmra.mxu1 %vm319_vm0, %v318_v5  ;;  %v365_v16 = vld [vmem:[%s4457_s21 + $0x20] sm:$0xff]  ;;  %v364_v19 = vld [vmem:[%s4457_s21 + $0x18] sm:$0xff]  ;;  %v363_v20 = vld [vmem:[%s4457_s21 + $0x10] sm:$0xff]  ;;  %s4465_s28 = sld [smem:[#allocation38_spill]]  ;;  %s3508_s16 = scalar_lea.hbm %s3765_s13, 2 }
  0xe7   :  { %398 = vmatpush.msrb.mxu1 %v314_v0  ;;  %536 = vmatpush.msrb.mxu0 %v314_v0  ;;  %v362_v21 = vld [vmem:[%s4457_s21 + $0x8] sm:$0xff]  ;;  %v2780_v26 = vld [vmem:[%s4457_s21 + $0x60] sm:$0xff]  ;;  %v2779_v28 = vld [vmem:[%s4457_s21 + $0x58] sm:$0xff]  ;;  %s4467_s11 = sld [smem:[#allocation42_spill]]  ;;  %p3509_p5 = scmp.lt.s32.totalorder %s3505_s18, %s3765_s13 }
  0xe8   :  { %486 = vmatpush.msra.mxu3 %v368_v10  ;;  %445 = vmatpush.msra.mxu2 %v2783_v12  ;;  %v361_v27 = vld [vmem:[%s4457_s21] sm:$0xff]  ;;  %v2778_v29 = vld [vmem:[%s4457_s21 + $0x50] sm:$0xff]  ;;  %v2777_v30 = vld [vmem:[%s4457_s21 + $0x48] sm:$0xff]  ;;  %s4468_s15 = sld [smem:[#allocation41_spill]]  ;;  %p3510_p6 = scmp.lt.s32.totalorder %s3508_s16, %s3506_s29 }
  0xe9   :  { %399 = vmatpush.msrb.mxu1 %v313_v1  ;;  %537 = vmatpush.msrb.mxu0 %v313_v1  ;;  %v2776_v31 = vld [vmem:[%s4457_s21 + $0x40] sm:$0xff]  ;;  %v2807_v32 = vld [vmem:[%s4457_s21 + $0xb8] sm:$0xff]  ;;  %v2806_v33 = vld [vmem:[%s4457_s21 + $0xb0] sm:$0xff]  ;;  %s4470_s27 = sld [smem:[#allocation44_spill]] }
  0xea   :  { %487 = vmatpush.msra.mxu3 %v367_v11  ;;  %446 = vmatpush.msra.mxu2 %v2782_v14  ;;  %v2805_v34 = vld [vmem:[%s4457_s21 + $0xa8] sm:$0xff]  ;;  %v2804_v35 = vld [vmem:[%s4457_s21 + $0xa0] sm:$0xff]  ;;  %v2803_v36 = vld [vmem:[%s4457_s21 + $0x98] sm:$0xff]  ;;  %s4471_s2 = sld [smem:[#allocation45_spill]]  ;;  %p3511_p7 = por %p3510_p6, %p3509_p5 }
  0xeb   :  { %400 = vmatpush.msrb.mxu1 %v312_v2  ;;  %538 = vmatpush.msrb.mxu0 %v312_v2  ;;  %v2802_v37 = vld [vmem:[%s4457_s21 + $0x90] sm:$0xff]  ;;  %v2801_v38 = vld [vmem:[%s4457_s21 + $0x88] sm:$0xff]  ;;  %v2800_v39 = vld [vmem:[%s4457_s21 + $0x80] sm:$0xff]  ;;  %s4474_s7 = sld [smem:[#allocation48_spill]] }
  0xec   :  { %488 = vmatpush.msra.mxu3 %v366_v13  ;;  %447 = vmatpush.msra.mxu2 %v2781_v15  ;;  %v3191_v5 = vld [vmem:[%s4458_s9] ss:$0 sm:$0xff]  ;;  %v2833_v13 = vld [vmem:[%s4459_s8 + $0xf8] sm:$0xff]  ;;  %p3512_p8 = pnand %p3511_p7, %p3507_p4 }
  0xed   :  { %401 = vmatpush.msrb.mxu1 %v311_v3  ;;  %539 = vmatpush.msrb.mxu0 %v311_v3  ;;  %v665_v14 = vld [vmem:[%s4459_s8 + $0x78] sm:$0xff] }
  0xee   :  { %2765 = vmatmul.msk.f32.gmra.mxu0 %vm319_vm0, %v316_v6  ;;  %2772 = vmatmul.msk.f32.vlgmr.msrb.gmra.mxu1 %vm319_vm0, %v2768_v7 }
  0xef   :  { %489 = vmatpush.msra.mxu3 %v365_v16  ;;  %448 = vmatpush.msra.mxu2 %v2780_v26  ;;  %v662_v26 = vld [vmem:[%s4459_s8 + $0x60] sm:$0xff] }
  0xf0   :  { %582 = vmatpush.msra.mxu1 %v2807_v32  ;;  %715 = vmatpush.msra.mxu0 %v2833_v13  ;;  %v660_v32 = vld [vmem:[%s4459_s8 + $0x50] sm:$0xff] }
  0xf1   :  { %490 = vmatpush.msra.mxu3 %v364_v19  ;;  %449 = vmatpush.msra.mxu2 %v2779_v28  ;;  %v2829_v28 = vld [vmem:[%s4459_s8 + $0xd8] sm:$0xff] }
  0xf2   :  { %583 = vmatpush.msra.mxu1 %v2806_v33  ;;  %v2851_v33 = vld [vmem:[%s4459_s8 + $0x168] sm:$0xff] }
  0xf3   :  { %491 = vmatpush.msra.mxu3 %v363_v20  ;;  %450 = vmatpush.msra.mxu2 %v2778_v29  ;;  %v2831_v20 = vld [vmem:[%s4459_s8 + $0xe8] sm:$0xff]  ;;  %v661_v29 = vld [vmem:[%s4459_s8 + $0x58] sm:$0xff] }
  0xf4   :  { %584 = vmatpush.msra.mxu1 %v2805_v34  ;;  %v2827_v34 = vld [vmem:[%s4459_s8 + $0xc8] sm:$0xff] }
  0xf5   :  { %492 = vmatpush.msra.mxu3 %v362_v21  ;;  %451 = vmatpush.msra.mxu2 %v2777_v30  ;;  %v663_v21 = vld [vmem:[%s4459_s8 + $0x68] sm:$0xff]  ;;  %v2852_v30 = vld [vmem:[%s4459_s8 + $0x170] sm:$0xff] }
  0xf6   :  { %2766 = vmatmul.msk.f32.gmra.mxu0 %vm319_vm0, %v317_v8  ;;  %2773 = vmatmul.msk.f32.gmra.mxu1 %vm319_vm0, %v2769_v9 }
  0xf7   :  { %493 = vmatpush.msra.mxu3 %v361_v27  ;;  %452 = vmatpush.msra.mxu2 %v2776_v31  ;;  %v2853_v27 = vld [vmem:[%s4459_s8 + $0x178] sm:$0xff]  ;;  %v2828_v31 = vld [vmem:[%s4459_s8 + $0xd0] sm:$0xff] }
  0xf8   :  { %585 = vmatpush.msra.mxu1 %v2804_v35  ;;  %v620_v35 = vld [vmem:[%s4460_s23 + $0x8] sm:$0xff] }
  0xfa   :  { %586 = vmatpush.msra.mxu1 %v2803_v36  ;;  %v2815_v36 = vld [vmem:[%s4460_s23 + $0x18] sm:$0xff] }
  0xfc   :  { %587 = vmatpush.msra.mxu1 %v2802_v37  ;;  %v659_v37 = vld [vmem:[%s4459_s8 + $0x48] sm:$0xff] }
  0xfe   :  { %2774 = vmatmul.msk.f32.gmra.mxu1 %vm319_vm0, %v2770_v17  ;;  %2796 = vmatmul.msk.f32.vlgmr.msrb.gmra.mxu0 %vm319_vm0, %v2792_v18  ;;  %v2832_v17 = vld [vmem:[%s4459_s8 + $0xf0] sm:$0xff] }
  0xff   :  { %588 = vmatpush.msra.mxu1 %v2801_v38  ;;  %v664_v18 = vld [vmem:[%s4459_s8 + $0x70] sm:$0xff]  ;;  %716 = vmatpush.msra.mxu0 %v2832_v17  ;;  %v2826_v38 = vld [vmem:[%s4459_s8 + $0xc0] sm:$0xff]  ;;  %v2872_v17 = vld [vmem:[%s4461_s0 + $0xf8] sm:$0xff] }
 0x101   :  { %589 = vmatpush.msra.mxu1 %v2800_v39  ;;  %717 = vmatpush.msra.mxu0 %v2831_v20  ;;  %v2850_v39 = vld [vmem:[%s4459_s8 + $0x160] sm:$0xff]  ;;  %v2870_v20 = vld [vmem:[%s4461_s0 + $0xe8] sm:$0xff] }
 0x103   :  { %738 = vmatpush.msrb.mxu1 %v665_v14 }
 0x105   :  { %739 = vmatpush.msrb.mxu1 %v664_v18  ;;  %v2871_v18 = vld [vmem:[%s4461_s0 + $0xf0] sm:$0xff] }
 0x106   :  { %2775 = vmatmul.msk.f32.gmra.mxu1 %vm319_vm0, %v2771_v22  ;;  %2797 = vmatmul.msk.f32.gmra.mxu0 %vm319_vm0, %v2793_v23  ;;  %v619_v23 = vld [vmem:[%s4460_s23] sm:$0xff] }
 0x107   :  { %740 = vmatpush.msrb.mxu1 %v663_v21  ;;  %v2890_v21 = vld [vmem:[%s4461_s0 + $0x178] sm:$0xff] }
 0x109   :  { %741 = vmatpush.msrb.mxu1 %v662_v26 }
 0x10b   :  { %742 = vmatpush.msrb.mxu1 %v661_v29  ;;  %v2867_v29 = vld [vmem:[%s4461_s0 + $0xd0] sm:$0xff] }
 0x10d   :  { %743 = vmatpush.msrb.mxu1 %v660_v32 }
 0x10e   :  { %2798 = vmatmul.msk.f32.gmra.mxu0 %vm319_vm0, %v2794_v24  ;;  %v2814_v24 = vld [vmem:[%s4460_s23 + $0x10] sm:$0xff] }
 0x10f   :  { %744 = vmatpush.msrb.mxu1 %v659_v37  ;;  %v2884_v37 = vld [vmem:[%s4461_s0 + $0x148] sm:$0xff] }
 0x116   :  { %2799 = vmatmul.msk.f32.gmra.mxu0 %vm319_vm0, %v2795_v25  ;;  %v2830_v25 = vld [vmem:[%s4459_s8 + $0xe0] sm:$0xff] }
 0x117   :  { %718 = vmatpush.msra.mxu0 %v2830_v25  ;;  %v2888_v25 = vld [vmem:[%s4461_s0 + $0x168] sm:$0xff] }
 0x119   :  { %719 = vmatpush.msra.mxu0 %v2829_v28  ;;  %v2887_v28 = vld [vmem:[%s4461_s0 + $0x160] sm:$0xff] }
 0x11b   :  { %720 = vmatpush.msra.mxu0 %v2828_v31 }
 0x11d   :  { %721 = vmatpush.msra.mxu0 %v2827_v34  ;;  %v2885_v34 = vld [vmem:[%s4461_s0 + $0x150] sm:$0xff] }
 0x11f   :  { %722 = vmatpush.msra.mxu0 %v2826_v38 }
 0x163   :  { %v349_v40 = vpop.f32.mrf.mxu0  ;;  %v358_v41 = vpop.f32.mrf.mxu1 }
 0x164   :  { %2788 = vmatmul.msk.f32.vlgmr.msra.gmra.mxu3 %vm424_vm1, %v349_v40  ;;  %v658_v40 = vld [vmem:[%s4459_s8 + $0x40] sm:$0xff] }
 0x165   :  { %745 = vmatpush.msrb.mxu1 %v658_v40  ;;  %v3192_v40 = vld [vmem:[#allocation2] ss:$0 sm:$0xff] }
 0x16b   :  { %v352_v42 = vpop.f32.mrf.mxu0  ;;  %v403_v43 = vpop.f32.mrf.mxu1 }
 0x16c   :  { %2784 = vmatmul.msk.f32.vlgmr.msra.gmra.mxu2 %vm424_vm1, %v403_v43  ;;  %2789 = vmatmul.msk.f32.gmra.mxu3 %vm424_vm1, %v352_v42  ;;  %v2849_v42 = vld [vmem:[%s4459_s8 + $0x158] sm:$0xff] }
 0x16d   :  { %v657_v43 = vld [vmem:[%s4459_s8 + $0x38] sm:$0xff] }
 0x16e   :  { %746 = vmatpush.msrb.mxu1 %v657_v43  ;;  %v2883_v43 = vld [vmem:[%s4461_s0 + $0x140] sm:$0xff] }
 0x173   :  { %v355_v44 = vpop.f32.mrf.mxu0  ;;  %v406_v45 = vpop.f32.mrf.mxu1 }
 0x174   :  { %2785 = vmatmul.msk.f32.gmra.mxu2 %vm424_vm1, %v406_v45  ;;  %2790 = vmatmul.msk.f32.gmra.mxu3 %vm424_vm1, %v355_v44  ;;  %v2824_v44 = vld [vmem:[%s4459_s8 + $0xb0] sm:$0xff] }
 0x175   :  { %v2848_v45 = vld [vmem:[%s4459_s8 + $0x150] sm:$0xff] }
 0x17b   :  { %v409_v46 = vpop.f32.mrf.mxu1  ;;  %v541_v47 = vpop.f32.mrf.mxu0 }
 0x17c   :  { %2786 = vmatmul.msk.f32.gmra.mxu2 %vm424_vm1, %v409_v46  ;;  %2791 = vmatmul.msk.f32.gmra.mxu3 %vm424_vm1, %v358_v41  ;;  %v2825_v41 = vld [vmem:[%s4459_s8 + $0xb8] sm:$0xff]  ;;  %v656_v46 = vld [vmem:[%s4459_s8 + $0x30] sm:$0xff] }
 0x17d   :  { %2808 = vmatmul.msk.f32.vlgmr.msra.gmra.mxu1 %vm424_vm1, %v541_v47  ;;  %723 = vmatpush.msra.mxu0 %v2825_v41  ;;  %v2823_v47 = vld [vmem:[%s4459_s8 + $0xa8] sm:$0xff] }
 0x17e   :  { %747 = vmatpush.msrb.mxu1 %v656_v46  ;;  %v2882_v46 = vld [vmem:[%s4461_s0 + $0x138] sm:$0xff] }
 0x17f   :  { %724 = vmatpush.msra.mxu0 %v2824_v44 }
 0x181   :  { %725 = vmatpush.msra.mxu0 %v2823_v47 }
 0x183   :  { %v412_v48 = vpop.f32.mrf.mxu1  ;;  %v544_v49 = vpop.f32.mrf.mxu0 }
 0x184   :  { %2787 = vmatmul.msk.f32.gmra.mxu2 %vm424_vm1, %v412_v48  ;;  %v2834_v48 = vld [vmem:[%s4460_s23 + $0x20] sm:$0xff] }
 0x185   :  { %2809 = vmatmul.msk.f32.gmra.mxu1 %vm424_vm1, %v544_v49  ;;  %v2847_v49 = vld [vmem:[%s4459_s8 + $0x148] sm:$0xff] }
 0x18b   :  { %v547_v50 = vpop.f32.mrf.mxu0 }
 0x18d   :  { %2810 = vmatmul.msk.f32.gmra.mxu1 %vm424_vm1, %v547_v50  ;;  %v655_v50 = vld [vmem:[%s4459_s8 + $0x28] sm:$0xff] }
 0x18e   :  { %748 = vmatpush.msrb.mxu1 %v655_v50  ;;  %v2862_v50 = vld [vmem:[%s4461_s0 + $0xa8] sm:$0xff] }
 0x193   :  { %v550_v51 = vpop.f32.mrf.mxu0 }
 0x195   :  { %2811 = vmatmul.msk.f32.gmra.mxu1 %vm424_vm1, %v550_v51  ;;  %v2822_v51 = vld [vmem:[%s4459_s8 + $0xa0] sm:$0xff] }
 0x196   :  { %726 = vmatpush.msra.mxu0 %v2822_v51  ;;  %v2881_v51 = vld [vmem:[%s4461_s0 + $0x130] sm:$0xff] }
 0x1e7   :  { %v495_v53 = vpop.f32.mrf.mxu3 }
 0x1ef   :  { %v454_v52 = vpop.f32.mrf.mxu2  ;;  %v498_v56 = vpop.f32.mrf.mxu3 }
 0x1f0   :  { %v496_v4 = vadd.f32 %v495_v53, %v454_v52  ;;  %v654_v52 = vld [vmem:[%s4459_s8 + $0x20] sm:$0xff]  ;;  %v2821_v53 = vld [vmem:[%s4459_s8 + $0x98] sm:$0xff] }
 0x1f1   :  { %749 = vmatpush.msrb.mxu1 %v654_v52  ;;  %727 = vmatpush.msra.mxu0 %v2821_v53  ;;  %v843_v53 = vld [vmem:[%s4462_s1] sm:$0xff] }
 0x1f7   :  { %v457_v54 = vpop.f32.mrf.mxu2  ;;  %v501_v59 = vpop.f32.mrf.mxu3 }
 0x1f8   :  { %v499_v0 = vadd.f32 %v498_v56, %v457_v54  ;;  %v653_v54 = vld [vmem:[%s4459_s8 + $0x18] sm:$0xff]  ;;  %v652_v56 = vld [vmem:[%s4459_s8 + $0x10] sm:$0xff] }
 0x1f9   :  { %750 = vmatpush.msrb.mxu1 %v653_v54  ;;  %v2855_v54 = vld [vmem:[%s4462_s1 + $0x8] sm:$0xff] }
 0x1fa   :  { %v591_v55 = vpop.f32.mrf.mxu1 }
 0x1fb   :  { %v603_v8 = vadd.f32 %v591_v55, %v496_v4  ;;  %v2820_v55 = vld [vmem:[%s4459_s8 + $0x90] sm:$0xff]  ;;  %751 = vmatpush.msrb.mxu1 %v652_v56  ;;  %v2861_v56 = vld [vmem:[%s4461_s0 + $0xa0] sm:$0xff] }
 0x1fc   :  { %728 = vmatpush.msra.mxu0 %v2820_v55  ;;  %v2840_v4 = vld [vmem:[%s4459_s8 + $0x110] sm:$0xff]  ;;  %v883_v55 = vld [vmem:[%s4461_s0 + $0x78] sm:$0xff] }
 0x1fd   :  { %v611_v15 = vadd.f32 %v3191_v5, %v603_v8 }
 0x1ff   :  { %v460_v58 = vpop.f32.mrf.mxu2  ;;  %v504_v63 = vpop.f32.mrf.mxu3  ;;  %v3905_v22 = vmax.f32 %v611_v15, 0.0 }
 0x200   :  { %v502_v62 = vadd.f32 %v501_v59, %v460_v58  ;;  %v2835_v58 = vld [vmem:[%s4460_s23 + $0x28] sm:$0xff] }
 0x201   :  { %v651_v59 = vld [vmem:[%s4459_s8 + $0x8] sm:$0xff] }
 0x202   :  { %v594_v57 = vpop.f32.mrf.mxu1  ;;  %752 = vmatpush.msrb.mxu1 %v651_v59  ;;  %v2860_v59 = vld [vmem:[%s4461_s0 + $0x98] sm:$0xff] }
 0x203   :  { %v604_v6 = vadd.f32 %v594_v57, %v499_v0  ;;  %v2819_v57 = vld [vmem:[%s4459_s8 + $0x88] sm:$0xff]  ;;  %v2844_v0 = vld [vmem:[%s4459_s8 + $0x130] sm:$0xff] }
 0x204   :  { %729 = vmatpush.msra.mxu0 %v2819_v57  ;;  %v2880_v57 = vld [vmem:[%s4461_s0 + $0x128] sm:$0xff] }
 0x205   :  { %v612_v11 = vadd.f32 %v3191_v5, %v604_v6  ;;  %v2838_v6 = vld [vmem:[%s4459_s8 + $0x100] sm:$0xff] }
 0x207   :  { %v463_v61 = vpop.f32.mrf.mxu2  ;;  %v3899_v19 = vmax.f32 %v612_v11, 0.0 }
 0x208   :  { %v505_v1 = vadd.f32 %v504_v63, %v463_v61  ;;  %v650_v61 = vld [vmem:[%s4459_s8] sm:$0xff]  ;;  %v2845_v63 = vld [vmem:[%s4459_s8 + $0x138] sm:$0xff] }
 0x209   :  { %753 = vmatpush.msrb.mxu1 %v650_v61  ;;  %v2859_v61 = vld [vmem:[%s4461_s0 + $0x90] sm:$0xff] }
 0x20a   :  { %v597_v60 = vpop.f32.mrf.mxu1 }
 0x20b   :  { %v605_v2 = vadd.f32 %v597_v60, %v502_v62  ;;  %v2818_v60 = vld [vmem:[%s4459_s8 + $0x80] sm:$0xff]  ;;  %926 = vmatpush.msra.mxu1 %v2872_v17  ;;  %v2877_v17 = vld [vmem:[%s4461_s0 + $0x110] sm:$0xff] }
 0x20c   :  { %v2846_v62 = vld [vmem:[%s4459_s8 + $0x140] sm:$0xff]  ;;  %730 = vmatpush.msra.mxu0 %v2818_v60  ;;  %v881_v60 = vld [vmem:[%s4461_s0 + $0x68] sm:$0xff] }
 0x20d   :  { %v613_v9 = vadd.f32 %v3191_v5, %v605_v2  ;;  %v2842_v2 = vld [vmem:[%s4459_s8 + $0x120] sm:$0xff]  ;;  %927 = vmatpush.msra.mxu1 %v2871_v18 }
 0x20e   :  { %v868_v18 = vld [vmem:[%s4461_s0] sm:$0xff] }
 0x20f   :  { %v3893_v16 = vmax.f32 %v613_v9, 0.0  ;;  %928 = vmatpush.msra.mxu1 %v2870_v20  ;;  %v2876_v20 = vld [vmem:[%s4461_s0 + $0x108] sm:$0xff] }
 0x212   :  { %v600_v3 = vpop.f32.mrf.mxu1 }
 0x213   :  { %v606_v7 = vadd.f32 %v600_v3, %v505_v1  ;;  %v2843_v1 = vld [vmem:[%s4459_s8 + $0x128] sm:$0xff]  ;;  %v2841_v3 = vld [vmem:[%s4459_s8 + $0x118] sm:$0xff] }
 0x215   :  { %v614_v10 = vadd.f32 %v3191_v5, %v606_v7  ;;  %v2839_v5 = vld [vmem:[%s4459_s8 + $0x108] sm:$0xff] }
 0x217   :  { %v3889_v12 = vmax.f32 %v614_v10, 0.0 }
 0x219   :  { %639 = vmatpush.msrb.mxu2 %v3889_v12  ;;  %687 = vmatpush.msrb.mxu3 %v3889_v12 }
 0x21b   :  { %640 = vmatpush.msrb.mxu2 %v3893_v16  ;;  %688 = vmatpush.msrb.mxu3 %v3893_v16 }
 0x21d   :  { %641 = vmatpush.msrb.mxu2 %v3899_v19  ;;  %689 = vmatpush.msrb.mxu3 %v3899_v19 }
 0x21f   :  { %642 = vmatpush.msrb.mxu2 %v3905_v22  ;;  %690 = vmatpush.msrb.mxu3 %v3905_v22 }
 0x220   :  { %2812 = vmatmul.msk.f32.vlgmr.msrb.gmra.mxu2 %vm319_vm0, %v619_v23  ;;  %2816 = vmatmul.msk.f32.vlgmr.msrb.gmra.mxu3 %vm319_vm0, %v2814_v24  ;;  %v2889_v23 = vld [vmem:[%s4461_s0 + $0x170] sm:$0xff]  ;;  %v2869_v24 = vld [vmem:[%s4461_s0 + $0xe0] sm:$0xff] }
 0x221   :  { %782 = vmatpush.msra.mxu2 %v3889_v12  ;;  %810 = vmatpush.msra.mxu3 %v2853_v27  ;;  %v2868_v27 = vld [vmem:[%s4461_s0 + $0xd8] sm:$0xff] }
 0x222   :  { %929 = vmatpush.msra.mxu1 %v2869_v24 }
 0x223   :  { %783 = vmatpush.msra.mxu2 %v3893_v16  ;;  %811 = vmatpush.msra.mxu3 %v2852_v30  ;;  %v2886_v30 = vld [vmem:[%s4461_s0 + $0x158] sm:$0xff] }
 0x224   :  { %930 = vmatpush.msra.mxu1 %v2868_v27 }
 0x225   :  { %784 = vmatpush.msra.mxu2 %v3899_v19  ;;  %812 = vmatpush.msra.mxu3 %v2851_v33  ;;  %v2866_v33 = vld [vmem:[%s4461_s0 + $0xc8] sm:$0xff] }
 0x226   :  { %931 = vmatpush.msra.mxu1 %v2867_v29 }
 0x227   :  { %785 = vmatpush.msra.mxu2 %v3905_v22  ;;  %813 = vmatpush.msra.mxu3 %v2850_v39 }
 0x228   :  { %2813 = vmatmul.msk.f32.gmra.mxu2 %vm319_vm0, %v620_v35  ;;  %2817 = vmatmul.msk.f32.gmra.mxu3 %vm319_vm0, %v2815_v36  ;;  %v2865_v36 = vld [vmem:[%s4461_s0 + $0xc0] sm:$0xff] }
 0x229   :  { %814 = vmatpush.msra.mxu3 %v2849_v42  ;;  %932 = vmatpush.msra.mxu1 %v2866_v33  ;;  %v2864_v42 = vld [vmem:[%s4461_s0 + $0xb8] sm:$0xff]  ;;  %v2910_v33 = vld [vmem:[%s4463_s30 + $0xb0] sm:$0xff] }
 0x22b   :  { %815 = vmatpush.msra.mxu3 %v2848_v45  ;;  %933 = vmatpush.msra.mxu1 %v2865_v36  ;;  %v2863_v45 = vld [vmem:[%s4461_s0 + $0xb0] sm:$0xff]  ;;  %v2909_v36 = vld [vmem:[%s4463_s30 + $0xa8] sm:$0xff] }
 0x22d   :  { %816 = vmatpush.msra.mxu3 %v2847_v49  ;;  %934 = vmatpush.msra.mxu1 %v2864_v42  ;;  %v1149_v42 = vld [vmem:[#allocation7 + $0x10] sm:$0xff] }
 0x22f   :  { %817 = vmatpush.msra.mxu3 %v2846_v62  ;;  %935 = vmatpush.msra.mxu1 %v2863_v45  ;;  %v880_v62 = vld [vmem:[%s4461_s0 + $0x60] sm:$0xff]  ;;  %v1065_v45 = vld [vmem:[%s4463_s30 + $0x28] sm:$0xff] }
 0x230   :  { %2836 = vmatmul.msk.f32.vlgmr.msra.gmra.mxu2 %vm319_vm0, %v2834_v48 }
 0x231   :  { %818 = vmatpush.msra.mxu3 %v2845_v63  ;;  %936 = vmatpush.msra.mxu1 %v2862_v50  ;;  %v2873_v63 = vld [vmem:[%s4462_s1 + $0x10] sm:$0xff] }
 0x232   :  { %v1062_v50 = vld [vmem:[%s4463_s30 + $0x10] sm:$0xff] }
 0x233   :  { %819 = vmatpush.msra.mxu3 %v2844_v0  ;;  %937 = vmatpush.msra.mxu1 %v2861_v56  ;;  %v2858_v0 = vld [vmem:[%s4461_s0 + $0x88] sm:$0xff] }
 0x234   :  { %v2924_v56 = vld [vmem:[%s4464_s20 + $0x68] sm:$0xff] }
 0x235   :  { %820 = vmatpush.msra.mxu3 %v2843_v1  ;;  %938 = vmatpush.msra.mxu1 %v2860_v59  ;;  %v879_v1 = vld [vmem:[%s4461_s0 + $0x58] sm:$0xff]  ;;  %v2921_v59 = vld [vmem:[%s4464_s20 + $0x50] sm:$0xff] }
 0x237   :  { %821 = vmatpush.msra.mxu3 %v2842_v2  ;;  %939 = vmatpush.msra.mxu1 %v2859_v61  ;;  %v878_v2 = vld [vmem:[%s4461_s0 + $0x50] sm:$0xff]  ;;  %v2897_v61 = vld [vmem:[%s4463_s30 + $0x60] sm:$0xff] }
 0x238   :  { %2837 = vmatmul.msk.f32.gmra.mxu2 %vm319_vm0, %v2835_v58  ;;  %v882_v58 = vld [vmem:[%s4461_s0 + $0x70] sm:$0xff] }
 0x239   :  { %822 = vmatpush.msra.mxu3 %v2841_v3  ;;  %940 = vmatpush.msra.mxu1 %v2858_v0  ;;  %v877_v3 = vld [vmem:[%s4461_s0 + $0x48] sm:$0xff]  ;;  %v2896_v0 = vld [vmem:[%s4463_s30 + $0x58] sm:$0xff] }
 0x23b   :  { %823 = vmatpush.msra.mxu3 %v2840_v4  ;;  %v876_v4 = vld [vmem:[%s4461_s0 + $0x40] sm:$0xff] }
 0x23d   :  { %824 = vmatpush.msra.mxu3 %v2839_v5  ;;  %v875_v5 = vld [vmem:[%s4461_s0 + $0x38] sm:$0xff] }
 0x23f   :  { %825 = vmatpush.msra.mxu3 %v2838_v6  ;;  %v874_v6 = vld [vmem:[%s4461_s0 + $0x30] sm:$0xff] }
 0x241   :  { %1008 = vmatpush.msrb.mxu3 %v2890_v21  ;;  %v2875_v21 = vld [vmem:[%s4461_s0 + $0x100] sm:$0xff] }
 0x243   :  { %1009 = vmatpush.msrb.mxu3 %v2889_v23 }
 0x245   :  { %1010 = vmatpush.msrb.mxu3 %v2888_v25 }
 0x247   :  { %1011 = vmatpush.msrb.mxu3 %v2887_v28  ;;  %v2911_v28 = vld [vmem:[%s4463_s30 + $0xb8] sm:$0xff] }
 0x249   :  { %1012 = vmatpush.msrb.mxu3 %v2886_v30  ;;  %v3193_v30 = vld [vmem:[#allocation5] ss:$0 sm:$0xff] }
 0x24b   :  { %1013 = vmatpush.msrb.mxu3 %v2885_v34 }
 0x24d   :  { %1014 = vmatpush.msrb.mxu3 %v2884_v37 }
 0x24f   :  { %1015 = vmatpush.msrb.mxu3 %v2883_v43  ;;  %v1067_v43 = vld [vmem:[%s4463_s30 + $0x38] sm:$0xff] }
 0x251   :  { %1016 = vmatpush.msrb.mxu3 %v2882_v46  ;;  %v1069_v46 = vld [vmem:[#allocation7 + $0x8] sm:$0xff] }
 0x253   :  { %1017 = vmatpush.msrb.mxu3 %v2881_v51  ;;  %v1061_v51 = vld [vmem:[%s4463_s30 + $0x8] sm:$0xff] }
 0x255   :  { %1018 = vmatpush.msrb.mxu3 %v2880_v57  ;;  %v2923_v57 = vld [vmem:[%s4464_s20 + $0x60] sm:$0xff] }
 0x2a3   :  { %v644_v7 = vpop.f32.mrf.mxu2  ;;  %v692_v8 = vpop.f32.mrf.mxu3 }
 0x2a4   :  { %731 = vmatmul.f32.vlgmr.msra.gmra.mxu0 %v692_v8  ;;  %754 = vmatmul.f32.vlgmr.msrb.gmra.mxu1 %v644_v7  ;;  %v873_v7 = vld [vmem:[%s4461_s0 + $0x28] sm:$0xff]  ;;  %v872_v8 = vld [vmem:[%s4461_s0 + $0x20] sm:$0xff] }
 0x2ab   :  { %v647_v9 = vpop.f32.mrf.mxu2  ;;  %v695_v10 = vpop.f32.mrf.mxu3 }
 0x2ac   :  { %734 = vmatmul.f32.gmra.mxu0 %v695_v10  ;;  %757 = vmatmul.f32.gmra.mxu1 %v647_v9  ;;  %v2857_v9 = vld [vmem:[%s4461_s0 + $0x80] sm:$0xff]  ;;  %v871_v10 = vld [vmem:[%s4461_s0 + $0x18] sm:$0xff] }
 0x2ad   :  { %941 = vmatpush.msra.mxu1 %v2857_v9 }
 0x2b3   :  { %v787_v11 = vpop.f32.mrf.mxu2 }
 0x2b4   :  { %826 = vmatmul.f32.vlgmr.msra.gmra.mxu3 %v787_v11  ;;  %v2879_v11 = vld [vmem:[%s4461_s0 + $0x120] sm:$0xff] }
 0x2b5   :  { %1019 = vmatpush.msrb.mxu3 %v2879_v11 }
 0x2bb   :  { %v790_v13 = vpop.f32.mrf.mxu2 }
 0x2bc   :  { %829 = vmatmul.f32.gmra.mxu3 %v790_v13  ;;  %v870_v13 = vld [vmem:[%s4461_s0 + $0x10] sm:$0xff] }
 0x321   :  { %v732_v14 = vpop.f32.mrf.mxu0  ;;  %v755_v15 = vpop.f32.mrf.mxu1 }
 0x322   :  { %v756_v35 = vadd.f32 %v755_v15, %v732_v14  ;;  %v2878_v14 = vld [vmem:[%s4461_s0 + $0x118] sm:$0xff]  ;;  %v869_v15 = vld [vmem:[%s4461_s0 + $0x8] sm:$0xff] }
 0x323   :  { %1020 = vmatpush.msrb.mxu3 %v2878_v14  ;;  %v3194_v14 = vld [vmem:[#allocation8] ss:$0 sm:$0xff] }
 0x325   :  { %1021 = vmatpush.msrb.mxu3 %v2877_v17 }
 0x327   :  { %1022 = vmatpush.msrb.mxu3 %v2876_v20 }
 0x329   :  { %v735_v31 = vpop.f32.mrf.mxu0  ;;  %v758_v32 = vpop.f32.mrf.mxu1  ;;  %1023 = vmatpush.msrb.mxu3 %v2875_v21  ;;  %v2915_v21 = vld [vmem:[%s4465_s28 + $0x10] sm:$0xff] }
 0x32a   :  { %v759_v38 = vadd.f32 %v758_v32, %v735_v31  ;;  %v2900_v32 = vld [vmem:[%s4463_s30 + $0x78] sm:$0xff] }
 0x32b   :  { %1193 = vmatpush.msra.mxu3 %v2911_v28  ;;  %1113 = vmatpush.msrb.mxu1 %v2900_v32  ;;  %v2916_v28 = vld [vmem:[%s4465_s28 + $0x18] sm:$0xff]  ;;  %v2939_v32 = vld [vmem:[%s4464_s20 + $0xa0] sm:$0xff] }
 0x32d   :  { %1194 = vmatpush.msra.mxu3 %v2910_v33  ;;  %v1249_v33 = vld [vmem:[%s4464_s20 + $0x30] sm:$0xff] }
 0x32f   :  { %1195 = vmatpush.msra.mxu3 %v2909_v36  ;;  %v2936_v36 = vld [vmem:[%s4464_s20 + $0x88] sm:$0xff] }
 0x337   :  { %v827_v26 = vpop.f32.mrf.mxu3 }
 0x338   :  { %v833_v39 = vadd.f32 %v827_v26, %v756_v35  ;;  %v2899_v35 = vld [vmem:[%s4463_s30 + $0x70] sm:$0xff] }
 0x339   :  { %1114 = vmatpush.msrb.mxu1 %v2899_v35  ;;  %v2937_v35 = vld [vmem:[%s4464_s20 + $0x90] sm:$0xff] }
 0x33a   :  { %v839_v47 = vadd.f32 %v3192_v40, %v833_v39  ;;  %v2908_v39 = vld [vmem:[%s4463_s30 + $0xa0] sm:$0xff] }
 0x33b   :  { %1196 = vmatpush.msra.mxu3 %v2908_v39  ;;  %v2935_v39 = vld [vmem:[%s4464_s20 + $0x80] sm:$0xff] }
 0x33c   :  { %v3992_v52 = vmax.f32 %v839_v47, 0.0  ;;  %v1064_v47 = vld [vmem:[%s4463_s30 + $0x20] sm:$0xff] }
 0x33f   :  { %v830_v41 = vpop.f32.mrf.mxu3 }
 0x340   :  { %v834_v44 = vadd.f32 %v830_v41, %v759_v38  ;;  %v2898_v38 = vld [vmem:[%s4463_s30 + $0x68] sm:$0xff] }
 0x341   :  { %v1035_v41 = vld [vmem:[#allocation7] sm:$0xff]  ;;  %1115 = vmatpush.msrb.mxu1 %v2898_v38 }
 0x342   :  { %v840_v48 = vadd.f32 %v3192_v40, %v834_v44  ;;  %v1066_v44 = vld [vmem:[%s4463_s30 + $0x30] sm:$0xff]  ;;  %v1422_v38 = vld [vmem:[#allocation10] sm:$0xff] }
 0x343   :  { %1116 = vmatpush.msrb.mxu1 %v2897_v61  ;;  %v1243_v61 = vld [vmem:[%s4464_s20] sm:$0xff] }
 0x344   :  { %v3988_v49 = vmax.f32 %v840_v48, 0.0  ;;  %v1063_v48 = vld [vmem:[%s4463_s30 + $0x18] sm:$0xff] }
 0x345   :  { %1117 = vmatpush.msrb.mxu1 %v2896_v0 }
 0x346   :  { %862 = vmatpush.msrb.mxu2 %v3988_v49  ;;  %903 = vmatpush.msrb.mxu0 %v3988_v49 }
 0x348   :  { %863 = vmatpush.msrb.mxu2 %v3992_v52  ;;  %904 = vmatpush.msrb.mxu0 %v3992_v52 }
 0x349   :  { %2854 = vmatmul.msk.f32.vlgmr.msrb.gmra.mxu2 %vm844_vm2, %v843_v53  ;;  %2856 = vmatmul.msk.f32.vlgmr.msrb.gmra.mxu0 %vm844_vm2, %v2855_v54  ;;  %v1060_v53 = vld [vmem:[%s4463_s30] sm:$0xff]  ;;  %v2926_v54 = vld [vmem:[%s4464_s20 + $0x78] sm:$0xff] }
 0x34a   :  { %985 = vmatpush.msra.mxu0 %v3988_v49  ;;  %946 = vmatpush.msra.mxu2 %v883_v55  ;;  %v2925_v55 = vld [vmem:[%s4464_s20 + $0x70] sm:$0xff] }
 0x34c   :  { %986 = vmatpush.msra.mxu0 %v3992_v52  ;;  %947 = vmatpush.msra.mxu2 %v882_v58  ;;  %v2922_v58 = vld [vmem:[%s4464_s20 + $0x58] sm:$0xff] }
 0x34e   :  { %948 = vmatpush.msra.mxu2 %v881_v60  ;;  %v2920_v60 = vld [vmem:[%s4464_s20 + $0x48] sm:$0xff] }
 0x350   :  { %949 = vmatpush.msra.mxu2 %v880_v62  ;;  %v2907_v62 = vld [vmem:[%s4463_s30 + $0x98] sm:$0xff] }
 0x351   :  { %2874 = vmatmul.msk.f32.vlgmr.msra.gmra.mxu0 %vm844_vm2, %v2873_v63  ;;  %v2919_v63 = vld [vmem:[%s4464_s20 + $0x40] sm:$0xff]  ;;  %1197 = vmatpush.msra.mxu3 %v2907_v62 }
 0x352   :  { %950 = vmatpush.msra.mxu2 %v879_v1  ;;  %v2906_v1 = vld [vmem:[%s4463_s30 + $0x90] sm:$0xff] }
 0x353   :  { %1198 = vmatpush.msra.mxu3 %v2906_v1 }
 0x354   :  { %951 = vmatpush.msra.mxu2 %v878_v2  ;;  %v2895_v2 = vld [vmem:[%s4463_s30 + $0x50] sm:$0xff] }
 0x355   :  { %1118 = vmatpush.msrb.mxu1 %v2895_v2 }
 0x356   :  { %952 = vmatpush.msra.mxu2 %v877_v3  ;;  %v2905_v3 = vld [vmem:[%s4463_s30 + $0x88] sm:$0xff] }
 0x357   :  { %1199 = vmatpush.msra.mxu3 %v2905_v3  ;;  %v3002_v3 = vld [vmem:[%s4467_s11 + $0x78] sm:$0xff] }
 0x358   :  { %953 = vmatpush.msra.mxu2 %v876_v4  ;;  %v2894_v4 = vld [vmem:[%s4463_s30 + $0x48] sm:$0xff] }
 0x359   :  { %1119 = vmatpush.msrb.mxu1 %v2894_v4 }
 0x35a   :  { %954 = vmatpush.msra.mxu2 %v875_v5  ;;  %v2904_v5 = vld [vmem:[%s4463_s30 + $0x80] sm:$0xff] }
 0x35b   :  { %1200 = vmatpush.msra.mxu3 %v2904_v5 }
 0x35c   :  { %955 = vmatpush.msra.mxu2 %v874_v6  ;;  %v2893_v6 = vld [vmem:[%s4463_s30 + $0x40] sm:$0xff] }
 0x35d   :  { %1120 = vmatpush.msrb.mxu1 %v2893_v6  ;;  %v3001_v6 = vld [vmem:[%s4467_s11 + $0x70] sm:$0xff] }
 0x35e   :  { %956 = vmatpush.msra.mxu2 %v873_v7 }
 0x360   :  { %957 = vmatpush.msra.mxu2 %v872_v8 }
 0x362   :  { %958 = vmatpush.msra.mxu2 %v871_v10 }
 0x364   :  { %959 = vmatpush.msra.mxu2 %v870_v13 }
 0x366   :  { %960 = vmatpush.msra.mxu2 %v869_v15 }
 0x368   :  { %961 = vmatpush.msra.mxu2 %v868_v18 }
 0x3c6   :  { %v906_v23 = vpop.f32.mrf.mxu0 }
 0x3c7   :  { %942 = vmatmul.f32.vlgmr.msra.gmra.mxu1 %v906_v23  ;;  %v2931_v23 = vld [vmem:[%s4465_s28 + $0x20] sm:$0xff] }
 0x3cc   :  { %v865_v24 = vpop.f32.mrf.mxu2 }
 0x3cd   :  { %962 = vmatmul.f32.vlgmr.msra.gmra.mxu2 %v865_v24  ;;  %v1212_v24 = vld [vmem:[%s4465_s28] sm:$0xff] }
 0x3ce   :  { %v988_v25 = vpop.f32.mrf.mxu0 }
 0x3cf   :  { %1024 = vmatmul.f32.vlgmr.msrb.gmra.mxu3 %v988_v25  ;;  %v2942_v25 = vld [vmem:[%s4464_s20 + $0xb8] sm:$0xff] }
 0x444   :  { %v943_v26 = vpop.f32.mrf.mxu1 }
 0x450   :  { %v963_v27 = vpop.f32.mrf.mxu2 }
 0x451   :  { %v964_v29 = vadd.f32 %v963_v27, %v943_v26  ;;  %v2941_v26 = vld [vmem:[%s4464_s20 + $0xb0] sm:$0xff]  ;;  %v2940_v27 = vld [vmem:[%s4464_s20 + $0xa8] sm:$0xff] }
 0x452   :  { %v1025_v31 = vpop.f32.mrf.mxu3 }
 0x453   :  { %v1028_v34 = vadd.f32 %v1025_v31, %v964_v29  ;;  %v2932_v29 = vld [vmem:[%s4465_s28 + $0x28] sm:$0xff]  ;;  %v1250_v31 = vld [vmem:[%s4464_s20 + $0x38] sm:$0xff] }
 0x455   :  { %v1033_v37 = vadd.f32 %v3193_v30, %v1028_v34  ;;  %v1213_v30 = vld [vmem:[%s4465_s28 + $0x8] sm:$0xff] }
 0x456   :  { %v1248_v34 = vld [vmem:[%s4464_s20 + $0x28] sm:$0xff] }
 0x457   :  { %v1034_v40 = vmax.f32 %v1033_v37, 0.0  ;;  %v1246_v37 = vld [vmem:[%s4464_s20 + $0x18] sm:$0xff] }
 0x459   :  { %1055 = vmatpush.msrb.mxu0 %v1034_v40  ;;  %1168 = vmatpush.msrb.mxu2 %v1034_v40 }
 0x45a   :  { %2891 = vmatmul.msk.f32.vlgmr.msrb.gmra.mxu0 %vm1036_vm3, %v1035_v41  ;;  %2903 = vmatmul.msk.f32.vlgmr.msrb.gmra.mxu2 %vm1036_vm3, %v1149_v42  ;;  %v1244_v42 = vld [vmem:[%s4464_s20 + $0x8] sm:$0xff] }
 0x45b   :  { %1088 = vmatpush.msra.mxu0 %v1034_v40  ;;  %v1245_v40 = vld [vmem:[%s4464_s20 + $0x10] sm:$0xff] }
 0x45d   :  { %1136 = vmatpush.msrb.mxu0 %v1067_v43 }
 0x45f   :  { %1137 = vmatpush.msrb.mxu0 %v1066_v44 }
 0x461   :  { %1138 = vmatpush.msrb.mxu0 %v1065_v45  ;;  %v1423_v45 = vld [vmem:[#allocation10 + $0x8] sm:$0xff] }
 0x462   :  { %2892 = vmatmul.msk.f32.vlgmr.msra.gmra.mxu0 %vm1036_vm3, %v1069_v46 }
 0x463   :  { %1139 = vmatpush.msrb.mxu0 %v1064_v47 }
 0x465   :  { %1140 = vmatpush.msrb.mxu0 %v1063_v48 }
 0x467   :  { %1141 = vmatpush.msrb.mxu0 %v1062_v50 }
 0x469   :  { %1142 = vmatpush.msrb.mxu0 %v1061_v51  ;;  %v1565_v51 = vld [vmem:[#allocation10 + $0x20] sm:$0xff] }
 0x46b   :  { %1143 = vmatpush.msrb.mxu0 %v1060_v53 }
 0x46d   :  { %1306 = vmatpush.msra.mxu0 %v2926_v54 }
 0x46f   :  { %1307 = vmatpush.msra.mxu0 %v2925_v55 }
 0x471   :  { %1308 = vmatpush.msra.mxu0 %v2924_v56 }
 0x473   :  { %1309 = vmatpush.msra.mxu0 %v2923_v57 }
 0x475   :  { %1310 = vmatpush.msra.mxu0 %v2922_v58 }
 0x477   :  { %1311 = vmatpush.msra.mxu0 %v2921_v59 }
 0x479   :  { %1312 = vmatpush.msra.mxu0 %v2920_v60 }
 0x47b   :  { %1313 = vmatpush.msra.mxu0 %v2919_v63  ;;  %v1566_v63 = vld [vmem:[#allocation10 + $0x28] sm:$0xff] }
 0x4d7   :  { %v1057_v7 = vpop.f32.mrf.mxu0 }
 0x4d8   :  { %2902 = vmatmul.msk.f32.vlgmr.msrb.gmra.mxu0 %vm424_vm1, %v1057_v7 }
 0x4d9   :  { %1492 = vmatpush.msrb.mxu0 %v3988_v49 }
 0x4db   :  { %1493 = vmatpush.msrb.mxu0 %v3992_v52 }
 0x4dd   :  { %v1170_v8 = vpop.f32.mrf.mxu2 }
 0x4de   :  { %2912 = vmatmul.msk.f32.vlgmr.msra.gmra.mxu3 %vm424_vm1, %v1170_v8 }
 0x4df   :  { %v1090_v9 = vpop.f32.mrf.mxu0 }
 0x4e0   :  { %2901 = vmatmul.msk.f32.vlgmr.msrb.gmra.mxu1 %vm424_vm1, %v1090_v9  ;;  %v3000_v9 = vld [vmem:[%s4467_s11 + $0x68] sm:$0xff] }
 0x555   :  { %v1145_v11 = vpop.f32.mrf.mxu0 }
 0x55d   :  { %v1122_v10 = vpop.f32.mrf.mxu1 }
 0x55e   :  { %v1146_v13 = vadd.f32 %v1145_v11, %v1122_v10  ;;  %v2999_v11 = vld [vmem:[%s4467_s11 + $0x60] sm:$0xff] }
 0x561   :  { %v1202_v15 = vpop.f32.mrf.mxu3 }
 0x562   :  { %v1205_v17 = vadd.f32 %v1202_v15, %v1146_v13  ;;  %v2998_v15 = vld [vmem:[%s4467_s11 + $0x58] sm:$0xff] }
 0x564   :  { %v1210_v18 = vadd.f32 %v3194_v14, %v1205_v17 }
 0x566   :  { %v1211_v20 = vmax.f32 %v1210_v18, 0.0 }
 0x568   :  { %2685 = vst.msk [vmem:[%s3750_s25] sm:$0xff] %vm424_vm1, %v1211_v20  ;;  %1235 = vmatpush.msra.mxu1 %v1211_v20  ;;  %1275 = vmatpush.msra.mxu2 %v1211_v20  ;;  %s4466_s25 = sld [smem:[#allocation40_spill]] }
 0x569   :  { %1374 = vmatpush.msrb.mxu3 %v1211_v20  ;;  %2917 = vmatmul.msk.f32.vlgmr.msra.gmra.mxu2 %vm1036_vm3, %v2915_v21  ;;  %v2997_v20 = vld [vmem:[%s4467_s11 + $0x50] sm:$0xff] }
 0x56a   :  { %2933 = vmatmul.msk.f32.vlgmr.msrb.gmra.mxu3 %vm1036_vm3, %v2931_v23  ;;  %2913 = vmatmul.msk.f32.vlgmr.msra.gmra.mxu1 %vm1036_vm3, %v1212_v24  ;;  %v2996_v23 = vld [vmem:[%s4467_s11 + $0x48] sm:$0xff] }
 0x56b   :  { %1444 = vmatpush.msra.mxu3 %v3988_v49  ;;  %1405 = vmatpush.msrb.mxu2 %v2942_v25  ;;  %v2995_v25 = vld [vmem:[%s4467_s11 + $0x40] sm:$0xff] }
 0x56c   :  { %1335 = vmatpush.msrb.mxu1 %v1250_v31 }
 0x56d   :  { %1445 = vmatpush.msra.mxu3 %v3992_v52  ;;  %1406 = vmatpush.msrb.mxu2 %v2941_v26  ;;  %v1470_v26 = vld [vmem:[#allocation10 + $0x10] sm:$0xff] }
 0x56e   :  { %1336 = vmatpush.msrb.mxu1 %v1249_v33  ;;  %v1468_v41 = vld [vmem:[%s4466_s25 + $0x78] sm:$0xff]  ;;  %v1467_v43 = vld [vmem:[%s4466_s25 + $0x70] sm:$0xff]  ;;  %v1466_v44 = vld [vmem:[%s4466_s25 + $0x68] sm:$0xff] }
 0x56f   :  { %1587 = vmatpush.msrb.mxu3 %v3988_v49  ;;  %1407 = vmatpush.msrb.mxu2 %v2940_v27  ;;  %v2938_v49 = vld [vmem:[%s4464_s20 + $0x98] sm:$0xff]  ;;  %v1465_v46 = vld [vmem:[%s4466_s25 + $0x60] sm:$0xff]  ;;  %v1463_v48 = vld [vmem:[%s4466_s25 + $0x50] sm:$0xff] }
 0x570   :  { %1337 = vmatpush.msrb.mxu1 %v1248_v34  ;;  %v1464_v47 = vld [vmem:[%s4466_s25 + $0x58] sm:$0xff]  ;;  %v1462_v50 = vld [vmem:[%s4466_s25 + $0x48] sm:$0xff]  ;;  %v1461_v53 = vld [vmem:[%s4466_s25 + $0x40] sm:$0xff] }
 0x571   :  { %1588 = vmatpush.msrb.mxu3 %v3992_v52  ;;  %2918 = vmatmul.msk.f32.gmra.mxu2 %vm1036_vm3, %v2916_v28  ;;  %v1247_v52 = vld [vmem:[%s4464_s20 + $0x20] sm:$0xff]  ;;  %v1460_v54 = vld [vmem:[%s4466_s25 + $0x38] sm:$0xff]  ;;  %v1459_v55 = vld [vmem:[%s4466_s25 + $0x30] sm:$0xff] }
 0x572   :  { %2934 = vmatmul.msk.f32.gmra.mxu3 %vm1036_vm3, %v2932_v29  ;;  %2914 = vmatmul.msk.f32.gmra.mxu1 %vm1036_vm3, %v1213_v30  ;;  %v1458_v56 = vld [vmem:[%s4466_s25 + $0x28] sm:$0xff]  ;;  %v1457_v57 = vld [vmem:[%s4466_s25 + $0x20] sm:$0xff]  ;;  %v1456_v58 = vld [vmem:[%s4466_s25 + $0x18] sm:$0xff] }
 0x573   :  { %1408 = vmatpush.msrb.mxu2 %v2939_v32  ;;  %1338 = vmatpush.msrb.mxu1 %v1247_v52  ;;  %v1455_v59 = vld [vmem:[%s4466_s25 + $0x10] sm:$0xff]  ;;  %v1454_v60 = vld [vmem:[%s4466_s25 + $0x8] sm:$0xff]  ;;  %v1453_v62 = vld [vmem:[%s4466_s25] sm:$0xff] }
 0x574   :  { %v2982_v1 = vld [vmem:[%s4466_s25 + $0x178] sm:$0xff]  ;;  %v2981_v5 = vld [vmem:[%s4466_s25 + $0x170] sm:$0xff]  ;;  %v2980_v7 = vld [vmem:[%s4466_s25 + $0x168] sm:$0xff] }
 0x575   :  { %1409 = vmatpush.msrb.mxu2 %v2938_v49  ;;  %1339 = vmatpush.msrb.mxu1 %v1246_v37  ;;  %v2979_v10 = vld [vmem:[%s4466_s25 + $0x160] sm:$0xff]  ;;  %v2978_v13 = vld [vmem:[%s4466_s25 + $0x158] sm:$0xff]  ;;  %v2977_v18 = vld [vmem:[%s4466_s25 + $0x150] sm:$0xff] }
 0x576   :  { %v2976_v21 = vld [vmem:[%s4466_s25 + $0x148] sm:$0xff]  ;;  %v2975_v24 = vld [vmem:[%s4466_s25 + $0x140] sm:$0xff]  ;;  %v2974_v27 = vld [vmem:[%s4466_s25 + $0x138] sm:$0xff] }
 0x577   :  { %1410 = vmatpush.msrb.mxu2 %v2937_v35  ;;  %1340 = vmatpush.msrb.mxu1 %v1245_v40  ;;  %v2973_v29 = vld [vmem:[%s4466_s25 + $0x130] sm:$0xff]  ;;  %v2972_v30 = vld [vmem:[%s4466_s25 + $0x128] sm:$0xff]  ;;  %v2971_v31 = vld [vmem:[%s4466_s25 + $0x120] sm:$0xff] }
 0x578   :  { %v1471_v32 = vld [vmem:[#allocation10 + $0x18] sm:$0xff]  ;;  %v2968_v37 = vld [vmem:[%s4466_s25 + $0x108] sm:$0xff] }
 0x579   :  { %1411 = vmatpush.msrb.mxu2 %v2936_v36  ;;  %1341 = vmatpush.msrb.mxu1 %v1244_v42  ;;  %v2964_v33 = vld [vmem:[%s4466_s25 + $0xf8] sm:$0xff]  ;;  %v2963_v34 = vld [vmem:[%s4466_s25 + $0xf0] sm:$0xff]  ;;  %v2962_v36 = vld [vmem:[%s4466_s25 + $0xe8] sm:$0xff] }
 0x57a   :  { %2945 = vmatmul.msk.f32.vlgmr.msra.gmra.mxu3 %vm844_vm2, %v1422_v38  ;;  %v2970_v49 = vld [vmem:[%s4466_s25 + $0x118] sm:$0xff]  ;;  %v2969_v35 = vld [vmem:[%s4466_s25 + $0x110] sm:$0xff]  ;;  %v2961_v38 = vld [vmem:[%s4466_s25 + $0xe0] sm:$0xff] }
 0x57b   :  { %1412 = vmatpush.msrb.mxu2 %v2935_v39  ;;  %1342 = vmatpush.msrb.mxu1 %v1243_v61  ;;  %v2967_v39 = vld [vmem:[%s4466_s25 + $0x100] sm:$0xff]  ;;  %v2960_v40 = vld [vmem:[%s4466_s25 + $0xd8] sm:$0xff]  ;;  %v2959_v42 = vld [vmem:[%s4466_s25 + $0xd0] sm:$0xff] }
 0x57c   :  { %v2950_v61 = vld [vmem:[%s4466_s25 + $0x88] sm:$0xff] }
 0x57d   :  { %1541 = vmatpush.msra.mxu2 %v1468_v41  ;;  %1518 = vmatpush.msra.mxu1 %v2964_v33  ;;  %v1700_v41 = vld [vmem:[%s4467_s11 + $0x38] sm:$0xff]  ;;  %v1648_v33 = vld [vmem:[%s4468_s15] sm:$0xff] }
 0x57f   :  { %1542 = vmatpush.msra.mxu2 %v1467_v43  ;;  %1519 = vmatpush.msra.mxu1 %v2963_v34  ;;  %v1699_v43 = vld [vmem:[%s4467_s11 + $0x30] sm:$0xff]  ;;  %v1649_v34 = vld [vmem:[%s4468_s15 + $0x8] sm:$0xff] }
 0x581   :  { %1543 = vmatpush.msra.mxu2 %v1466_v44  ;;  %1520 = vmatpush.msra.mxu1 %v2962_v36  ;;  %v2989_v36 = vld [vmem:[%s4468_s15 + $0x30] sm:$0xff] }
 0x582   :  { %2946 = vmatmul.msk.f32.gmra.mxu3 %vm844_vm2, %v1423_v45  ;;  %v2958_v45 = vld [vmem:[%s4466_s25 + $0xc8] sm:$0xff] }
 0x583   :  { %1544 = vmatpush.msra.mxu2 %v1465_v46  ;;  %1521 = vmatpush.msra.mxu1 %v2961_v38  ;;  %v1698_v46 = vld [vmem:[%s4467_s11 + $0x28] sm:$0xff]  ;;  %v2990_v38 = vld [vmem:[%s4468_s15 + $0x38] sm:$0xff] }
 0x585   :  { %1545 = vmatpush.msra.mxu2 %v1464_v47  ;;  %1522 = vmatpush.msra.mxu1 %v2960_v40  ;;  %v1697_v47 = vld [vmem:[%s4467_s11 + $0x20] sm:$0xff]  ;;  %v3012_v40 = vld [vmem:[%s4468_s15 + $0x48] sm:$0xff] }
 0x587   :  { %1546 = vmatpush.msra.mxu2 %v1463_v48  ;;  %1523 = vmatpush.msra.mxu1 %v2959_v42  ;;  %v1696_v48 = vld [vmem:[%s4467_s11 + $0x18] sm:$0xff] }
 0x588   :  { %v3014_v42 = vld [vmem:[%s4468_s15 + $0x58] sm:$0xff] }
 0x589   :  { %1547 = vmatpush.msra.mxu2 %v1462_v50  ;;  %1524 = vmatpush.msra.mxu1 %v2958_v45  ;;  %v1695_v50 = vld [vmem:[%s4467_s11 + $0x10] sm:$0xff]  ;;  %v3024_v45 = vld [vmem:[%s4467_s11 + $0xa8] sm:$0xff] }
 0x58a   :  { %2965 = vmatmul.msk.f32.vlgmr.msrb.gmra.mxu3 %vm844_vm2, %v1565_v51  ;;  %v1694_v51 = vld [vmem:[%s4467_s11 + $0x8] sm:$0xff] }
 0x58b   :  { %1548 = vmatpush.msra.mxu2 %v1461_v53  ;;  %v1693_v53 = vld [vmem:[%s4467_s11] sm:$0xff] }
 0x58d   :  { %1549 = vmatpush.msra.mxu2 %v1460_v54  ;;  %v2957_v54 = vld [vmem:[%s4466_s25 + $0xc0] sm:$0xff] }
 0x58e   :  { %1525 = vmatpush.msra.mxu1 %v2957_v54  ;;  %v3019_v54 = vld [vmem:[%s4467_s11 + $0x80] sm:$0xff] }
 0x58f   :  { %1550 = vmatpush.msra.mxu2 %v1459_v55  ;;  %v2956_v55 = vld [vmem:[%s4466_s25 + $0xb8] sm:$0xff] }
 0x590   :  { %1526 = vmatpush.msra.mxu1 %v2956_v55 }
 0x591   :  { %1551 = vmatpush.msra.mxu2 %v1458_v56  ;;  %v2955_v56 = vld [vmem:[%s4466_s25 + $0xb0] sm:$0xff] }
 0x592   :  { %2966 = vmatmul.msk.f32.gmra.mxu3 %vm844_vm2, %v1566_v63  ;;  %1527 = vmatpush.msra.mxu1 %v2955_v56 }
 0x593   :  { %1552 = vmatpush.msra.mxu2 %v1457_v57  ;;  %v2954_v57 = vld [vmem:[%s4466_s25 + $0xa8] sm:$0xff] }
 0x594   :  { %1528 = vmatpush.msra.mxu1 %v2954_v57 }
 0x595   :  { %1553 = vmatpush.msra.mxu2 %v1456_v58  ;;  %v2953_v58 = vld [vmem:[%s4466_s25 + $0xa0] sm:$0xff] }
 0x596   :  { %1529 = vmatpush.msra.mxu1 %v2953_v58 }
 0x597   :  { %1554 = vmatpush.msra.mxu2 %v1455_v59  ;;  %v2952_v59 = vld [vmem:[%s4466_s25 + $0x98] sm:$0xff] }
 0x598   :  { %1530 = vmatpush.msra.mxu1 %v2952_v59 }
 0x599   :  { %1555 = vmatpush.msra.mxu2 %v1454_v60  ;;  %v2951_v60 = vld [vmem:[%s4466_s25 + $0x90] sm:$0xff] }
 0x59a   :  { %1531 = vmatpush.msra.mxu1 %v2951_v60 }
 0x59b   :  { %1556 = vmatpush.msra.mxu2 %v1453_v62  ;;  %v2949_v62 = vld [vmem:[%s4466_s25 + $0x80] sm:$0xff] }
 0x59c   :  { %1532 = vmatpush.msra.mxu1 %v2950_v61 }
 0x59e   :  { %1533 = vmatpush.msra.mxu1 %v2949_v62 }
 0x5e7   :  { %v1237_v0 = vpop.f32.mrf.mxu1 }
 0x5e8   :  { %2929 = vmatmul.msk.f32.vlgmr.msrb.gmra.mxu1 %vm424_vm1, %v1237_v0 }
 0x5ec   :  { %v1277_v2 = vpop.f32.mrf.mxu2 }
 0x5ed   :  { %v1376_v4 = vpop.f32.mrf.mxu3  ;;  %2927 = vmatmul.msk.f32.vlgmr.msra.gmra.mxu0 %vm424_vm1, %v1277_v2 }
 0x5ee   :  { %2943 = vmatmul.msk.f32.vlgmr.msrb.gmra.mxu2 %vm424_vm1, %v1376_v4  ;;  %1613 = vmatpush.msra.mxu0 %v2982_v1 }
 0x5ef   :  { %1776 = vmatpush.msrb.mxu2 %v3002_v3  ;;  %v1240_v8 = vpop.f32.mrf.mxu1 }
 0x5f0   :  { %1614 = vmatpush.msra.mxu0 %v2981_v5  ;;  %2930 = vmatmul.msk.f32.gmra.mxu1 %vm424_vm1, %v1240_v8 }
 0x5f1   :  { %1777 = vmatpush.msrb.mxu2 %v3001_v6 }
 0x5f2   :  { %1615 = vmatpush.msra.mxu0 %v2980_v7 }
 0x5f3   :  { %1778 = vmatpush.msrb.mxu2 %v3000_v9 }
 0x5f4   :  { %1616 = vmatpush.msra.mxu0 %v2979_v10  ;;  %v1280_v14 = vpop.f32.mrf.mxu2 }
 0x5f5   :  { %v1379_v17 = vpop.f32.mrf.mxu3  ;;  %1779 = vmatpush.msrb.mxu2 %v2999_v11  ;;  %2928 = vmatmul.msk.f32.gmra.mxu0 %vm424_vm1, %v1280_v14 }
 0x5f6   :  { %2944 = vmatmul.msk.f32.gmra.mxu2 %vm424_vm1, %v1379_v17  ;;  %1617 = vmatpush.msra.mxu0 %v2978_v13  ;;  %v3195_v17 = vld [vmem:[#allocation11] ss:$0 sm:$0xff] }
 0x5f7   :  { %1780 = vmatpush.msrb.mxu2 %v2998_v15 }
 0x5f8   :  { %1618 = vmatpush.msra.mxu0 %v2977_v18 }
 0x5f9   :  { %1781 = vmatpush.msrb.mxu2 %v2997_v20 }
 0x5fa   :  { %1619 = vmatpush.msra.mxu0 %v2976_v21 }
 0x5fb   :  { %1782 = vmatpush.msrb.mxu2 %v2996_v23 }
 0x5fc   :  { %1620 = vmatpush.msra.mxu0 %v2975_v24 }
 0x5fd   :  { %v1447_v28 = vpop.f32.mrf.mxu3  ;;  %1783 = vmatpush.msrb.mxu2 %v2995_v25  ;;  %2947 = vmatmul.msk.f32.vlgmr.msrb.gmra.mxu0 %vm844_vm2, %v1470_v26 }
 0x5fe   :  { %1557 = vmatmul.f32.vlgmr.msra.gmra.mxu2 %v1447_v28  ;;  %1621 = vmatpush.msra.mxu0 %v2974_v27 }
 0x5ff   :  { %1966 = vmatpush.msra.mxu2 %v3889_v12 }
 0x600   :  { %1622 = vmatpush.msra.mxu0 %v2973_v29 }
 0x601   :  { %1967 = vmatpush.msra.mxu2 %v3893_v16 }
 0x602   :  { %1623 = vmatpush.msra.mxu0 %v2972_v30 }
 0x603   :  { %1968 = vmatpush.msra.mxu2 %v3899_v19 }
 0x604   :  { %1624 = vmatpush.msra.mxu0 %v2971_v31 }
 0x605   :  { %1969 = vmatpush.msra.mxu2 %v3905_v22  ;;  %2948 = vmatmul.msk.f32.gmra.mxu0 %vm844_vm2, %v1471_v32  ;;  %v1450_v52 = vpop.f32.mrf.mxu3 }
 0x606   :  { %1625 = vmatpush.msra.mxu0 %v2970_v49  ;;  %1560 = vmatmul.f32.gmra.mxu2 %v1450_v52  ;;  %v2987_v49 = vld [vmem:[%s4468_s15 + $0x20] sm:$0xff]  ;;  %v1650_v52 = vld [vmem:[%s4468_s15 + $0x10] sm:$0xff] }
 0x608   :  { %1626 = vmatpush.msra.mxu0 %v2969_v35  ;;  %v2988_v35 = vld [vmem:[%s4468_s15 + $0x28] sm:$0xff] }
 0x60a   :  { %1627 = vmatpush.msra.mxu0 %v2968_v37  ;;  %v1651_v37 = vld [vmem:[%s4468_s15 + $0x18] sm:$0xff] }
 0x60c   :  { %1628 = vmatpush.msra.mxu0 %v2967_v39  ;;  %v3011_v39 = vld [vmem:[%s4468_s15 + $0x40] sm:$0xff] }
 0x60d   :  { %v1590_v44 = vpop.f32.mrf.mxu3 }
 0x60e   :  { %1817 = vmatpush.msrb.mxu0 %v1700_v41  ;;  %v3013_v41 = vld [vmem:[%s4468_s15 + $0x50] sm:$0xff] }
 0x60f   :  { %1629 = vmatmul.f32.vlgmr.msra.gmra.mxu0 %v1590_v44  ;;  %v3025_v44 = vld [vmem:[%s4467_s11 + $0xb0] sm:$0xff] }
 0x610   :  { %1818 = vmatpush.msrb.mxu0 %v1699_v43  ;;  %v3026_v43 = vld [vmem:[%s4467_s11 + $0xb8] sm:$0xff] }
 0x612   :  { %1819 = vmatpush.msrb.mxu0 %v1698_v46  ;;  %v3023_v46 = vld [vmem:[%s4467_s11 + $0xa0] sm:$0xff] }
 0x614   :  { %1820 = vmatpush.msrb.mxu0 %v1697_v47  ;;  %v3022_v47 = vld [vmem:[%s4467_s11 + $0x98] sm:$0xff] }
 0x615   :  { %v1593_v63 = vpop.f32.mrf.mxu3 }
 0x616   :  { %1821 = vmatpush.msrb.mxu0 %v1696_v48 }
 0x617   :  { %1632 = vmatmul.f32.gmra.mxu0 %v1593_v63 }
 0x618   :  { %1822 = vmatpush.msrb.mxu0 %v1695_v50  ;;  %v3021_v50 = vld [vmem:[%s4467_s11 + $0x90] sm:$0xff] }
 0x61a   :  { %1823 = vmatpush.msrb.mxu0 %v1694_v51  ;;  %v3020_v51 = vld [vmem:[%s4467_s11 + $0x88] sm:$0xff] }
 0x61c   :  { %1824 = vmatpush.msrb.mxu0 %v1693_v53 }
 0x61e   :  { %2028 = vmatpush.msra.mxu0 %v3889_v12 }
 0x620   :  { %2029 = vmatpush.msra.mxu0 %v3893_v16 }
 0x622   :  { %2030 = vmatpush.msra.mxu0 %v3899_v19 }
 0x624   :  { %2031 = vmatpush.msra.mxu0 %v3905_v22 }
 0x665   :  { %v1344_v5 = vpop.f32.mrf.mxu1 }
 0x66a   :  { %v1315_v0 = vpop.f32.mrf.mxu0 }
 0x66b   :  { %v1345_v11 = vadd.f32 %v1344_v5, %v1315_v0 }
 0x66d   :  { %v1347_v7 = vpop.f32.mrf.mxu1 }
 0x671   :  { %v1414_v4 = vpop.f32.mrf.mxu2 }
 0x672   :  { %v1318_v1 = vpop.f32.mrf.mxu0  ;;  %v1420_v14 = vadd.f32 %v1414_v4, %v1345_v11  ;;  %v3057_v11 = vld [vmem:[%s4470_s27 + $0xf0] sm:$0xff] }
 0x673   :  { %v1348_v25 = vadd.f32 %v1347_v7, %v1318_v1 }
 0x679   :  { %v1417_v6 = vpop.f32.mrf.mxu2 }
 0x67a   :  { %v1495_v2 = vpop.f32.mrf.mxu0  ;;  %v1421_v28 = vadd.f32 %v1417_v6, %v1348_v25  ;;  %v3052_v25 = vld [vmem:[%s4470_s27 + $0xc8] sm:$0xff] }
 0x67b   :  { %1534 = vmatmul.f32.vlgmr.msra.gmra.mxu1 %v1495_v2 }
 0x681   :  { %v1558_v8 = vpop.f32.mrf.mxu2 }
 0x682   :  { %v1498_v3 = vpop.f32.mrf.mxu0 }
 0x683   :  { %1537 = vmatmul.f32.gmra.mxu1 %v1498_v3 }
 0x689   :  { %v1561_v20 = vpop.f32.mrf.mxu2 }
 0x68c   :  { %v1630_v9 = vpop.f32.mrf.mxu0 }
 0x694   :  { %v1633_v24 = vpop.f32.mrf.mxu0 }
 0x6f8   :  { %v1535_v10 = vpop.f32.mrf.mxu1 }
 0x6f9   :  { %v1559_v13 = vadd.f32 %v1558_v8, %v1535_v10  ;;  %v1998_v10 = vld [vmem:[%s4470_s27 + $0x78] sm:$0xff] }
 0x6fb   :  { %v1636_v15 = vadd.f32 %v1630_v9, %v1559_v13  ;;  %v3058_v9 = vld [vmem:[%s4470_s27 + $0xf8] sm:$0xff]  ;;  %v1997_v13 = vld [vmem:[%s4470_s27 + $0x70] sm:$0xff] }
 0x6fd   :  { %v1638_v18 = vadd.f32 %v1636_v15, %v1420_v14  ;;  %v3056_v14 = vld [vmem:[%s4470_s27 + $0xe8] sm:$0xff] }
 0x6fe   :  { %v1996_v15 = vld [vmem:[%s4470_s27 + $0x68] sm:$0xff] }
 0x6ff   :  { %v1644_v21 = vadd.f32 %v3195_v17, %v1638_v18  ;;  %v1995_v18 = vld [vmem:[%s4470_s27 + $0x60] sm:$0xff] }
 0x700   :  { %v1538_v23 = vpop.f32.mrf.mxu1 }
 0x701   :  { %v1646_v26 = vmax.f32 %v1644_v21, 0.0  ;;  %v1562_v27 = vadd.f32 %v1561_v20, %v1538_v23  ;;  %v3054_v20 = vld [vmem:[%s4470_s27 + $0xd8] sm:$0xff]  ;;  %v3053_v23 = vld [vmem:[%s4470_s27 + $0xd0] sm:$0xff] }
 0x702   :  { %v1994_v21 = vld [vmem:[%s4470_s27 + $0x58] sm:$0xff] }
 0x703   :  { %2686 = vst.msk [vmem:[%s3755_s17] sm:$0xff] %vm424_vm1, %v1646_v26  ;;  %v1637_v29 = vadd.f32 %v1633_v24, %v1562_v27  ;;  %v1993_v24 = vld [vmem:[%s4470_s27 + $0x50] sm:$0xff]  ;;  %v3051_v27 = vld [vmem:[%s4470_s27 + $0xc0] sm:$0xff] }
 0x705   :  { %v1639_v30 = vadd.f32 %v1637_v29, %v1421_v28  ;;  %v1991_v28 = vld [vmem:[%s4470_s27 + $0x40] sm:$0xff]  ;;  %v3050_v29 = vld [vmem:[%s4470_s27 + $0xb8] sm:$0xff] }
 0x707   :  { %v1645_v31 = vadd.f32 %v3195_v17, %v1639_v30  ;;  %v3055_v17 = vld [vmem:[%s4470_s27 + $0xe0] sm:$0xff]  ;;  %v1990_v30 = vld [vmem:[%s4470_s27 + $0x38] sm:$0xff] }
 0x709   :  { %v1647_v32 = vmax.f32 %v1645_v31, 0.0  ;;  %v3049_v31 = vld [vmem:[%s4470_s27 + $0xb0] sm:$0xff] }
 0x70b   :  { %2687 = vst.msk [vmem:[%s3755_s17 + $0x8] sm:$0xff] %vm424_vm1, %v1647_v32  ;;  %1678 = vmatpush.msra.mxu3 %v1647_v32  ;;  %1732 = vmatpush.msrb.mxu1 %v1647_v32  ;;  %s4469_s17 = sld [smem:[#allocation43_spill]] }
 0x70d   :  { %1679 = vmatpush.msra.mxu3 %v1646_v26  ;;  %1733 = vmatpush.msrb.mxu1 %v1646_v26 }
 0x70e   :  { %2983 = vmatmul.msk.f32.vlgmr.msra.gmra.mxu3 %vm844_vm2, %v1648_v33  ;;  %2991 = vmatmul.msk.f32.vlgmr.msrb.gmra.mxu1 %vm844_vm2, %v2987_v49  ;;  %v3048_v33 = vld [vmem:[%s4470_s27 + $0xa8] sm:$0xff] }
 0x70f   :  { %1869 = vmatpush.msrb.mxu3 %v1647_v32  ;;  %1913 = vmatpush.msra.mxu1 %v3026_v43  ;;  %v1989_v32 = vld [vmem:[%s4470_s27 + $0x30] sm:$0xff]  ;;  %v1988_v49 = vld [vmem:[%s4470_s27 + $0x28] sm:$0xff] }
 0x711   :  { %1870 = vmatpush.msrb.mxu3 %v1646_v26  ;;  %1914 = vmatpush.msra.mxu1 %v3025_v44  ;;  %v3035_v58 = vld [vmem:[%s4469_s17 + $0x20] sm:$0xff]  ;;  %v1939_v60 = vld [vmem:[%s4469_s17 + $0x8] sm:$0xff]  ;;  %v1940_v63 = vld [vmem:[%s4469_s17 + $0x10] sm:$0xff] }
 0x712   :  { %v3036_v61 = vld [vmem:[%s4469_s17 + $0x28] sm:$0xff]  ;;  %v3037_v0 = vld [vmem:[%s4469_s17 + $0x30] sm:$0xff]  ;;  %v1941_v2 = vld [vmem:[%s4469_s17 + $0x18] sm:$0xff] }
 0x713   :  { %1915 = vmatpush.msra.mxu1 %v3024_v45  ;;  %v3038_v3 = vld [vmem:[%s4469_s17 + $0x38] sm:$0xff]  ;;  %v3059_v5 = vld [vmem:[%s4469_s17 + $0x40] sm:$0xff]  ;;  %v3060_v6 = vld [vmem:[%s4469_s17 + $0x48] sm:$0xff]  ;;  %2062 = vmatpush.msra.mxu3 %v3058_v9 }
 0x714   :  { %v3061_v7 = vld [vmem:[%s4469_s17 + $0x50] sm:$0xff]  ;;  %v3062_v8 = vld [vmem:[%s4469_s17 + $0x58] sm:$0xff]  ;;  %v1992_v26 = vld [vmem:[%s4470_s27 + $0x48] sm:$0xff] }
 0x715   :  { %1916 = vmatpush.msra.mxu1 %v3023_v46  ;;  %2063 = vmatpush.msra.mxu3 %v3057_v11  ;;  %v3043_v44 = vld [vmem:[%s4470_s27 + $0x80] sm:$0xff]  ;;  %v3082_v46 = vld [vmem:[%s4470_s27 + $0x178] sm:$0xff] }
 0x716   :  { %2984 = vmatmul.msk.f32.gmra.mxu3 %vm844_vm2, %v1649_v34  ;;  %2992 = vmatmul.msk.f32.gmra.mxu1 %vm844_vm2, %v2988_v35  ;;  %v3047_v34 = vld [vmem:[%s4470_s27 + $0xa0] sm:$0xff] }
 0x717   :  { %1917 = vmatpush.msra.mxu1 %v3022_v47  ;;  %2064 = vmatpush.msra.mxu3 %v3056_v14  ;;  %v1987_v35 = vld [vmem:[%s4470_s27 + $0x20] sm:$0xff]  ;;  %v3081_v47 = vld [vmem:[%s4470_s27 + $0x170] sm:$0xff] }
 0x718   :  { %v1983_v45 = vld [vmem:[%s4470_s27] sm:$0xff] }
 0x719   :  { %1918 = vmatpush.msra.mxu1 %v3021_v50  ;;  %2065 = vmatpush.msra.mxu3 %v3055_v17 }
 0x71b   :  { %1919 = vmatpush.msra.mxu1 %v3020_v51  ;;  %2066 = vmatpush.msra.mxu3 %v3054_v20 }
 0x71d   :  { %1920 = vmatpush.msra.mxu1 %v3019_v54  ;;  %2067 = vmatpush.msra.mxu3 %v3053_v23  ;;  %v3079_v54 = vld [vmem:[%s4470_s27 + $0x160] sm:$0xff] }
 0x71e   :  { %2985 = vmatmul.msk.f32.gmra.mxu3 %vm844_vm2, %v1650_v52  ;;  %2993 = vmatmul.msk.f32.gmra.mxu1 %vm844_vm2, %v2989_v36  ;;  %v3046_v52 = vld [vmem:[%s4470_s27 + $0x98] sm:$0xff] }
 0x71f   :  { %2091 = vmatpush.msrb.mxu1 %v1998_v10  ;;  %2068 = vmatpush.msra.mxu3 %v3052_v25  ;;  %v1986_v36 = vld [vmem:[%s4470_s27 + $0x18] sm:$0xff] }
 0x721   :  { %2092 = vmatpush.msrb.mxu1 %v1997_v13  ;;  %2069 = vmatpush.msra.mxu3 %v3051_v27 }
 0x723   :  { %2093 = vmatpush.msrb.mxu1 %v1996_v15  ;;  %2070 = vmatpush.msra.mxu3 %v3050_v29 }
 0x725   :  { %2094 = vmatpush.msrb.mxu1 %v1995_v18  ;;  %2071 = vmatpush.msra.mxu3 %v3049_v31 }
 0x726   :  { %2986 = vmatmul.msk.f32.gmra.mxu3 %vm844_vm2, %v1651_v37  ;;  %2994 = vmatmul.msk.f32.gmra.mxu1 %vm844_vm2, %v2990_v38  ;;  %v3045_v37 = vld [vmem:[%s4470_s27 + $0x90] sm:$0xff] }
 0x727   :  { %2095 = vmatpush.msrb.mxu1 %v1994_v21  ;;  %2072 = vmatpush.msra.mxu3 %v3048_v33  ;;  %v1985_v38 = vld [vmem:[%s4470_s27 + $0x10] sm:$0xff] }
 0x729   :  { %2096 = vmatpush.msrb.mxu1 %v1993_v24  ;;  %2073 = vmatpush.msra.mxu3 %v3047_v34 }
 0x72b   :  { %2097 = vmatpush.msrb.mxu1 %v1992_v26  ;;  %2074 = vmatpush.msra.mxu3 %v3046_v52 }
 0x72d   :  { %2098 = vmatpush.msrb.mxu1 %v1991_v28  ;;  %2075 = vmatpush.msra.mxu3 %v3045_v37 }
 0x72e   :  { %3015 = vmatmul.msk.f32.vlgmr.msrb.gmra.mxu3 %vm844_vm2, %v3011_v39  ;;  %v3044_v39 = vld [vmem:[%s4470_s27 + $0x88] sm:$0xff] }
 0x72f   :  { %2099 = vmatpush.msrb.mxu1 %v1990_v30  ;;  %2076 = vmatpush.msra.mxu3 %v3044_v39 }
 0x731   :  { %2100 = vmatpush.msrb.mxu1 %v1989_v32  ;;  %2077 = vmatpush.msra.mxu3 %v3043_v44  ;;  %v3196_v32 = vld [vmem:[#allocation13] ss:$0 sm:$0xff] }
 0x733   :  { %2101 = vmatpush.msrb.mxu1 %v1988_v49 }
 0x735   :  { %2102 = vmatpush.msrb.mxu1 %v1987_v35 }
 0x736   :  { %3016 = vmatmul.msk.f32.gmra.mxu3 %vm844_vm2, %v3012_v40  ;;  %v1984_v40 = vld [vmem:[%s4470_s27 + $0x8] sm:$0xff] }
 0x737   :  { %2103 = vmatpush.msrb.mxu1 %v1986_v36 }
 0x739   :  { %2104 = vmatpush.msrb.mxu1 %v1985_v38 }
 0x73b   :  { %2105 = vmatpush.msrb.mxu1 %v1984_v40 }
 0x73d   :  { %2106 = vmatpush.msrb.mxu1 %v1983_v45 }
 0x73e   :  { %3017 = vmatmul.msk.f32.gmra.mxu3 %vm844_vm2, %v3013_v41 }
 0x746   :  { %3018 = vmatmul.msk.f32.gmra.mxu3 %vm844_vm2, %v3014_v42 }
 0x78b   :  { %v1735_v48 = vpop.f32.mrf.mxu1 }
 0x78c   :  { %3003 = vmatmul.msk.f32.vlgmr.msrb.gmra.mxu2 %vm424_vm1, %v1735_v48  ;;  %v3080_v48 = vld [vmem:[%s4470_s27 + $0x168] sm:$0xff] }
 0x78d   :  { %2149 = vmatpush.msrb.mxu2 %v3889_v12 }
 0x78f   :  { %2150 = vmatpush.msrb.mxu2 %v3893_v16 }
 0x791   :  { %2151 = vmatpush.msrb.mxu2 %v3899_v19  ;;  %v1681_v53 = vpop.f32.mrf.mxu3 }
 0x792   :  { %3007 = vmatmul.msk.f32.vlgmr.msrb.gmra.mxu0 %vm424_vm1, %v1681_v53 }
 0x793   :  { %2152 = vmatpush.msrb.mxu2 %v3905_v22  ;;  %v1738_v55 = vpop.f32.mrf.mxu1  ;;  %v1938_v22 = vld [vmem:[%s4469_s17] sm:$0xff]  ;;  %2183 = vmatpush.msrb.mxu0 %v3082_v46  ;;  %v3094_v46 = vld [vmem:[%s4471_s2 + $0x78] sm:$0xff] }
 0x794   :  { %3004 = vmatmul.msk.f32.gmra.mxu2 %vm424_vm1, %v1738_v55  ;;  %v3078_v55 = vld [vmem:[%s4470_s27 + $0x158] sm:$0xff] }
 0x795   :  { %2184 = vmatpush.msrb.mxu0 %v3081_v47  ;;  %v3093_v47 = vld [vmem:[%s4471_s2 + $0x70] sm:$0xff] }
 0x797   :  { %2185 = vmatpush.msrb.mxu0 %v3080_v48 }
 0x799   :  { %v1684_v12 = vpop.f32.mrf.mxu3  ;;  %2186 = vmatpush.msrb.mxu0 %v3079_v54  ;;  %v3091_v54 = vld [vmem:[%s4471_s2 + $0x60] sm:$0xff] }
 0x79a   :  { %3008 = vmatmul.msk.f32.gmra.mxu0 %vm424_vm1, %v1684_v12  ;;  %v3077_v12 = vld [vmem:[%s4470_s27 + $0x150] sm:$0xff] }
 0x79b   :  { %v1741_v16 = vpop.f32.mrf.mxu1  ;;  %2187 = vmatpush.msrb.mxu0 %v3078_v55 }
 0x79c   :  { %3005 = vmatmul.msk.f32.gmra.mxu2 %vm424_vm1, %v1741_v16  ;;  %v3076_v16 = vld [vmem:[%s4470_s27 + $0x148] sm:$0xff] }
 0x79d   :  { %2188 = vmatpush.msrb.mxu0 %v3077_v12 }
 0x79f   :  { %2189 = vmatpush.msrb.mxu0 %v3076_v16  ;;  %v3090_v16 = vld [vmem:[%s4471_s2 + $0x58] sm:$0xff] }
 0x7a1   :  { %v1687_v19 = vpop.f32.mrf.mxu3 }
 0x7a2   :  { %3009 = vmatmul.msk.f32.gmra.mxu0 %vm424_vm1, %v1687_v19 }
 0x7a3   :  { %v1744_v56 = vpop.f32.mrf.mxu1 }
 0x7a4   :  { %3006 = vmatmul.msk.f32.gmra.mxu2 %vm424_vm1, %v1744_v56 }
 0x7a9   :  { %v1690_v57 = vpop.f32.mrf.mxu3 }
 0x7aa   :  { %3010 = vmatmul.msk.f32.gmra.mxu0 %vm424_vm1, %v1690_v57 }
 0x7ac   :  { %3031 = vmatmul.msk.f32.vlgmr.msra.gmra.mxu2 %vm319_vm0, %v1938_v22  ;;  %v3075_v22 = vld [vmem:[%s4470_s27 + $0x140] sm:$0xff] }
 0x7ad   :  { %2190 = vmatpush.msrb.mxu0 %v3075_v22  ;;  %2326 = vmatpush.msra.mxu2 %v3094_v46  ;;  %v3089_v22 = vld [vmem:[%s4471_s2 + $0x50] sm:$0xff] }
 0x7af   :  { %2327 = vmatpush.msra.mxu2 %v3093_v47  ;;  %v3197_v47 = vld [vmem:[#allocation16] ss:$0 sm:$0xff] }
 0x7b1   :  { %v1872_v59 = vpop.f32.mrf.mxu3 }
 0x7b2   :  { %3027 = vmatmul.msk.f32.vlgmr.msra.gmra.mxu1 %vm424_vm1, %v1872_v59  ;;  %3039 = vmatmul.msk.f32.vlgmr.msra.gmra.mxu0 %vm319_vm0, %v3035_v58  ;;  %v3074_v58 = vld [vmem:[%s4470_s27 + $0x138] sm:$0xff]  ;;  %v3073_v59 = vld [vmem:[%s4470_s27 + $0x130] sm:$0xff] }
 0x7b3   :  { %2191 = vmatpush.msrb.mxu0 %v3074_v58 }
 0x7b4   :  { %3032 = vmatmul.msk.f32.gmra.mxu2 %vm319_vm0, %v1939_v60  ;;  %v3072_v60 = vld [vmem:[%s4470_s27 + $0x128] sm:$0xff] }
 0x7b5   :  { %2192 = vmatpush.msrb.mxu0 %v3073_v59  ;;  %v3088_v59 = vld [vmem:[%s4471_s2 + $0x48] sm:$0xff] }
 0x7b7   :  { %2193 = vmatpush.msrb.mxu0 %v3072_v60 }
 0x7b9   :  { %v1875_v62 = vpop.f32.mrf.mxu3 }
 0x7ba   :  { %3028 = vmatmul.msk.f32.gmra.mxu1 %vm424_vm1, %v1875_v62  ;;  %3040 = vmatmul.msk.f32.gmra.mxu0 %vm319_vm0, %v3036_v61 }
 0x7bc   :  { %3033 = vmatmul.msk.f32.gmra.mxu2 %vm319_vm0, %v1940_v63 }
 0x7c1   :  { %v1878_v1 = vpop.f32.mrf.mxu3 }
 0x7c2   :  { %3029 = vmatmul.msk.f32.gmra.mxu1 %vm424_vm1, %v1878_v1  ;;  %3041 = vmatmul.msk.f32.gmra.mxu0 %vm319_vm0, %v3037_v0  ;;  %v3071_v0 = vld [vmem:[%s4470_s27 + $0x120] sm:$0xff]  ;;  %v3070_v1 = vld [vmem:[%s4470_s27 + $0x118] sm:$0xff] }
 0x7c3   :  { %2194 = vmatpush.msrb.mxu0 %v3071_v0  ;;  %v3201_v0 = vld [vmem:[%s3590_s5 + $0x10] sm:$0xff] }
 0x7c4   :  { %3034 = vmatmul.msk.f32.gmra.mxu2 %vm319_vm0, %v1941_v2  ;;  %v3069_v2 = vld [vmem:[%s4470_s27 + $0x110] sm:$0xff] }
 0x7c5   :  { %2195 = vmatpush.msrb.mxu0 %v3070_v1 }
 0x7c7   :  { %2196 = vmatpush.msrb.mxu0 %v3069_v2 }
 0x7c9   :  { %v1881_v4 = vpop.f32.mrf.mxu3 }
 0x7ca   :  { %3030 = vmatmul.msk.f32.gmra.mxu1 %vm424_vm1, %v1881_v4  ;;  %3042 = vmatmul.msk.f32.gmra.mxu0 %vm319_vm0, %v3038_v3  ;;  %v3068_v3 = vld [vmem:[%s4470_s27 + $0x108] sm:$0xff] }
 0x7cb   :  { %2197 = vmatpush.msrb.mxu0 %v3068_v3  ;;  %v3203_v3 = vld [vmem:[%s3590_s5] sm:$0xff] }
 0x7cc   :  { %3063 = vmatmul.msk.f32.vlgmr.msrb.gmra.mxu2 %vm319_vm0, %v3059_v5  ;;  %v3067_v5 = vld [vmem:[%s4470_s27 + $0x100] sm:$0xff] }
 0x7cd   :  { %2198 = vmatpush.msrb.mxu0 %v3067_v5  ;;  %v2232_v5 = vld [vmem:[#allocation14] sm:$0xff] }
 0x7d4   :  { %3064 = vmatmul.msk.f32.gmra.mxu2 %vm319_vm0, %v3060_v6 }
 0x7dc   :  { %3065 = vmatmul.msk.f32.gmra.mxu2 %vm319_vm0, %v3061_v7 }
 0x7e4   :  { %3066 = vmatmul.msk.f32.gmra.mxu2 %vm319_vm0, %v3062_v8 }
 0x80f   :  { %v1785_v41 = vpop.f32.mrf.mxu2  ;;  %v1826_v42 = vpop.f32.mrf.mxu0 }
 0x810   :  { %v4297_v43 = vadd.f32 %v1826_v42, %v1785_v41 }
 0x817   :  { %v1788_v50 = vpop.f32.mrf.mxu2  ;;  %v1829_v51 = vpop.f32.mrf.mxu0 }
 0x818   :  { %v4304_v53 = vadd.f32 %v1829_v51, %v1788_v50  ;;  %v3092_v50 = vld [vmem:[%s4471_s2 + $0x68] sm:$0xff] }
 0x819   :  { %2328 = vmatpush.msra.mxu2 %v3092_v50 }
 0x81b   :  { %2329 = vmatpush.msra.mxu2 %v3091_v54 }
 0x81d   :  { %2330 = vmatpush.msra.mxu2 %v3090_v16 }
 0x81f   :  { %v1791_v19 = vpop.f32.mrf.mxu2  ;;  %v1832_v56 = vpop.f32.mrf.mxu0  ;;  %2331 = vmatpush.msra.mxu2 %v3089_v22 }
 0x820   :  { %v4310_v57 = vadd.f32 %v1832_v56, %v1791_v19 }
 0x821   :  { %2332 = vmatpush.msra.mxu2 %v3088_v59 }
 0x827   :  { %v1794_v61 = vpop.f32.mrf.mxu2  ;;  %v1835_v62 = vpop.f32.mrf.mxu0 }
 0x828   :  { %v4316_v63 = vadd.f32 %v1835_v62, %v1794_v61  ;;  %v3200_v61 = vld [vmem:[%s3590_s5 + $0x18] sm:$0xff] }
 0x82f   :  { %v1971_v4 = vpop.f32.mrf.mxu2  ;;  %v2033_v6 = vpop.f32.mrf.mxu0 }
 0x830   :  { %2107 = vmatmul.f32.vlgmr.msrb.gmra.mxu1 %v1971_v4  ;;  %2078 = vmatmul.f32.vlgmr.msra.gmra.mxu3 %v2033_v6  ;;  %v1922_v20 = vpop.f32.mrf.mxu1  ;;  %v2272_v6 = vld [vmem:[#allocation14 + $0x10] sm:$0xff] }
 0x831   :  { %v1934_v30 = vadd.f32 %v1922_v20, %v4297_v43  ;;  %v2267_v20 = vld [vmem:[%s4471_s2 + $0x20] sm:$0xff] }
 0x837   :  { %v1974_v7 = vpop.f32.mrf.mxu2  ;;  %v2036_v8 = vpop.f32.mrf.mxu0 }
 0x838   :  { %2110 = vmatmul.f32.gmra.mxu1 %v1974_v7  ;;  %2081 = vmatmul.f32.gmra.mxu3 %v2036_v8  ;;  %v1925_v21 = vpop.f32.mrf.mxu1  ;;  %v2371_v7 = vld [vmem:[#allocation14 + $0x20] sm:$0xff] }
 0x839   :  { %v1935_v36 = vadd.f32 %v1925_v21, %v4304_v53  ;;  %v2270_v8 = vld [vmem:[%s4471_s2 + $0x38] sm:$0xff] }
 0x83a   :  { %v2266_v21 = vld [vmem:[%s4471_s2 + $0x18] sm:$0xff] }
 0x83f   :  { %v1977_v9 = vpop.f32.mrf.mxu2  ;;  %v2039_v10 = vpop.f32.mrf.mxu0 }
 0x840   :  { %2113 = vmatmul.f32.gmra.mxu1 %v1977_v9  ;;  %2084 = vmatmul.f32.gmra.mxu3 %v2039_v10  ;;  %v1928_v23 = vpop.f32.mrf.mxu1  ;;  %v3108_v9 = vld [vmem:[%s4471_s2 + $0xb8] sm:$0xff]  ;;  %v2269_v10 = vld [vmem:[%s4471_s2 + $0x30] sm:$0xff] }
 0x841   :  { %v1936_v44 = vadd.f32 %v1928_v23, %v4310_v57  ;;  %v2265_v23 = vld [vmem:[%s4471_s2 + $0x10] sm:$0xff] }
 0x847   :  { %v1980_v11 = vpop.f32.mrf.mxu2  ;;  %v2042_v13 = vpop.f32.mrf.mxu0 }
 0x848   :  { %2116 = vmatmul.f32.gmra.mxu1 %v1980_v11  ;;  %2087 = vmatmul.f32.gmra.mxu3 %v2042_v13  ;;  %v1931_v24 = vpop.f32.mrf.mxu1  ;;  %v3107_v11 = vld [vmem:[%s4471_s2 + $0xb0] sm:$0xff]  ;;  %v2268_v13 = vld [vmem:[%s4471_s2 + $0x28] sm:$0xff] }
 0x849   :  { %v1937_v56 = vadd.f32 %v1931_v24, %v4316_v63  ;;  %v3202_v63 = vld [vmem:[%s3590_s5 + $0x8] sm:$0xff]  ;;  %s4472_s5 = sld [smem:[#allocation47_spill]] }
 0x84a   :  { %v2264_v24 = vld [vmem:[%s4471_s2 + $0x8] sm:$0xff] }
 0x84f   :  { %v2154_v14 = vpop.f32.mrf.mxu2  ;;  %v2481_v22 = vld [vmem:[%s4472_s5 + $0x38] sm:$0xff]  ;;  %v2479_v59 = vld [vmem:[%s4472_s5 + $0x28] sm:$0xff] }
 0x850   :  { %2199 = vmatmul.f32.vlgmr.msrb.gmra.mxu0 %v2154_v14  ;;  %v3106_v14 = vld [vmem:[%s4471_s2 + $0xa8] sm:$0xff] }
 0x857   :  { %v2157_v15 = vpop.f32.mrf.mxu2 }
 0x858   :  { %2202 = vmatmul.f32.gmra.mxu0 %v2157_v15  ;;  %v2233_v15 = vld [vmem:[#allocation14 + $0x8] sm:$0xff] }
 0x85f   :  { %v2160_v17 = vpop.f32.mrf.mxu2 }
 0x860   :  { %2205 = vmatmul.f32.gmra.mxu0 %v2160_v17  ;;  %v2273_v17 = vld [vmem:[#allocation14 + $0x18] sm:$0xff] }
 0x867   :  { %v2163_v18 = vpop.f32.mrf.mxu2 }
 0x868   :  { %2208 = vmatmul.f32.gmra.mxu0 %v2163_v18  ;;  %v2372_v18 = vld [vmem:[#allocation14 + $0x28] sm:$0xff] }
 0x8ad   :  { %v2108_v26 = vpop.f32.mrf.mxu1 }
 0x8b3   :  { %v2079_v25 = vpop.f32.mrf.mxu3 }
 0x8b4   :  { %v2109_v27 = vadd.f32 %v2108_v26, %v2079_v25  ;;  %v3087_v25 = vld [vmem:[%s4471_s2 + $0x40] sm:$0xff] }
 0x8b5   :  { %v2111_v33 = vpop.f32.mrf.mxu1  ;;  %v2263_v26 = vld [vmem:[%s4471_s2] sm:$0xff]  ;;  %2333 = vmatpush.msra.mxu2 %v3087_v25  ;;  %v2651_v25 = vld [vmem:[%s4474_s7 + $0x8] sm:$0xff] }
 0x8bb   :  { %v2082_v28 = vpop.f32.mrf.mxu3 }
 0x8bc   :  { %v2112_v35 = vadd.f32 %v2111_v33, %v2082_v28  ;;  %v3104_v28 = vld [vmem:[%s4471_s2 + $0x98] sm:$0xff] }
 0x8bd   :  { %v2114_v40 = vpop.f32.mrf.mxu1 }
 0x8c3   :  { %v2085_v38 = vpop.f32.mrf.mxu3 }
 0x8c4   :  { %v2115_v42 = vadd.f32 %v2114_v40, %v2085_v38  ;;  %v3120_v38 = vld [vmem:[%s4472_s5 + $0x70] sm:$0xff]  ;;  %v3119_v40 = vld [vmem:[%s4472_s5 + $0x68] sm:$0xff] }
 0x8c5   :  { %v2117_v55 = vpop.f32.mrf.mxu1 }
 0x8cb   :  { %v2088_v51 = vpop.f32.mrf.mxu3 }
 0x8cc   :  { %v2118_v12 = vadd.f32 %v2117_v55, %v2088_v51 }
 0x8cd   :  { %v2200_v29 = vpop.f32.mrf.mxu0 }
 0x8ce   :  { %v2212_v31 = vadd.f32 %v2200_v29, %v2109_v27  ;;  %v3105_v27 = vld [vmem:[%s4471_s2 + $0xa0] sm:$0xff]  ;;  %v3103_v29 = vld [vmem:[%s4471_s2 + $0x90] sm:$0xff] }
 0x8d0   :  { %v2216_v49 = vadd.f32 %v2212_v31, %v1934_v30  ;;  %v3102_v30 = vld [vmem:[%s4471_s2 + $0x88] sm:$0xff]  ;;  %v3101_v31 = vld [vmem:[%s4471_s2 + $0x80] sm:$0xff] }
 0x8d2   :  { %v2224_v34 = vadd.f32 %v3196_v32, %v2216_v49 }
 0x8d4   :  { %2688 = vst.msk [vmem:[%s3760_s3] sm:$0xff] %vm424_vm1, %v2224_v34  ;;  %v2228_v4 = vadd.f32 %v3203_v3, %v2224_v34  ;;  %v3130_v3 = vld [vmem:[%s4472_s5 + $0xa0] sm:$0xff] }
 0x8d5   :  { %v2203_v52 = vpop.f32.mrf.mxu0 }
 0x8d6   :  { %v2213_v37 = vadd.f32 %v2203_v52, %v2112_v35 }
 0x8d8   :  { %v2217_v39 = vadd.f32 %v2213_v37, %v1935_v36  ;;  %v3121_v37 = vld [vmem:[%s4472_s5 + $0x78] sm:$0xff] }
 0x8da   :  { %v2225_v41 = vadd.f32 %v3196_v32, %v2217_v39 }
 0x8dc   :  { %2689 = vst.msk [vmem:[%s3760_s3 + $0x8] sm:$0xff] %vm424_vm1, %v2225_v41  ;;  %v2229_v2 = vadd.f32 %v3202_v63, %v2225_v41  ;;  %v3131_v63 = vld [vmem:[%s4472_s5 + $0xa8] sm:$0xff] }
 0x8dd   :  { %v2206_v43 = vpop.f32.mrf.mxu0 }
 0x8de   :  { %v2214_v45 = vadd.f32 %v2206_v43, %v2115_v42 }
 0x8e0   :  { %v2218_v48 = vadd.f32 %v2214_v45, %v1936_v44 }
 0x8e2   :  { %v2226_v53 = vadd.f32 %v3196_v32, %v2218_v48 }
 0x8e4   :  { %2690 = vst.msk [vmem:[%s3760_s3 + $0x10] sm:$0xff] %vm424_vm1, %v2226_v53  ;;  %v2230_v1 = vadd.f32 %v3201_v0, %v2226_v53  ;;  %v2475_v0 = vld [vmem:[%s4472_s5 + $0x8] sm:$0xff] }
 0x8e5   :  { %v2209_v19 = vpop.f32.mrf.mxu0 }
 0x8e6   :  { %v2215_v57 = vadd.f32 %v2209_v19, %v2118_v12  ;;  %v3133_v19 = vld [vmem:[%s4472_s5 + $0xb8] sm:$0xff] }
 0x8e8   :  { %v2219_v58 = vadd.f32 %v2215_v57, %v1937_v56  ;;  %v3132_v56 = vld [vmem:[%s4472_s5 + $0xb0] sm:$0xff] }
 0x8ea   :  { %v2227_v60 = vadd.f32 %v3196_v32, %v2219_v58  ;;  %v2480_v58 = vld [vmem:[%s4472_s5 + $0x30] sm:$0xff] }
 0x8ec   :  { %v2231_v62 = vadd.f32 %v3200_v61, %v2227_v60  ;;  %2691 = vst.msk [vmem:[%s3760_s3 + $0x18] sm:$0xff] %vm424_vm1, %v2227_v60  ;;  %s4473_s3 = sld [smem:[#allocation46_spill]]  ;;  %v2478_v60 = vld [vmem:[%s4472_s5 + $0x20] sm:$0xff]  ;;  %v2477_v61 = vld [vmem:[%s4472_s5 + $0x18] sm:$0xff] }
 0x8ee   :  { %2252 = vmatpush.msrb.mxu3 %v2231_v62  ;;  %2292 = vmatpush.msra.mxu1 %v2231_v62 }
 0x8ef   :  { %2391 = vmatpush.msra.mxu0 %v2231_v62  ;;  %v2476_v62 = vld [vmem:[%s4472_s5 + $0x10] sm:$0xff] }
 0x8f0   :  { %2253 = vmatpush.msrb.mxu3 %v2230_v1  ;;  %2293 = vmatpush.msra.mxu1 %v2230_v1 }
 0x8f1   :  { %2392 = vmatpush.msra.mxu0 %v2230_v1  ;;  %v3118_v1 = vld [vmem:[%s4472_s5 + $0x60] sm:$0xff] }
 0x8f2   :  { %2254 = vmatpush.msrb.mxu3 %v2229_v2  ;;  %2294 = vmatpush.msra.mxu1 %v2229_v2  ;;  %v3124_v12 = vld [vmem:[%s4473_s3 + $0x10] sm:$0xff]  ;;  %v2450_v16 = vld [vmem:[%s4473_s3] sm:$0xff]  ;;  %v3112_v57 = vld [vmem:[%s4473_s3 + $0x8] sm:$0xff] }
 0x8f3   :  { %2393 = vmatpush.msra.mxu0 %v2229_v2  ;;  %v3117_v2 = vld [vmem:[%s4472_s5 + $0x58] sm:$0xff] }
 0x8f4   :  { %2255 = vmatpush.msrb.mxu3 %v2228_v4  ;;  %2295 = vmatpush.msra.mxu1 %v2228_v4 }
 0x8f5   :  { %2394 = vmatpush.msra.mxu0 %v2228_v4  ;;  %3083 = vmatmul.msk.f32.vlgmr.msrb.gmra.mxu3 %vm319_vm0, %v2232_v5  ;;  %v3116_v4 = vld [vmem:[%s4472_s5 + $0x50] sm:$0xff]  ;;  %v3129_v5 = vld [vmem:[%s4472_s5 + $0x98] sm:$0xff] }
 0x8f6   :  { %3085 = vmatmul.msk.f32.vlgmr.msra.gmra.mxu1 %vm319_vm0, %v2272_v6  ;;  %3099 = vmatmul.msk.f32.vlgmr.msra.gmra.mxu0 %vm319_vm0, %v2371_v7  ;;  %v2474_v6 = vld [vmem:[%s4472_s5] sm:$0xff]  ;;  %v3115_v7 = vld [vmem:[%s4472_s5 + $0x48] sm:$0xff] }
 0x8f7   :  { %2355 = vmatpush.msra.mxu3 %v2270_v8  ;;  %2425 = vmatpush.msrb.mxu1 %v3108_v9  ;;  %v3128_v8 = vld [vmem:[%s4472_s5 + $0x90] sm:$0xff]  ;;  %v3114_v9 = vld [vmem:[%s4472_s5 + $0x40] sm:$0xff] }
 0x8f8   :  { %2550 = vmatpush.msrb.mxu0 %v2481_v22 }
 0x8f9   :  { %2356 = vmatpush.msra.mxu3 %v2269_v10  ;;  %2426 = vmatpush.msrb.mxu1 %v3107_v11  ;;  %v3127_v10 = vld [vmem:[%s4472_s5 + $0x88] sm:$0xff]  ;;  %v3126_v11 = vld [vmem:[%s4472_s5 + $0x80] sm:$0xff] }
 0x8fa   :  { %2551 = vmatpush.msrb.mxu0 %v2480_v58 }
 0x8fb   :  { %2357 = vmatpush.msra.mxu3 %v2268_v13  ;;  %2427 = vmatpush.msrb.mxu1 %v3106_v14 }
 0x8fc   :  { %2552 = vmatpush.msrb.mxu0 %v2479_v59 }
 0x8fd   :  { %3084 = vmatmul.msk.f32.gmra.mxu3 %vm319_vm0, %v2233_v15  ;;  %2428 = vmatpush.msrb.mxu1 %v3105_v27 }
 0x8fe   :  { %3086 = vmatmul.msk.f32.gmra.mxu1 %vm319_vm0, %v2273_v17  ;;  %3100 = vmatmul.msk.f32.gmra.mxu0 %vm319_vm0, %v2372_v18  ;;  %v2657_v17 = vld [vmem:[%s4474_s7 + $0x38] sm:$0xff]  ;;  %v2656_v18 = vld [vmem:[%s4474_s7 + $0x30] sm:$0xff] }
 0x8ff   :  { %2358 = vmatpush.msra.mxu3 %v2267_v20  ;;  %2429 = vmatpush.msrb.mxu1 %v3104_v28  ;;  %v2655_v20 = vld [vmem:[%s4474_s7 + $0x28] sm:$0xff] }
 0x900   :  { %2553 = vmatpush.msrb.mxu0 %v2478_v60 }
 0x901   :  { %2359 = vmatpush.msra.mxu3 %v2266_v21  ;;  %2430 = vmatpush.msrb.mxu1 %v3103_v29  ;;  %v2654_v21 = vld [vmem:[%s4474_s7 + $0x20] sm:$0xff] }
 0x902   :  { %2554 = vmatpush.msrb.mxu0 %v2477_v61 }
 0x903   :  { %2360 = vmatpush.msra.mxu3 %v2265_v23  ;;  %2431 = vmatpush.msrb.mxu1 %v3102_v30  ;;  %v2653_v23 = vld [vmem:[%s4474_s7 + $0x18] sm:$0xff]  ;;  %v3198_v30 = vld [vmem:[#allocation17] ss:$0 sm:$0xff] }
 0x904   :  { %2555 = vmatpush.msrb.mxu0 %v2476_v62 }
 0x905   :  { %2361 = vmatpush.msra.mxu3 %v2264_v24  ;;  %2432 = vmatpush.msrb.mxu1 %v3101_v31  ;;  %v2652_v24 = vld [vmem:[%s4474_s7 + $0x10] sm:$0xff] }
 0x906   :  { %2556 = vmatpush.msrb.mxu0 %v2475_v0 }
 0x907   :  { %2362 = vmatpush.msra.mxu3 %v2263_v26 }
 0x908   :  { %2557 = vmatpush.msrb.mxu0 %v2474_v6 }
 0x909   :  { %2527 = vmatpush.msrb.mxu3 %v3121_v37 }
 0x90a   :  { %2673 = vmatpush.msra.mxu0 %v2657_v17 }
 0x90b   :  { %2528 = vmatpush.msrb.mxu3 %v3120_v38 }
 0x90c   :  { %2674 = vmatpush.msra.mxu0 %v2656_v18 }
 0x90d   :  { %2529 = vmatpush.msrb.mxu3 %v3119_v40 }
 0x90e   :  { %2675 = vmatpush.msra.mxu0 %v2655_v20 }
 0x90f   :  { %2530 = vmatpush.msrb.mxu3 %v3118_v1 }
 0x910   :  { %2676 = vmatpush.msra.mxu0 %v2654_v21 }
 0x911   :  { %2531 = vmatpush.msrb.mxu3 %v3117_v2 }
 0x912   :  { %2677 = vmatpush.msra.mxu0 %v2653_v23 }
 0x913   :  { %2532 = vmatpush.msrb.mxu3 %v3116_v4 }
 0x914   :  { %2678 = vmatpush.msra.mxu0 %v2652_v24 }
 0x915   :  { %2533 = vmatpush.msrb.mxu3 %v3115_v7 }
 0x916   :  { %2679 = vmatpush.msra.mxu0 %v2651_v25 }
 0x917   :  { %2534 = vmatpush.msrb.mxu3 %v3114_v9 }
 0x973   :  { %v2297_v32 = vpop.f32.mrf.mxu1  ;;  %v2396_v33 = vpop.f32.mrf.mxu0 }
 0x974   :  { %3095 = vmatmul.msk.f32.vlgmr.msra.gmra.mxu2 %vm424_vm1, %v2297_v32  ;;  %3109 = vmatmul.msk.f32.vlgmr.msrb.gmra.mxu1 %vm424_vm1, %v2396_v33 }
 0x978   :  { %v2257_v49 = vpop.f32.mrf.mxu3 }
 0x979   :  { %3097 = vmatmul.msk.f32.vlgmr.msra.gmra.mxu3 %vm424_vm1, %v2257_v49  ;;  %v2626_v49 = vld [vmem:[#allocation19] sm:$0x3] }
 0x97b   :  { %v2300_v34 = vpop.f32.mrf.mxu1  ;;  %v2399_v35 = vpop.f32.mrf.mxu0 }
 0x97c   :  { %3096 = vmatmul.msk.f32.gmra.mxu2 %vm424_vm1, %v2300_v34  ;;  %3110 = vmatmul.msk.f32.gmra.mxu1 %vm424_vm1, %v2399_v35  ;;  %v2650_v34 = vld [vmem:[%s4474_s7] sm:$0xff] }
 0x97d   :  { %2680 = vmatpush.msra.mxu0 %v2650_v34 }
 0x980   :  { %v2260_v52 = vpop.f32.mrf.mxu3 }
 0x981   :  { %3098 = vmatmul.msk.f32.gmra.mxu3 %vm424_vm1, %v2260_v52  ;;  %v3199_v52 = vld [vmem:[#allocation20] ss:$0 sm:$0xff] }
 0x9f1   :  { %v2434_v39 = vpop.f32.mrf.mxu1 }
 0x9f7   :  { %v2335_v36 = vpop.f32.mrf.mxu2 }
 0x9f9   :  { %v2437_v45 = vpop.f32.mrf.mxu1 }
 0x9fc   :  { %v2364_v41 = vpop.f32.mrf.mxu3 }
 0x9fd   :  { %v2365_v42 = vadd.f32 %v2364_v41, %v2335_v36 }
 0x9ff   :  { %v2338_v43 = vpop.f32.mrf.mxu2  ;;  %v2440_v46 = vadd.f32 %v2434_v39, %v2365_v42 }
 0xa01   :  { %v2446_v51 = vadd.f32 %v3197_v47, %v2440_v46 }
 0xa03   :  { %v2448_v55 = vmax.f32 %v2446_v51, 0.0 }
 0xa04   :  { %v2367_v44 = vpop.f32.mrf.mxu3 }
 0xa05   :  { %v2368_v48 = vadd.f32 %v2367_v44, %v2338_v43 }
 0xa07   :  { %v2441_v50 = vadd.f32 %v2437_v45, %v2368_v48 }
 0xa09   :  { %v2447_v53 = vadd.f32 %v3197_v47, %v2441_v50 }
 0xa0b   :  { %v2449_v54 = vmax.f32 %v2447_v53, 0.0 }
 0xa0d   :  { %2468 = vmatpush.msrb.mxu2 %v2449_v54  ;;  %2581 = vmatpush.msra.mxu1 %v2449_v54 }
 0xa0f   :  { %2469 = vmatpush.msrb.mxu2 %v2448_v55  ;;  %2582 = vmatpush.msra.mxu1 %v2448_v55 }
 0xa10   :  { %3125 = vmatmul.msk.f32.vlgmr.msra.gmra.mxu1 %vm844_vm2, %v3124_v12  ;;  %3111 = vmatmul.msk.f32.vlgmr.msrb.gmra.mxu2 %vm844_vm2, %v2450_v16 }
 0xa11   :  { %2501 = vmatpush.msra.mxu2 %v2449_v54 }
 0xa13   :  { %2502 = vmatpush.msra.mxu2 %v2448_v55 }
 0xa15   :  { %2607 = vmatpush.msrb.mxu2 %v3133_v19 }
 0xa17   :  { %2608 = vmatpush.msrb.mxu2 %v3132_v56 }
 0xa18   :  { %3113 = vmatmul.msk.f32.vlgmr.msra.gmra.mxu2 %vm844_vm2, %v3112_v57 }
 0xa19   :  { %2609 = vmatpush.msrb.mxu2 %v3131_v63 }
 0xa1b   :  { %2610 = vmatpush.msrb.mxu2 %v3130_v3 }
 0xa1d   :  { %2611 = vmatpush.msrb.mxu2 %v3129_v5 }
 0xa1f   :  { %2612 = vmatpush.msrb.mxu2 %v3128_v8 }
 0xa21   :  { %2613 = vmatpush.msrb.mxu2 %v3127_v10 }
 0xa23   :  { %2614 = vmatpush.msrb.mxu2 %v3126_v11 }
 0xa8d   :  { %v2584_v13 = vpop.f32.mrf.mxu1 }
 0xa8e   :  { %3134 = vmatmul.msk.f32.vlgmr.msrb.gmra.mxu2 %vm424_vm1, %v2584_v13 }
 0xa93   :  { %v2471_v14 = vpop.f32.mrf.mxu2 }
 0xa94   :  { %3123 = vmatmul.msk.f32.vlgmr.msrb.gmra.mxu0 %vm424_vm1, %v2471_v14 }
 0xa9b   :  { %v2504_v15 = vpop.f32.mrf.mxu2 }
 0xa9c   :  { %3122 = vmatmul.msk.f32.vlgmr.msrb.gmra.mxu3 %vm424_vm1, %v2504_v15 }
 0xb11   :  { %v2616_v26 = vpop.f32.mrf.mxu2  ;;  %v2559_v28 = vpop.f32.mrf.mxu0 }
 0xb1f   :  { %v2536_v27 = vpop.f32.mrf.mxu3 }
 0xb20   :  { %v2560_v29 = vadd.f32 %v2559_v28, %v2536_v27 }
 0xb22   :  { %v2619_v31 = vadd.f32 %v2616_v26, %v2560_v29 }
 0xb24   :  { %v2624_v32 = vadd.f32 %v3198_v30, %v2619_v31 }
 0xb26   :  { %v2625_v33 = vmax.f32 %v2624_v32, 0.0 }
 0xb28   :  { %2645 = vmatpush.msra.mxu3 %v2625_v33 }
 0xb29   :  { %3135 = vmatmul.msk.f32.vlgmr.msra.gmra.mxu3 %vm1036_vm3, %v2626_v49 }
 0xbac   :  { %v2647_v35 = vpop.f32.mrf.mxu3 }
 0xbad   :  { %3136 = vmatmul.msk.f32.vlgmr.msra.gmra.mxu0 %vm424_vm1, %v2647_v35 }
 0xc2a   :  { %v2682_v36 = vpop.f32.mrf.mxu0 }
 0xc2b   :  { %v2683_v37 = vadd.f32 %v3199_v52, %v2682_v36 }
 0xc2d   :  { %2693 = vst.msk [vmem:[#allocation22] sm:$0x3] %vm2692_vm4, %v2683_v37 }
 0xc2e   :  { %3515 = shalt.err (!%p3512_p8)
}
 0xc2f   :  { %2710 = dma.vmem_to_hbm [thread:$0]  %s2706_s6, 32, %s2708_s4, [#allocation4]  }
 0xc30   :  { %3530 = dma.done.wait [#allocation4], 32  }
 0xc31   :  { %3531 = vsyncadd [#allocation4], 4294967264 }
 0xc32   :  { %2721 = vsyncpa [#allocation3], 1 }
 0xc33   :  { %2722 = vsyncpa [#allocation6], 1 }
 0xc34   :  { %2723 = vsyncpa [#allocation9], 1 }
 0xc35   :  { %2724 = vsyncpa [#allocation12], 1 }
 0xc36   :  { %2725 = vsyncpa [#allocation15], 1 }
 0xc37   :  { %2726 = vsyncpa [#allocation18], 1 }
 0xc38   :  { %2727 = vsyncpa [#allocation21], 1 }
 0xc39   :  { %2728 = vsyncpa [#allocation4], 1 }

</bundles_post_ra>
